<compile_context>
chip_gen: v6e
topology: v6e:2x2x1
jax: 0.10.0
libtpu: 0.0.40
codegen_flags: <defaults>
</compile_context>

<pallas_src>
import numpy as np
import jax
import jax.numpy as jnp
from jax.experimental import pallas as pl
from jax.experimental.pallas import tpu as pltpu

# ---- hyperparameters (small, consistent with the module) -------------------
NUM_MELS  = 32     # hp.model.num_mels
DIM_MODEL = 64     # hp.model.dim_model
N_CONVS   = 5      # hp.model.n_postnet_convolutions
N_MID     = N_CONVS - 2
KSIZE     = 5
PAD       = (KSIZE - 1) // 2
BN_EPS    = 1e-5
BATCH     = 2
SEQ_LEN   = 8

LANES  = 128                      # channel dims zero-padded to one lane tile
LEFT   = 8                        # left zero-pad rows  (>= PAD, multiple of 8)
RIGHT  = 8                        # right zero-pad rows (>= PAD)
STRIPE = LEFT + SEQ_LEN + RIGHT   # rows owned by one sequence in the slab
NROWS  = BATCH * STRIPE

# Alignment / correctness invariants (incl. the roll-variant invariants from the review:
# wrap-around contributions of pltpu.roll may only land in never-read padding rows).
assert PAD <= LEFT and PAD <= RIGHT
assert LEFT % 8 == 0 and STRIPE % 8 == 0 and SEQ_LEN % 8 == 0
assert NUM_MELS <= LANES and DIM_MODEL <= LANES


# ---------------------------- Pallas kernel ---------------------------------
def postnet_kernel(x_ref, w_hbm, shift_ref, o_ref, wbuf, sem, act_ref):
    # act_ref: (B*STRIPE, 128) f32 activation slab kept in VMEM across all 5 layers.
    #          Each sequence owns a STRIPE-row stripe; rows [LEFT, LEFT+T) carry data,
    #          surrounding rows stay zero forever and provide 'same' padding each layer.
    # w_hbm:   (N_CONVS, K*128, 128) f32 weights, left in HBM (pl.ANY).
    # wbuf:    (2, K*128, 128) VMEM double buffer for one layer's weights.

    def fetch(layer, slot):
        return pltpu.make_async_copy(w_hbm.at[layer], wbuf.at[slot], sem.at[slot])

    fetch(0, 0).start()                        # layer-0 weights in flight during slab init

    act_ref[...] = jnp.zeros_like(act_ref)
    for b in range(BATCH):
        r0 = b * STRIPE + LEFT
        act_ref[r0:r0 + SEQ_LEN, 0:NUM_MELS] = x_ref[b].astype(jnp.float32)

    for l in range(N_CONVS):
        slot = l & 1
        if l + 1 < N_CONVS:
            fetch(l + 1, 1 - slot).start()     # overlap next layer's weight DMA with compute
        fetch(l, slot).wait()

        # Conv as 5 aligned per-tap MXU matmuls over the whole slab; the tap offset is
        # realised with pltpu.roll (XLU) instead of unaligned sublane slices/concats.
        # Roll wrap-around only pollutes padding rows (never read), since LEFT,RIGHT >= PAD.
        slab = act_ref[...]
        y = jnp.dot(slab, wbuf[slot, PAD * LANES:(PAD + 1) * LANES, :],
                    preferred_element_type=jnp.float32)
        for k in range(KSIZE):
            if k == PAD:
                continue
            shifted = pltpu.roll(slab, shift=(PAD - k) % NROWS, axis=0)
            y = y + jnp.dot(shifted, wbuf[slot, k * LANES:(k + 1) * LANES, :],
                            preferred_element_type=jnp.float32)

        # BN scale + conv bias folded into weights/shift on the host; only the shift add
        # (and tanh for the first N-1 layers) remains. All stores are aligned, full-lane.
        shift = shift_ref[l:l + 1, :]                      # (1, 128)
        for b in range(BATCH):
            r0 = b * STRIPE + LEFT
            h = y[r0:r0 + SEQ_LEN, :] + shift
            if l < N_CONVS - 1:
                act_ref[r0:r0 + SEQ_LEN, :] = jnp.tanh(h)  # padded lanes stay exactly 0
            else:
                o_ref[b * SEQ_LEN:(b + 1) * SEQ_LEN, :] = h.astype(o_ref.dtype)
    # TODO(synk): training-mode Dropout(0.5) RNG masks intentionally omitted (eval mode).


# ---------------------------- wrapper ----------------------------------------
def postnet_pallas(x, fp):
    B, T, M = x.shape
    NT = B * T
    # VMEM budget (v7x-safe): weight double buffer 2*640*128*4 B ~= 0.64 MiB,
    # slab 48*128*4 B ~= 24 KiB, in/out blocks < 40 KiB  -> far below the 32 MiB default.
    out_flat = pl.pallas_call(
        postnet_kernel,
        out_shape=jax.ShapeDtypeStruct((NT, LANES), x.dtype),
        grid_spec=pltpu.PrefetchScalarGridSpec(
            num_scalar_prefetch=0,
            grid=(1,),
            in_specs=[
                pl.BlockSpec((B, T, M), lambda i: (0, 0, 0)),
                pl.BlockSpec(memory_space=pl.ANY),           # weights stay in HBM; manual DMA
                pl.BlockSpec((N_CONVS, LANES), lambda i: (0, 0)),
            ],
            out_specs=pl.BlockSpec((NT, LANES), lambda i: (0, 0)),
            scratch_shapes=[
                pltpu.VMEM((2, KSIZE * LANES, LANES), jnp.float32),   # weight double buffer
                pltpu.SemaphoreType.DMA((2,)),
                pltpu.VMEM((BATCH * STRIPE, LANES), jnp.float32),     # activation slab
            ],
        ),
        # Single grid step on one TensorCore; strict layer dependency -> no cross-TC split.
        compiler_params=pltpu.CompilerParams(dimension_semantics=("arbitrary",)),
    )(x, fp["w"], fp["shift"])
    return out_flat[:, :M].reshape(B, T, M)


# ---------------------------- parameters --------------------------------------
def init_params(key):
    keys = jax.random.split(key, 2 * N_CONVS + 8)
    kit = iter(keys)
    conv_w, conv_b = [], []
    dims = [(DIM_MODEL, NUM_MELS)] + [(DIM_MODEL, DIM_MODEL)] * N_MID + [(NUM_MELS, DIM_MODEL)]
    gains = [5.0 / 3.0] * (N_CONVS - 1) + [1.0]   # xavier_uniform: 'tanh' / 'linear'
    for (cout, cin), gain in zip(dims, gains):
        fan_in, fan_out = cin * KSIZE, cout * KSIZE
        wb = gain * np.sqrt(6.0 / (fan_in + fan_out))
        conv_w.append(jax.random.uniform(next(kit), (cout, cin, KSIZE), jnp.float32, -wb, wb))
        bb = 1.0 / np.sqrt(fan_in)
        conv_b.append(jax.random.uniform(next(kit), (cout,), jnp.float32, -bb, bb))

    def bn(c):   # synthetic eval-mode BatchNorm1d stats
        return dict(gamma=1.0 + 0.1 * jax.random.normal(next(kit), (c,), jnp.float32),
                    beta=0.1 * jax.random.normal(next(kit), (c,), jnp.float32),
                    mean=0.05 * jax.random.normal(next(kit), (c,), jnp.float32),
                    var=jnp.abs(0.5 + 0.1 * jax.random.normal(next(kit), (c,), jnp.float32)))

    return dict(conv_w=conv_w, conv_b=conv_b, bn=bn(DIM_MODEL), bn_last=bn(NUM_MELS))


def fold_params(p):
    """Host-side: fold BN (+conv bias) into per-channel affine, fold the BN scale into the
    packed weight columns, zero-pad channel dims to 128 lanes, stack all layers."""
    def fold_affine(bn, bias):
        scale = bn["gamma"] * jax.lax.rsqrt(bn["var"] + BN_EPS)
        shift = bn["beta"] + scale * (bias - bn["mean"])   # conv bias folded into the shift
        return scale, shift

    def pack_w(w_torch, scale):     # (Cout, Cin, K) torch layout -> (K*128, 128), scale folded
        cout, cin, k = w_torch.shape
        w = jnp.transpose(w_torch, (2, 1, 0)) * scale[None, None, :]   # (K, Cin, Cout)
        w = jnp.pad(w, ((0, 0), (0, LANES - cin), (0, LANES - cout)))
        return w.reshape(k * LANES, LANES)

    ws, shifts = [], []
    for j in range(N_CONVS):
        bn = p["bn"] if j < N_CONVS - 1 else p["bn_last"]
        scale, shift = fold_affine(bn, p["conv_b"][j])
        ws.append(pack_w(p["conv_w"][j], scale))
        shifts.append(jnp.pad(shift, (0, LANES - shift.shape[0])))
    # NOTE: weights kept in f32 — bf16 would halve HBM traffic but breaks 1e-4 parity with
    # the f32 reference; the manual double buffer already hides the weight DMA anyway.
    return dict(w=jnp.stack(ws),           # (N_CONVS, K*128, 128)
                shift=jnp.stack(shifts))   # (N_CONVS, 128)


# ---------------------------- reference (mirrors PyTorch forward) --------------
def postnet_ref(x, p):
    h = jnp.transpose(x, (0, 2, 1))                              # x.transpose(1, 2)

    def bn_eval(h, bn):
        inv = jax.lax.rsqrt(bn["var"] + BN_EPS)
        return ((h - bn["mean"][None, :, None]) * inv[None, :, None]
                * bn["gamma"][None, :, None] + bn["beta"][None, :, None])

    for i in range(N_CONVS - 1):
        h = jax.lax.conv_general_dilated(
            h, p["conv_w"][i], (1,), [(PAD, PAD)],
            dimension_numbers=("NCH", "OIH", "NCH"),
            precision=jax.lax.Precision.HIGHEST)
        h = h + p["conv_b"][i][None, :, None]
        h = jnp.tanh(bn_eval(h, p["bn"]))                        # dropout = identity (eval)
    h = jax.lax.conv_general_dilated(
        h, p["conv_w"][N_CONVS - 1], (1,), [(PAD, PAD)],
        dimension_numbers=("NCH", "OIH", "NCH"),
        precision=jax.lax.Precision.HIGHEST)
    h = h + p["conv_b"][N_CONVS - 1][None, :, None]
    h = bn_eval(h, p["bn_last"])                                 # dropout = identity (eval)
    return jnp.transpose(h, (0, 2, 1))


if __name__ == "__main__":
    key = jax.random.PRNGKey(0)
    pkey, xkey = jax.random.split(key)
    params = init_params(pkey)
    x = jax.random.normal(xkey, (BATCH, SEQ_LEN, NUM_MELS), jnp.float32)

    folded = fold_params(params)
    out = jax.block_until_ready(postnet_pallas(x, folded))

    ref = jax.block_until_ready(postnet_ref(x, params))
    np.testing.assert_allclose(np.asarray(out), np.asarray(ref), rtol=1e-4, atol=1e-4)
    assert out.shape == (BATCH, SEQ_LEN, NUM_MELS)
    print("KERNEL_OK")
</pallas_src>

<mosaic_0001>
module attributes {stable_mosaic.version = 11 : i64} {
  func.func @postnet_kernel(%arg0: i32, %arg1: memref<2x8x32xf32, #tpu.memory_space<vmem>>, %arg2: memref<5x640x128xf32, #tpu.memory_space<any>>, %arg3: memref<5x128xf32, #tpu.memory_space<vmem>>, %arg4: memref<16x128xf32, #tpu.memory_space<vmem>>, %arg5: memref<2x640x128xf32, #tpu.memory_space<vmem>>, %arg6: memref<2x!tpu.dma_semaphore, #tpu.memory_space<semaphore_mem>>, %arg7: memref<48x128xf32, #tpu.memory_space<vmem>>) attributes {dimension_semantics = [#tpu.dimension_semantics<arbitrary>], iteration_bounds = array<i64: 1>, scalar_prefetch = 0 : i64, scratch_operands = 3 : i64, tpu.core_type = #tpu.core_type<tc>, window_params = [{pipeline_mode = #tpu.pipeline_mode<synchronous>, transform_indices = @transform_0, window_bounds = array<i64: 2, 8, 32>}, {}, {pipeline_mode = #tpu.pipeline_mode<synchronous>, transform_indices = @transform_2, window_bounds = array<i64: 5, 128>}, {pipeline_mode = #tpu.pipeline_mode<synchronous>, transform_indices = @transform_3, window_bounds = array<i64: 16, 128>}]} {
    %c0_i32 = arith.constant 0 : i32
    %c0_i32_0 = arith.constant 0 : i32
    %c0_i32_1 = arith.constant 0 : i32
    %c0_i32_2 = arith.constant 0 : i32
    %c0_i32_3 = arith.constant 0 : i32
    %0 = tpu.memref_slice %arg2[%c0_i32, %c0_i32_2, %c0_i32_3] : memref<5x640x128xf32, #tpu.memory_space<any>> -> memref<1x640x128xf32, #tpu.memory_space<any>>
    %1 = tpu.memref_squeeze %0 : memref<1x640x128xf32, #tpu.memory_space<any>> -> memref<640x128xf32, #tpu.memory_space<any>>
    %c0_i32_4 = arith.constant 0 : i32
    %c0_i32_5 = arith.constant 0 : i32
    %2 = tpu.memref_slice %arg5[%c0_i32_0, %c0_i32_4, %c0_i32_5] : memref<2x640x128xf32, #tpu.memory_space<vmem>> -> memref<1x640x128xf32, #tpu.memory_space<vmem>>
    %3 = tpu.memref_squeeze %2 : memref<1x640x128xf32, #tpu.memory_space<vmem>> -> memref<640x128xf32, #tpu.memory_space<vmem>>
    %4 = tpu.memref_slice %arg6[%c0_i32_1] : memref<2x!tpu.dma_semaphore, #tpu.memory_space<semaphore_mem>> -> memref<1x!tpu.dma_semaphore, #tpu.memory_space<semaphore_mem>>
    %5 = tpu.memref_squeeze %4 : memref<1x!tpu.dma_semaphore, #tpu.memory_space<semaphore_mem>> -> memref<!tpu.dma_semaphore, #tpu.memory_space<semaphore_mem>>
    tpu.enqueue_dma source(%1 : memref<640x128xf32, #tpu.memory_space<any>>) target(%3 : memref<640x128xf32, #tpu.memory_space<vmem>>) target_semaphore(%5 : memref<!tpu.dma_semaphore, #tpu.memory_space<semaphore_mem>>)
    %cst = arith.constant 0.000000e+00 : f32
    %6 = vector.broadcast %cst : f32 to vector<48x128xf32>
    %c0 = arith.constant 0 : index
    %c0_6 = arith.constant 0 : index
    %7 = vector.load %arg7[%c0, %c0_6] : memref<48x128xf32, #tpu.memory_space<vmem>>, vector<48x128xf32>
    tpu.vector_store %arg7[%c0, %c0_6], %6 {strides = array<i32>} : memref<48x128xf32, #tpu.memory_space<vmem>>, vector<48x128xf32>,
    %c0_7 = arith.constant 0 : index
    %c0_8 = arith.constant 0 : index
    %c0_9 = arith.constant 0 : index
    %8 = vector.load %arg1[%c0_7, %c0_8, %c0_9] : memref<2x8x32xf32, #tpu.memory_space<vmem>>, vector<1x8x32xf32>
    %9 = vector.shape_cast %8 : vector<1x8x32xf32> to vector<8x32xf32>
    %c8 = arith.constant 8 : index
    %c0_10 = arith.constant 0 : index
    %10 = vector.load %arg7[%c8, %c0_10] : memref<48x128xf32, #tpu.memory_space<vmem>>, vector<8x32xf32>
    tpu.vector_store %arg7[%c8, %c0_10], %9 {strides = array<i32>} : memref<48x128xf32, #tpu.memory_space<vmem>>, vector<8x32xf32>,
    %c1 = arith.constant 1 : index
    %c0_11 = arith.constant 0 : index
    %c0_12 = arith.constant 0 : index
    %11 = vector.load %arg1[%c1, %c0_11, %c0_12] : memref<2x8x32xf32, #tpu.memory_space<vmem>>, vector<1x8x32xf32>
    %12 = vector.shape_cast %11 : vector<1x8x32xf32> to vector<8x32xf32>
    %c32 = arith.constant 32 : index
    %c0_13 = arith.constant 0 : index
    %13 = vector.load %arg7[%c32, %c0_13] : memref<48x128xf32, #tpu.memory_space<vmem>>, vector<8x32xf32>
    tpu.vector_store %arg7[%c32, %c0_13], %12 {strides = array<i32>} : memref<48x128xf32, #tpu.memory_space<vmem>>, vector<8x32xf32>,
    %c1_i32 = arith.constant 1 : i32
    %c1_i32_14 = arith.constant 1 : i32
    %c1_i32_15 = arith.constant 1 : i32
    %c0_i32_16 = arith.constant 0 : i32
    %c0_i32_17 = arith.constant 0 : i32
    %14 = tpu.memref_slice %arg2[%c1_i32, %c0_i32_16, %c0_i32_17] : memref<5x640x128xf32, #tpu.memory_space<any>> -> memref<1x640x128xf32, #tpu.memory_space<any>>
    %15 = tpu.memref_squeeze %14 : memref<1x640x128xf32, #tpu.memory_space<any>> -> memref<640x128xf32, #tpu.memory_space<any>>
    %c0_i32_18 = arith.constant 0 : i32
    %c0_i32_19 = arith.constant 0 : i32
    %16 = tpu.memref_slice %arg5[%c1_i32_14, %c0_i32_18, %c0_i32_19] : memref<2x640x128xf32, #tpu.memory_space<vmem>> -> memref<1x640x128xf32, #tpu.memory_space<vmem>>
    %17 = tpu.memref_squeeze %16 : memref<1x640x128xf32, #tpu.memory_space<vmem>> -> memref<640x128xf32, #tpu.memory_space<vmem>>
    %18 = tpu.memref_slice %arg6[%c1_i32_15] : memref<2x!tpu.dma_semaphore, #tpu.memory_space<semaphore_mem>> -> memref<1x!tpu.dma_semaphore, #tpu.memory_space<semaphore_mem>>
    %19 = tpu.memref_squeeze %18 : memref<1x!tpu.dma_semaphore, #tpu.memory_space<semaphore_mem>> -> memref<!tpu.dma_semaphore, #tpu.memory_space<semaphore_mem>>
    tpu.enqueue_dma source(%15 : memref<640x128xf32, #tpu.memory_space<any>>) target(%17 : memref<640x128xf32, #tpu.memory_space<vmem>>) target_semaphore(%19 : memref<!tpu.dma_semaphore, #tpu.memory_space<semaphore_mem>>)
    %c0_i32_20 = arith.constant 0 : i32
    %c0_i32_21 = arith.constant 0 : i32
    %c0_i32_22 = arith.constant 0 : i32
    %c0_i32_23 = arith.constant 0 : i32
    %c0_i32_24 = arith.constant 0 : i32
    %20 = tpu.memref_slice %arg2[%c0_i32_20, %c0_i32_23, %c0_i32_24] : memref<5x640x128xf32, #tpu.memory_space<any>> -> memref<1x640x128xf32, #tpu.memory_space<any>>
    %21 = tpu.memref_squeeze %20 : memref<1x640x128xf32, #tpu.memory_space<any>> -> memref<640x128xf32, #tpu.memory_space<any>>
    %c0_i32_25 = arith.constant 0 : i32
    %c0_i32_26 = arith.constant 0 : i32
    %22 = tpu.memref_slice %arg5[%c0_i32_21, %c0_i32_25, %c0_i32_26] : memref<2x640x128xf32, #tpu.memory_space<vmem>> -> memref<1x640x128xf32, #tpu.memory_space<vmem>>
    %23 = tpu.memref_squeeze %22 : memref<1x640x128xf32, #tpu.memory_space<vmem>> -> memref<640x128xf32, #tpu.memory_space<vmem>>
    %24 = tpu.memref_slice %arg6[%c0_i32_22] : memref<2x!tpu.dma_semaphore, #tpu.memory_space<semaphore_mem>> -> memref<1x!tpu.dma_semaphore, #tpu.memory_space<semaphore_mem>>
    %25 = tpu.memref_squeeze %24 : memref<1x!tpu.dma_semaphore, #tpu.memory_space<semaphore_mem>> -> memref<!tpu.dma_semaphore, #tpu.memory_space<semaphore_mem>>
    tpu.wait_dma2 semaphore(%25 : memref<!tpu.dma_semaphore, #tpu.memory_space<semaphore_mem>>) src(%21 : memref<640x128xf32, #tpu.memory_space<any>>) dst(%23 : memref<640x128xf32, #tpu.memory_space<vmem>>)
    %c0_27 = arith.constant 0 : index
    %c0_28 = arith.constant 0 : index
    %26 = vector.load %arg7[%c0_27, %c0_28] : memref<48x128xf32, #tpu.memory_space<vmem>>, vector<48x128xf32>
    %c0_29 = arith.constant 0 : index
    %c256 = arith.constant 256 : index
    %c0_30 = arith.constant 0 : index
    %27 = vector.load %arg5[%c0_29, %c256, %c0_30] : memref<2x640x128xf32, #tpu.memory_space<vmem>>, vector<1x128x128xf32>
    %28 = vector.shape_cast %27 : vector<1x128x128xf32> to vector<128x128xf32>
    %cst_31 = arith.constant dense<0.000000e+00> : vector<48x128xf32>
    %29 = tpu.matmul %26, %28, %cst_31 {dimension_numbers = #tpu.dot_dimension_numbers<[1], [0], [0], [1], [0, 0, 1, 1], [], []>} : vector<48x128xf32>, vector<128x128xf32>, vector<48x128xf32> -> vector<48x128xf32>
    %c2_i32 = arith.constant 2 : i32
    %30 = tpu.dynamic_rotate %26 by %c2_i32 dim 0 : vector<48x128xf32>, i32 -> vector<48x128xf32>
    %c0_32 = arith.constant 0 : index
    %c0_33 = arith.constant 0 : index
    %c0_34 = arith.constant 0 : index
    %31 = vector.load %arg5[%c0_32, %c0_33, %c0_34] : memref<2x640x128xf32, #tpu.memory_space<vmem>>, vector<1x128x128xf32>
    %32 = vector.shape_cast %31 : vector<1x128x128xf32> to vector<128x128xf32>
    %cst_35 = arith.constant dense<0.000000e+00> : vector<48x128xf32>
    %33 = tpu.matmul %30, %32, %cst_35 {dimension_numbers = #tpu.dot_dimension_numbers<[1], [0], [0], [1], [0, 0, 1, 1], [], []>} : vector<48x128xf32>, vector<128x128xf32>, vector<48x128xf32> -> vector<48x128xf32>
    %34 = arith.addf %29, %33 : vector<48x128xf32>
    %c1_i32_36 = arith.constant 1 : i32
    %35 = tpu.dynamic_rotate %26 by %c1_i32_36 dim 0 : vector<48x128xf32>, i32 -> vector<48x128xf32>
    %c0_37 = arith.constant 0 : index
    %c128 = arith.constant 128 : index
    %c0_38 = arith.constant 0 : index
    %36 = vector.load %arg5[%c0_37, %c128, %c0_38] : memref<2x640x128xf32, #tpu.memory_space<vmem>>, vector<1x128x128xf32>
    %37 = vector.shape_cast %36 : vector<1x128x128xf32> to vector<128x128xf32>
    %cst_39 = arith.constant dense<0.000000e+00> : vector<48x128xf32>
    %38 = tpu.matmul %35, %37, %cst_39 {dimension_numbers = #tpu.dot_dimension_numbers<[1], [0], [0], [1], [0, 0, 1, 1], [], []>} : vector<48x128xf32>, vector<128x128xf32>, vector<48x128xf32> -> vector<48x128xf32>
    %39 = arith.addf %34, %38 : vector<48x128xf32>
    %c47_i32 = arith.constant 47 : i32
    %40 = tpu.dynamic_rotate %26 by %c47_i32 dim 0 : vector<48x128xf32>, i32 -> vector<48x128xf32>
    %c0_40 = arith.constant 0 : index
    %c384 = arith.constant 384 : index
    %c0_41 = arith.constant 0 : index
    %41 = vector.load %arg5[%c0_40, %c384, %c0_41] : memref<2x640x128xf32, #tpu.memory_space<vmem>>, vector<1x128x128xf32>
    %42 = vector.shape_cast %41 : vector<1x128x128xf32> to vector<128x128xf32>
    %cst_42 = arith.constant dense<0.000000e+00> : vector<48x128xf32>
    %43 = tpu.matmul %40, %42, %cst_42 {dimension_numbers = #tpu.dot_dimension_numbers<[1], [0], [0], [1], [0, 0, 1, 1], [], []>} : vector<48x128xf32>, vector<128x128xf32>, vector<48x128xf32> -> vector<48x128xf32>
    %44 = arith.addf %39, %43 : vector<48x128xf32>
    %c46_i32 = arith.constant 46 : i32
    %45 = tpu.dynamic_rotate %26 by %c46_i32 dim 0 : vector<48x128xf32>, i32 -> vector<48x128xf32>
    %c0_43 = arith.constant 0 : index
    %c512 = arith.constant 512 : index
    %c0_44 = arith.constant 0 : index
    %46 = vector.load %arg5[%c0_43, %c512, %c0_44] : memref<2x640x128xf32, #tpu.memory_space<vmem>>, vector<1x128x128xf32>
    %47 = vector.shape_cast %46 : vector<1x128x128xf32> to vector<128x128xf32>
    %cst_45 = arith.constant dense<0.000000e+00> : vector<48x128xf32>
    %48 = tpu.matmul %45, %47, %cst_45 {dimension_numbers = #tpu.dot_dimension_numbers<[1], [0], [0], [1], [0, 0, 1, 1], [], []>} : vector<48x128xf32>, vector<128x128xf32>, vector<48x128xf32> -> vector<48x128xf32>
    %49 = arith.addf %44, %48 : vector<48x128xf32>
    %c0_46 = arith.constant 0 : index
    %c0_47 = arith.constant 0 : index
    %50 = vector.load %arg3[%c0_46, %c0_47] : memref<5x128xf32, #tpu.memory_space<vmem>>, vector<1x128xf32>
    %51 = vector.extract_strided_slice %49 {offsets = [8, 0], sizes = [8, 128], strides = [1, 1]} : vector<48x128xf32> to vector<8x128xf32>
    %52 = vector.broadcast %50 : vector<1x128xf32> to vector<8x128xf32>
    %53 = arith.addf %51, %52 : vector<8x128xf32>
    %54 = math.tanh %53 : vector<8x128xf32>
    %c8_48 = arith.constant 8 : index
    %c0_49 = arith.constant 0 : index
    %55 = vector.load %arg7[%c8_48, %c0_49] : memref<48x128xf32, #tpu.memory_space<vmem>>, vector<8x128xf32>
    tpu.vector_store %arg7[%c8_48, %c0_49], %54 {strides = array<i32>} : memref<48x128xf32, #tpu.memory_space<vmem>>, vector<8x128xf32>,
    %56 = vector.extract_strided_slice %49 {offsets = [32, 0], sizes = [8, 128], strides = [1, 1]} : vector<48x128xf32> to vector<8x128xf32>
    %57 = vector.broadcast %50 : vector<1x128xf32> to vector<8x128xf32>
    %58 = arith.addf %56, %57 : vector<8x128xf32>
    %59 = math.tanh %58 : vector<8x128xf32>
    %c32_50 = arith.constant 32 : index
    %c0_51 = arith.constant 0 : index
    %60 = vector.load %arg7[%c32_50, %c0_51] : memref<48x128xf32, #tpu.memory_space<vmem>>, vector<8x128xf32>
    tpu.vector_store %arg7[%c32_50, %c0_51], %59 {strides = array<i32>} : memref<48x128xf32, #tpu.memory_space<vmem>>, vector<8x128xf32>,
    %c2_i32_52 = arith.constant 2 : i32
    %c0_i32_53 = arith.constant 0 : i32
    %c0_i32_54 = arith.constant 0 : i32
    %c0_i32_55 = arith.constant 0 : i32
    %c0_i32_56 = arith.constant 0 : i32
    %61 = tpu.memref_slice %arg2[%c2_i32_52, %c0_i32_55, %c0_i32_56] : memref<5x640x128xf32, #tpu.memory_space<any>> -> memref<1x640x128xf32, #tpu.memory_space<any>>
    %62 = tpu.memref_squeeze %61 : memref<1x640x128xf32, #tpu.memory_space<any>> -> memref<640x128xf32, #tpu.memory_space<any>>
    %c0_i32_57 = arith.constant 0 : i32
    %c0_i32_58 = arith.constant 0 : i32
    %63 = tpu.memref_slice %arg5[%c0_i32_53, %c0_i32_57, %c0_i32_58] : memref<2x640x128xf32, #tpu.memory_space<vmem>> -> memref<1x640x128xf32, #tpu.memory_space<vmem>>
    %64 = tpu.memref_squeeze %63 : memref<1x640x128xf32, #tpu.memory_space<vmem>> -> memref<640x128xf32, #tpu.memory_space<vmem>>
    %65 = tpu.memref_slice %arg6[%c0_i32_54] : memref<2x!tpu.dma_semaphore, #tpu.memory_space<semaphore_mem>> -> memref<1x!tpu.dma_semaphore, #tpu.memory_space<semaphore_mem>>
    %66 = tpu.memref_squeeze %65 : memref<1x!tpu.dma_semaphore, #tpu.memory_space<semaphore_mem>> -> memref<!tpu.dma_semaphore, #tpu.memory_space<semaphore_mem>>
    tpu.enqueue_dma source(%62 : memref<640x128xf32, #tpu.memory_space<any>>) target(%64 : memref<640x128xf32, #tpu.memory_space<vmem>>) target_semaphore(%66 : memref<!tpu.dma_semaphore, #tpu.memory_space<semaphore_mem>>)
    %c1_i32_59 = arith.constant 1 : i32
    %c1_i32_60 = arith.constant 1 : i32
    %c1_i32_61 = arith.constant 1 : i32
    %c0_i32_62 = arith.constant 0 : i32
    %c0_i32_63 = arith.constant 0 : i32
    %67 = tpu.memref_slice %arg2[%c1_i32_59, %c0_i32_62, %c0_i32_63] : memref<5x640x128xf32, #tpu.memory_space<any>> -> memref<1x640x128xf32, #tpu.memory_space<any>>
    %68 = tpu.memref_squeeze %67 : memref<1x640x128xf32, #tpu.memory_space<any>> -> memref<640x128xf32, #tpu.memory_space<any>>
    %c0_i32_64 = arith.constant 0 : i32
    %c0_i32_65 = arith.constant 0 : i32
    %69 = tpu.memref_slice %arg5[%c1_i32_60, %c0_i32_64, %c0_i32_65] : memref<2x640x128xf32, #tpu.memory_space<vmem>> -> memref<1x640x128xf32, #tpu.memory_space<vmem>>
    %70 = tpu.memref_squeeze %69 : memref<1x640x128xf32, #tpu.memory_space<vmem>> -> memref<640x128xf32, #tpu.memory_space<vmem>>
    %71 = tpu.memref_slice %arg6[%c1_i32_61] : memref<2x!tpu.dma_semaphore, #tpu.memory_space<semaphore_mem>> -> memref<1x!tpu.dma_semaphore, #tpu.memory_space<semaphore_mem>>
    %72 = tpu.memref_squeeze %71 : memref<1x!tpu.dma_semaphore, #tpu.memory_space<semaphore_mem>> -> memref<!tpu.dma_semaphore, #tpu.memory_space<semaphore_mem>>
    tpu.wait_dma2 semaphore(%72 : memref<!tpu.dma_semaphore, #tpu.memory_space<semaphore_mem>>) src(%68 : memref<640x128xf32, #tpu.memory_space<any>>) dst(%70 : memref<640x128xf32, #tpu.memory_space<vmem>>)
    %c0_66 = arith.constant 0 : index
    %c0_67 = arith.constant 0 : index
    %73 = vector.load %arg7[%c0_66, %c0_67] : memref<48x128xf32, #tpu.memory_space<vmem>>, vector<48x128xf32>
    %c1_68 = arith.constant 1 : index
    %c256_69 = arith.constant 256 : index
    %c0_70 = arith.constant 0 : index
    %74 = vector.load %arg5[%c1_68, %c256_69, %c0_70] : memref<2x640x128xf32, #tpu.memory_space<vmem>>, vector<1x128x128xf32>
    %75 = vector.shape_cast %74 : vector<1x128x128xf32> to vector<128x128xf32>
    %cst_71 = arith.constant dense<0.000000e+00> : vector<48x128xf32>
    %76 = tpu.matmul %73, %75, %cst_71 {dimension_numbers = #tpu.dot_dimension_numbers<[1], [0], [0], [1], [0, 0, 1, 1], [], []>} : vector<48x128xf32>, vector<128x128xf32>, vector<48x128xf32> -> vector<48x128xf32>
    %c2_i32_72 = arith.constant 2 : i32
    %77 = tpu.dynamic_rotate %73 by %c2_i32_72 dim 0 : vector<48x128xf32>, i32 -> vector<48x128xf32>
    %c1_73 = arith.constant 1 : index
    %c0_74 = arith.constant 0 : index
    %c0_75 = arith.constant 0 : index
    %78 = vector.load %arg5[%c1_73, %c0_74, %c0_75] : memref<2x640x128xf32, #tpu.memory_space<vmem>>, vector<1x128x128xf32>
    %79 = vector.shape_cast %78 : vector<1x128x128xf32> to vector<128x128xf32>
    %cst_76 = arith.constant dense<0.000000e+00> : vector<48x128xf32>
    %80 = tpu.matmul %77, %79, %cst_76 {dimension_numbers = #tpu.dot_dimension_numbers<[1], [0], [0], [1], [0, 0, 1, 1], [], []>} : vector<48x128xf32>, vector<128x128xf32>, vector<48x128xf32> -> vector<48x128xf32>
    %81 = arith.addf %76, %80 : vector<48x128xf32>
    %c1_i32_77 = arith.constant 1 : i32
    %82 = tpu.dynamic_rotate %73 by %c1_i32_77 dim 0 : vector<48x128xf32>, i32 -> vector<48x128xf32>
    %c1_78 = arith.constant 1 : index
    %c128_79 = arith.constant 128 : index
    %c0_80 = arith.constant 0 : index
    %83 = vector.load %arg5[%c1_78, %c128_79, %c0_80] : memref<2x640x128xf32, #tpu.memory_space<vmem>>, vector<1x128x128xf32>
    %84 = vector.shape_cast %83 : vector<1x128x128xf32> to vector<128x128xf32>
    %cst_81 = arith.constant dense<0.000000e+00> : vector<48x128xf32>
    %85 = tpu.matmul %82, %84, %cst_81 {dimension_numbers = #tpu.dot_dimension_numbers<[1], [0], [0], [1], [0, 0, 1, 1], [], []>} : vector<48x128xf32>, vector<128x128xf32>, vector<48x128xf32> -> vector<48x128xf32>
    %86 = arith.addf %81, %85 : vector<48x128xf32>
    %c47_i32_82 = arith.constant 47 : i32
    %87 = tpu.dynamic_rotate %73 by %c47_i32_82 dim 0 : vector<48x128xf32>, i32 -> vector<48x128xf32>
    %c1_83 = arith.constant 1 : index
    %c384_84 = arith.constant 384 : index
    %c0_85 = arith.constant 0 : index
    %88 = vector.load %arg5[%c1_83, %c384_84, %c0_85] : memref<2x640x128xf32, #tpu.memory_space<vmem>>, vector<1x128x128xf32>
    %89 = vector.shape_cast %88 : vector<1x128x128xf32> to vector<128x128xf32>
    %cst_86 = arith.constant dense<0.000000e+00> : vector<48x128xf32>
    %90 = tpu.matmul %87, %89, %cst_86 {dimension_numbers = #tpu.dot_dimension_numbers<[1], [0], [0], [1], [0, 0, 1, 1], [], []>} : vector<48x128xf32>, vector<128x128xf32>, vector<48x128xf32> -> vector<48x128xf32>
    %91 = arith.addf %86, %90 : vector<48x128xf32>
    %c46_i32_87 = arith.constant 46 : i32
    %92 = tpu.dynamic_rotate %73 by %c46_i32_87 dim 0 : vector<48x128xf32>, i32 -> vector<48x128xf32>
    %c1_88 = arith.constant 1 : index
    %c512_89 = arith.constant 512 : index
    %c0_90 = arith.constant 0 : index
    %93 = vector.load %arg5[%c1_88, %c512_89, %c0_90] : memref<2x640x128xf32, #tpu.memory_space<vmem>>, vector<1x128x128xf32>
    %94 = vector.shape_cast %93 : vector<1x128x128xf32> to vector<128x128xf32>
    %cst_91 = arith.constant dense<0.000000e+00> : vector<48x128xf32>
    %95 = tpu.matmul %92, %94, %cst_91 {dimension_numbers = #tpu.dot_dimension_numbers<[1], [0], [0], [1], [0, 0, 1, 1], [], []>} : vector<48x128xf32>, vector<128x128xf32>, vector<48x128xf32> -> vector<48x128xf32>
    %96 = arith.addf %91, %95 : vector<48x128xf32>
    %c1_92 = arith.constant 1 : index
    %c0_93 = arith.constant 0 : index
    %97 = vector.load %arg3[%c1_92, %c0_93] : memref<5x128xf32, #tpu.memory_space<vmem>>, vector<1x128xf32>
    %98 = vector.extract_strided_slice %96 {offsets = [8, 0], sizes = [8, 128], strides = [1, 1]} : vector<48x128xf32> to vector<8x128xf32>
    %99 = vector.broadcast %97 : vector<1x128xf32> to vector<8x128xf32>
    %100 = arith.addf %98, %99 : vector<8x128xf32>
    %101 = math.tanh %100 : vector<8x128xf32>
    %c8_94 = arith.constant 8 : index
    %c0_95 = arith.constant 0 : index
    %102 = vector.load %arg7[%c8_94, %c0_95] : memref<48x128xf32, #tpu.memory_space<vmem>>, vector<8x128xf32>
    tpu.vector_store %arg7[%c8_94, %c0_95], %101 {strides = array<i32>} : memref<48x128xf32, #tpu.memory_space<vmem>>, vector<8x128xf32>,
    %103 = vector.extract_strided_slice %96 {offsets = [32, 0], sizes = [8, 128], strides = [1, 1]} : vector<48x128xf32> to vector<8x128xf32>
    %104 = vector.broadcast %97 : vector<1x128xf32> to vector<8x128xf32>
    %105 = arith.addf %103, %104 : vector<8x128xf32>
    %106 = math.tanh %105 : vector<8x128xf32>
    %c32_96 = arith.constant 32 : index
    %c0_97 = arith.constant 0 : index
    %107 = vector.load %arg7[%c32_96, %c0_97] : memref<48x128xf32, #tpu.memory_space<vmem>>, vector<8x128xf32>
    tpu.vector_store %arg7[%c32_96, %c0_97], %106 {strides = array<i32>} : memref<48x128xf32, #tpu.memory_space<vmem>>, vector<8x128xf32>,
    %c3_i32 = arith.constant 3 : i32
    %c1_i32_98 = arith.constant 1 : i32
    %c1_i32_99 = arith.constant 1 : i32
    %c0_i32_100 = arith.constant 0 : i32
    %c0_i32_101 = arith.constant 0 : i32
    %108 = tpu.memref_slice %arg2[%c3_i32, %c0_i32_100, %c0_i32_101] : memref<5x640x128xf32, #tpu.memory_space<any>> -> memref<1x640x128xf32, #tpu.memory_space<any>>
    %109 = tpu.memref_squeeze %108 : memref<1x640x128xf32, #tpu.memory_space<any>> -> memref<640x128xf32, #tpu.memory_space<any>>
    %c0_i32_102 = arith.constant 0 : i32
    %c0_i32_103 = arith.constant 0 : i32
    %110 = tpu.memref_slice %arg5[%c1_i32_98, %c0_i32_102, %c0_i32_103] : memref<2x640x128xf32, #tpu.memory_space<vmem>> -> memref<1x640x128xf32, #tpu.memory_space<vmem>>
    %111 = tpu.memref_squeeze %110 : memref<1x640x128xf32, #tpu.memory_space<vmem>> -> memref<640x128xf32, #tpu.memory_space<vmem>>
    %112 = tpu.memref_slice %arg6[%c1_i32_99] : memref<2x!tpu.dma_semaphore, #tpu.memory_space<semaphore_mem>> -> memref<1x!tpu.dma_semaphore, #tpu.memory_space<semaphore_mem>>
    %113 = tpu.memref_squeeze %112 : memref<1x!tpu.dma_semaphore, #tpu.memory_space<semaphore_mem>> -> memref<!tpu.dma_semaphore, #tpu.memory_space<semaphore_mem>>
    tpu.enqueue_dma source(%109 : memref<640x128xf32, #tpu.memory_space<any>>) target(%111 : memref<640x128xf32, #tpu.memory_space<vmem>>) target_semaphore(%113 : memref<!tpu.dma_semaphore, #tpu.memory_space<semaphore_mem>>)
    %c2_i32_104 = arith.constant 2 : i32
    %c0_i32_105 = arith.constant 0 : i32
    %c0_i32_106 = arith.constant 0 : i32
    %c0_i32_107 = arith.constant 0 : i32
    %c0_i32_108 = arith.constant 0 : i32
    %114 = tpu.memref_slice %arg2[%c2_i32_104, %c0_i32_107, %c0_i32_108] : memref<5x640x128xf32, #tpu.memory_space<any>> -> memref<1x640x128xf32, #tpu.memory_space<any>>
    %115 = tpu.memref_squeeze %114 : memref<1x640x128xf32, #tpu.memory_space<any>> -> memref<640x128xf32, #tpu.memory_space<any>>
    %c0_i32_109 = arith.constant 0 : i32
    %c0_i32_110 = arith.constant 0 : i32
    %116 = tpu.memref_slice %arg5[%c0_i32_105, %c0_i32_109, %c0_i32_110] : memref<2x640x128xf32, #tpu.memory_space<vmem>> -> memref<1x640x128xf32, #tpu.memory_space<vmem>>
    %117 = tpu.memref_squeeze %116 : memref<1x640x128xf32, #tpu.memory_space<vmem>> -> memref<640x128xf32, #tpu.memory_space<vmem>>
    %118 = tpu.memref_slice %arg6[%c0_i32_106] : memref<2x!tpu.dma_semaphore, #tpu.memory_space<semaphore_mem>> -> memref<1x!tpu.dma_semaphore, #tpu.memory_space<semaphore_mem>>
    %119 = tpu.memref_squeeze %118 : memref<1x!tpu.dma_semaphore, #tpu.memory_space<semaphore_mem>> -> memref<!tpu.dma_semaphore, #tpu.memory_space<semaphore_mem>>
    tpu.wait_dma2 semaphore(%119 : memref<!tpu.dma_semaphore, #tpu.memory_space<semaphore_mem>>) src(%115 : memref<640x128xf32, #tpu.memory_space<any>>) dst(%117 : memref<640x128xf32, #tpu.memory_space<vmem>>)
    %c0_111 = arith.constant 0 : index
    %c0_112 = arith.constant 0 : index
    %120 = vector.load %arg7[%c0_111, %c0_112] : memref<48x128xf32, #tpu.memory_space<vmem>>, vector<48x128xf32>
    %c0_113 = arith.constant 0 : index
    %c256_114 = arith.constant 256 : index
    %c0_115 = arith.constant 0 : index
    %121 = vector.load %arg5[%c0_113, %c256_114, %c0_115] : memref<2x640x128xf32, #tpu.memory_space<vmem>>, vector<1x128x128xf32>
    %122 = vector.shape_cast %121 : vector<1x128x128xf32> to vector<128x128xf32>
    %cst_116 = arith.constant dense<0.000000e+00> : vector<48x128xf32>
    %123 = tpu.matmul %120, %122, %cst_116 {dimension_numbers = #tpu.dot_dimension_numbers<[1], [0], [0], [1], [0, 0, 1, 1], [], []>} : vector<48x128xf32>, vector<128x128xf32>, vector<48x128xf32> -> vector<48x128xf32>
    %c2_i32_117 = arith.constant 2 : i32
    %124 = tpu.dynamic_rotate %120 by %c2_i32_117 dim 0 : vector<48x128xf32>, i32 -> vector<48x128xf32>
    %c0_118 = arith.constant 0 : index
    %c0_119 = arith.constant 0 : index
    %c0_120 = arith.constant 0 : index
    %125 = vector.load %arg5[%c0_118, %c0_119, %c0_120] : memref<2x640x128xf32, #tpu.memory_space<vmem>>, vector<1x128x128xf32>
    %126 = vector.shape_cast %125 : vector<1x128x128xf32> to vector<128x128xf32>
    %cst_121 = arith.constant dense<0.000000e+00> : vector<48x128xf32>
    %127 = tpu.matmul %124, %126, %cst_121 {dimension_numbers = #tpu.dot_dimension_numbers<[1], [0], [0], [1], [0, 0, 1, 1], [], []>} : vector<48x128xf32>, vector<128x128xf32>, vector<48x128xf32> -> vector<48x128xf32>
    %128 = arith.addf %123, %127 : vector<48x128xf32>
    %c1_i32_122 = arith.constant 1 : i32
    %129 = tpu.dynamic_rotate %120 by %c1_i32_122 dim 0 : vector<48x128xf32>, i32 -> vector<48x128xf32>
    %c0_123 = arith.constant 0 : index
    %c128_124 = arith.constant 128 : index
    %c0_125 = arith.constant 0 : index
    %130 = vector.load %arg5[%c0_123, %c128_124, %c0_125] : memref<2x640x128xf32, #tpu.memory_space<vmem>>, vector<1x128x128xf32>
    %131 = vector.shape_cast %130 : vector<1x128x128xf32> to vector<128x128xf32>
    %cst_126 = arith.constant dense<0.000000e+00> : vector<48x128xf32>
    %132 = tpu.matmul %129, %131, %cst_126 {dimension_numbers = #tpu.dot_dimension_numbers<[1], [0], [0], [1], [0, 0, 1, 1], [], []>} : vector<48x128xf32>, vector<128x128xf32>, vector<48x128xf32> -> vector<48x128xf32>
    %133 = arith.addf %128, %132 : vector<48x128xf32>
    %c47_i32_127 = arith.constant 47 : i32
    %134 = tpu.dynamic_rotate %120 by %c47_i32_127 dim 0 : vector<48x128xf32>, i32 -> vector<48x128xf32>
    %c0_128 = arith.constant 0 : index
    %c384_129 = arith.constant 384 : index
    %c0_130 = arith.constant 0 : index
    %135 = vector.load %arg5[%c0_128, %c384_129, %c0_130] : memref<2x640x128xf32, #tpu.memory_space<vmem>>, vector<1x128x128xf32>
    %136 = vector.shape_cast %135 : vector<1x128x128xf32> to vector<128x128xf32>
    %cst_131 = arith.constant dense<0.000000e+00> : vector<48x128xf32>
    %137 = tpu.matmul %134, %136, %cst_131 {dimension_numbers = #tpu.dot_dimension_numbers<[1], [0], [0], [1], [0, 0, 1, 1], [], []>} : vector<48x128xf32>, vector<128x128xf32>, vector<48x128xf32> -> vector<48x128xf32>
    %138 = arith.addf %133, %137 : vector<48x128xf32>
    %c46_i32_132 = arith.constant 46 : i32
    %139 = tpu.dynamic_rotate %120 by %c46_i32_132 dim 0 : vector<48x128xf32>, i32 -> vector<48x128xf32>
    %c0_133 = arith.constant 0 : index
    %c512_134 = arith.constant 512 : index
    %c0_135 = arith.constant 0 : index
    %140 = vector.load %arg5[%c0_133, %c512_134, %c0_135] : memref<2x640x128xf32, #tpu.memory_space<vmem>>, vector<1x128x128xf32>
    %141 = vector.shape_cast %140 : vector<1x128x128xf32> to vector<128x128xf32>
    %cst_136 = arith.constant dense<0.000000e+00> : vector<48x128xf32>
    %142 = tpu.matmul %139, %141, %cst_136 {dimension_numbers = #tpu.dot_dimension_numbers<[1], [0], [0], [1], [0, 0, 1, 1], [], []>} : vector<48x128xf32>, vector<128x128xf32>, vector<48x128xf32> -> vector<48x128xf32>
    %143 = arith.addf %138, %142 : vector<48x128xf32>
    %c2 = arith.constant 2 : index
    %c0_137 = arith.constant 0 : index
    %144 = vector.load %arg3[%c2, %c0_137] : memref<5x128xf32, #tpu.memory_space<vmem>>, vector<1x128xf32>
    %145 = vector.extract_strided_slice %143 {offsets = [8, 0], sizes = [8, 128], strides = [1, 1]} : vector<48x128xf32> to vector<8x128xf32>
    %146 = vector.broadcast %144 : vector<1x128xf32> to vector<8x128xf32>
    %147 = arith.addf %145, %146 : vector<8x128xf32>
    %148 = math.tanh %147 : vector<8x128xf32>
    %c8_138 = arith.constant 8 : index
    %c0_139 = arith.constant 0 : index
    %149 = vector.load %arg7[%c8_138, %c0_139] : memref<48x128xf32, #tpu.memory_space<vmem>>, vector<8x128xf32>
    tpu.vector_store %arg7[%c8_138, %c0_139], %148 {strides = array<i32>} : memref<48x128xf32, #tpu.memory_space<vmem>>, vector<8x128xf32>,
    %150 = vector.extract_strided_slice %143 {offsets = [32, 0], sizes = [8, 128], strides = [1, 1]} : vector<48x128xf32> to vector<8x128xf32>
    %151 = vector.broadcast %144 : vector<1x128xf32> to vector<8x128xf32>
    %152 = arith.addf %150, %151 : vector<8x128xf32>
    %153 = math.tanh %152 : vector<8x128xf32>
    %c32_140 = arith.constant 32 : index
    %c0_141 = arith.constant 0 : index
    %154 = vector.load %arg7[%c32_140, %c0_141] : memref<48x128xf32, #tpu.memory_space<vmem>>, vector<8x128xf32>
    tpu.vector_store %arg7[%c32_140, %c0_141], %153 {strides = array<i32>} : memref<48x128xf32, #tpu.memory_space<vmem>>, vector<8x128xf32>,
    %c4_i32 = arith.constant 4 : i32
    %c0_i32_142 = arith.constant 0 : i32
    %c0_i32_143 = arith.constant 0 : i32
    %c0_i32_144 = arith.constant 0 : i32
    %c0_i32_145 = arith.constant 0 : i32
    %155 = tpu.memref_slice %arg2[%c4_i32, %c0_i32_144, %c0_i32_145] : memref<5x640x128xf32, #tpu.memory_space<any>> -> memref<1x640x128xf32, #tpu.memory_space<any>>
    %156 = tpu.memref_squeeze %155 : memref<1x640x128xf32, #tpu.memory_space<any>> -> memref<640x128xf32, #tpu.memory_space<any>>
    %c0_i32_146 = arith.constant 0 : i32
    %c0_i32_147 = arith.constant 0 : i32
    %157 = tpu.memref_slice %arg5[%c0_i32_142, %c0_i32_146, %c0_i32_147] : memref<2x640x128xf32, #tpu.memory_space<vmem>> -> memref<1x640x128xf32, #tpu.memory_space<vmem>>
    %158 = tpu.memref_squeeze %157 : memref<1x640x128xf32, #tpu.memory_space<vmem>> -> memref<640x128xf32, #tpu.memory_space<vmem>>
    %159 = tpu.memref_slice %arg6[%c0_i32_143] : memref<2x!tpu.dma_semaphore, #tpu.memory_space<semaphore_mem>> -> memref<1x!tpu.dma_semaphore, #tpu.memory_space<semaphore_mem>>
    %160 = tpu.memref_squeeze %159 : memref<1x!tpu.dma_semaphore, #tpu.memory_space<semaphore_mem>> -> memref<!tpu.dma_semaphore, #tpu.memory_space<semaphore_mem>>
    tpu.enqueue_dma source(%156 : memref<640x128xf32, #tpu.memory_space<any>>) target(%158 : memref<640x128xf32, #tpu.memory_space<vmem>>) target_semaphore(%160 : memref<!tpu.dma_semaphore, #tpu.memory_space<semaphore_mem>>)
    %c3_i32_148 = arith.constant 3 : i32
    %c1_i32_149 = arith.constant 1 : i32
    %c1_i32_150 = arith.constant 1 : i32
    %c0_i32_151 = arith.constant 0 : i32
    %c0_i32_152 = arith.constant 0 : i32
    %161 = tpu.memref_slice %arg2[%c3_i32_148, %c0_i32_151, %c0_i32_152] : memref<5x640x128xf32, #tpu.memory_space<any>> -> memref<1x640x128xf32, #tpu.memory_space<any>>
    %162 = tpu.memref_squeeze %161 : memref<1x640x128xf32, #tpu.memory_space<any>> -> memref<640x128xf32, #tpu.memory_space<any>>
    %c0_i32_153 = arith.constant 0 : i32
    %c0_i32_154 = arith.constant 0 : i32
    %163 = tpu.memref_slice %arg5[%c1_i32_149, %c0_i32_153, %c0_i32_154] : memref<2x640x128xf32, #tpu.memory_space<vmem>> -> memref<1x640x128xf32, #tpu.memory_space<vmem>>
    %164 = tpu.memref_squeeze %163 : memref<1x640x128xf32, #tpu.memory_space<vmem>> -> memref<640x128xf32, #tpu.memory_space<vmem>>
    %165 = tpu.memref_slice %arg6[%c1_i32_150] : memref<2x!tpu.dma_semaphore, #tpu.memory_space<semaphore_mem>> -> memref<1x!tpu.dma_semaphore, #tpu.memory_space<semaphore_mem>>
    %166 = tpu.memref_squeeze %165 : memref<1x!tpu.dma_semaphore, #tpu.memory_space<semaphore_mem>> -> memref<!tpu.dma_semaphore, #tpu.memory_space<semaphore_mem>>
    tpu.wait_dma2 semaphore(%166 : memref<!tpu.dma_semaphore, #tpu.memory_space<semaphore_mem>>) src(%162 : memref<640x128xf32, #tpu.memory_space<any>>) dst(%164 : memref<640x128xf32, #tpu.memory_space<vmem>>)
    %c0_155 = arith.constant 0 : index
    %c0_156 = arith.constant 0 : index
    %167 = vector.load %arg7[%c0_155, %c0_156] : memref<48x128xf32, #tpu.memory_space<vmem>>, vector<48x128xf32>
    %c1_157 = arith.constant 1 : index
    %c256_158 = arith.constant 256 : index
    %c0_159 = arith.constant 0 : index
    %168 = vector.load %arg5[%c1_157, %c256_158, %c0_159] : memref<2x640x128xf32, #tpu.memory_space<vmem>>, vector<1x128x128xf32>
    %169 = vector.shape_cast %168 : vector<1x128x128xf32> to vector<128x128xf32>
    %cst_160 = arith.constant dense<0.000000e+00> : vector<48x128xf32>
    %170 = tpu.matmul %167, %169, %cst_160 {dimension_numbers = #tpu.dot_dimension_numbers<[1], [0], [0], [1], [0, 0, 1, 1], [], []>} : vector<48x128xf32>, vector<128x128xf32>, vector<48x128xf32> -> vector<48x128xf32>
    %c2_i32_161 = arith.constant 2 : i32
    %171 = tpu.dynamic_rotate %167 by %c2_i32_161 dim 0 : vector<48x128xf32>, i32 -> vector<48x128xf32>
    %c1_162 = arith.constant 1 : index
    %c0_163 = arith.constant 0 : index
    %c0_164 = arith.constant 0 : index
    %172 = vector.load %arg5[%c1_162, %c0_163, %c0_164] : memref<2x640x128xf32, #tpu.memory_space<vmem>>, vector<1x128x128xf32>
    %173 = vector.shape_cast %172 : vector<1x128x128xf32> to vector<128x128xf32>
    %cst_165 = arith.constant dense<0.000000e+00> : vector<48x128xf32>
    %174 = tpu.matmul %171, %173, %cst_165 {dimension_numbers = #tpu.dot_dimension_numbers<[1], [0], [0], [1], [0, 0, 1, 1], [], []>} : vector<48x128xf32>, vector<128x128xf32>, vector<48x128xf32> -> vector<48x128xf32>
    %175 = arith.addf %170, %174 : vector<48x128xf32>
    %c1_i32_166 = arith.constant 1 : i32
    %176 = tpu.dynamic_rotate %167 by %c1_i32_166 dim 0 : vector<48x128xf32>, i32 -> vector<48x128xf32>
    %c1_167 = arith.constant 1 : index
    %c128_168 = arith.constant 128 : index
    %c0_169 = arith.constant 0 : index
    %177 = vector.load %arg5[%c1_167, %c128_168, %c0_169] : memref<2x640x128xf32, #tpu.memory_space<vmem>>, vector<1x128x128xf32>
    %178 = vector.shape_cast %177 : vector<1x128x128xf32> to vector<128x128xf32>
    %cst_170 = arith.constant dense<0.000000e+00> : vector<48x128xf32>
    %179 = tpu.matmul %176, %178, %cst_170 {dimension_numbers = #tpu.dot_dimension_numbers<[1], [0], [0], [1], [0, 0, 1, 1], [], []>} : vector<48x128xf32>, vector<128x128xf32>, vector<48x128xf32> -> vector<48x128xf32>
    %180 = arith.addf %175, %179 : vector<48x128xf32>
    %c47_i32_171 = arith.constant 47 : i32
    %181 = tpu.dynamic_rotate %167 by %c47_i32_171 dim 0 : vector<48x128xf32>, i32 -> vector<48x128xf32>
    %c1_172 = arith.constant 1 : index
    %c384_173 = arith.constant 384 : index
    %c0_174 = arith.constant 0 : index
    %182 = vector.load %arg5[%c1_172, %c384_173, %c0_174] : memref<2x640x128xf32, #tpu.memory_space<vmem>>, vector<1x128x128xf32>
    %183 = vector.shape_cast %182 : vector<1x128x128xf32> to vector<128x128xf32>
    %cst_175 = arith.constant dense<0.000000e+00> : vector<48x128xf32>
    %184 = tpu.matmul %181, %183, %cst_175 {dimension_numbers = #tpu.dot_dimension_numbers<[1], [0], [0], [1], [0, 0, 1, 1], [], []>} : vector<48x128xf32>, vector<128x128xf32>, vector<48x128xf32> -> vector<48x128xf32>
    %185 = arith.addf %180, %184 : vector<48x128xf32>
    %c46_i32_176 = arith.constant 46 : i32
    %186 = tpu.dynamic_rotate %167 by %c46_i32_176 dim 0 : vector<48x128xf32>, i32 -> vector<48x128xf32>
    %c1_177 = arith.constant 1 : index
    %c512_178 = arith.constant 512 : index
    %c0_179 = arith.constant 0 : index
    %187 = vector.load %arg5[%c1_177, %c512_178, %c0_179] : memref<2x640x128xf32, #tpu.memory_space<vmem>>, vector<1x128x128xf32>
    %188 = vector.shape_cast %187 : vector<1x128x128xf32> to vector<128x128xf32>
    %cst_180 = arith.constant dense<0.000000e+00> : vector<48x128xf32>
    %189 = tpu.matmul %186, %188, %cst_180 {dimension_numbers = #tpu.dot_dimension_numbers<[1], [0], [0], [1], [0, 0, 1, 1], [], []>} : vector<48x128xf32>, vector<128x128xf32>, vector<48x128xf32> -> vector<48x128xf32>
    %190 = arith.addf %185, %189 : vector<48x128xf32>
    %c3 = arith.constant 3 : index
    %c0_181 = arith.constant 0 : index
    %191 = vector.load %arg3[%c3, %c0_181] : memref<5x128xf32, #tpu.memory_space<vmem>>, vector<1x128xf32>
    %192 = vector.extract_strided_slice %190 {offsets = [8, 0], sizes = [8, 128], strides = [1, 1]} : vector<48x128xf32> to vector<8x128xf32>
    %193 = vector.broadcast %191 : vector<1x128xf32> to vector<8x128xf32>
    %194 = arith.addf %192, %193 : vector<8x128xf32>
    %195 = math.tanh %194 : vector<8x128xf32>
    %c8_182 = arith.constant 8 : index
    %c0_183 = arith.constant 0 : index
    %196 = vector.load %arg7[%c8_182, %c0_183] : memref<48x128xf32, #tpu.memory_space<vmem>>, vector<8x128xf32>
    tpu.vector_store %arg7[%c8_182, %c0_183], %195 {strides = array<i32>} : memref<48x128xf32, #tpu.memory_space<vmem>>, vector<8x128xf32>,
    %197 = vector.extract_strided_slice %190 {offsets = [32, 0], sizes = [8, 128], strides = [1, 1]} : vector<48x128xf32> to vector<8x128xf32>
    %198 = vector.broadcast %191 : vector<1x128xf32> to vector<8x128xf32>
    %199 = arith.addf %197, %198 : vector<8x128xf32>
    %200 = math.tanh %199 : vector<8x128xf32>
    %c32_184 = arith.constant 32 : index
    %c0_185 = arith.constant 0 : index
    %201 = vector.load %arg7[%c32_184, %c0_185] : memref<48x128xf32, #tpu.memory_space<vmem>>, vector<8x128xf32>
    tpu.vector_store %arg7[%c32_184, %c0_185], %200 {strides = array<i32>} : memref<48x128xf32, #tpu.memory_space<vmem>>, vector<8x128xf32>,
    %c4_i32_186 = arith.constant 4 : i32
    %c0_i32_187 = arith.constant 0 : i32
    %c0_i32_188 = arith.constant 0 : i32
    %c0_i32_189 = arith.constant 0 : i32
    %c0_i32_190 = arith.constant 0 : i32
    %202 = tpu.memref_slice %arg2[%c4_i32_186, %c0_i32_189, %c0_i32_190] : memref<5x640x128xf32, #tpu.memory_space<any>> -> memref<1x640x128xf32, #tpu.memory_space<any>>
    %203 = tpu.memref_squeeze %202 : memref<1x640x128xf32, #tpu.memory_space<any>> -> memref<640x128xf32, #tpu.memory_space<any>>
    %c0_i32_191 = arith.constant 0 : i32
    %c0_i32_192 = arith.constant 0 : i32
    %204 = tpu.memref_slice %arg5[%c0_i32_187, %c0_i32_191, %c0_i32_192] : memref<2x640x128xf32, #tpu.memory_space<vmem>> -> memref<1x640x128xf32, #tpu.memory_space<vmem>>
    %205 = tpu.memref_squeeze %204 : memref<1x640x128xf32, #tpu.memory_space<vmem>> -> memref<640x128xf32, #tpu.memory_space<vmem>>
    %206 = tpu.memref_slice %arg6[%c0_i32_188] : memref<2x!tpu.dma_semaphore, #tpu.memory_space<semaphore_mem>> -> memref<1x!tpu.dma_semaphore, #tpu.memory_space<semaphore_mem>>
    %207 = tpu.memref_squeeze %206 : memref<1x!tpu.dma_semaphore, #tpu.memory_space<semaphore_mem>> -> memref<!tpu.dma_semaphore, #tpu.memory_space<semaphore_mem>>
    tpu.wait_dma2 semaphore(%207 : memref<!tpu.dma_semaphore, #tpu.memory_space<semaphore_mem>>) src(%203 : memref<640x128xf32, #tpu.memory_space<any>>) dst(%205 : memref<640x128xf32, #tpu.memory_space<vmem>>)
    %c0_193 = arith.constant 0 : index
    %c0_194 = arith.constant 0 : index
    %208 = vector.load %arg7[%c0_193, %c0_194] : memref<48x128xf32, #tpu.memory_space<vmem>>, vector<48x128xf32>
    %c0_195 = arith.constant 0 : index
    %c256_196 = arith.constant 256 : index
    %c0_197 = arith.constant 0 : index
    %209 = vector.load %arg5[%c0_195, %c256_196, %c0_197] : memref<2x640x128xf32, #tpu.memory_space<vmem>>, vector<1x128x128xf32>
    %210 = vector.shape_cast %209 : vector<1x128x128xf32> to vector<128x128xf32>
    %cst_198 = arith.constant dense<0.000000e+00> : vector<48x128xf32>
    %211 = tpu.matmul %208, %210, %cst_198 {dimension_numbers = #tpu.dot_dimension_numbers<[1], [0], [0], [1], [0, 0, 1, 1], [], []>} : vector<48x128xf32>, vector<128x128xf32>, vector<48x128xf32> -> vector<48x128xf32>
    %c2_i32_199 = arith.constant 2 : i32
    %212 = tpu.dynamic_rotate %208 by %c2_i32_199 dim 0 : vector<48x128xf32>, i32 -> vector<48x128xf32>
    %c0_200 = arith.constant 0 : index
    %c0_201 = arith.constant 0 : index
    %c0_202 = arith.constant 0 : index
    %213 = vector.load %arg5[%c0_200, %c0_201, %c0_202] : memref<2x640x128xf32, #tpu.memory_space<vmem>>, vector<1x128x128xf32>
    %214 = vector.shape_cast %213 : vector<1x128x128xf32> to vector<128x128xf32>
    %cst_203 = arith.constant dense<0.000000e+00> : vector<48x128xf32>
    %215 = tpu.matmul %212, %214, %cst_203 {dimension_numbers = #tpu.dot_dimension_numbers<[1], [0], [0], [1], [0, 0, 1, 1], [], []>} : vector<48x128xf32>, vector<128x128xf32>, vector<48x128xf32> -> vector<48x128xf32>
    %216 = arith.addf %211, %215 : vector<48x128xf32>
    %c1_i32_204 = arith.constant 1 : i32
    %217 = tpu.dynamic_rotate %208 by %c1_i32_204 dim 0 : vector<48x128xf32>, i32 -> vector<48x128xf32>
    %c0_205 = arith.constant 0 : index
    %c128_206 = arith.constant 128 : index
    %c0_207 = arith.constant 0 : index
    %218 = vector.load %arg5[%c0_205, %c128_206, %c0_207] : memref<2x640x128xf32, #tpu.memory_space<vmem>>, vector<1x128x128xf32>
    %219 = vector.shape_cast %218 : vector<1x128x128xf32> to vector<128x128xf32>
    %cst_208 = arith.constant dense<0.000000e+00> : vector<48x128xf32>
    %220 = tpu.matmul %217, %219, %cst_208 {dimension_numbers = #tpu.dot_dimension_numbers<[1], [0], [0], [1], [0, 0, 1, 1], [], []>} : vector<48x128xf32>, vector<128x128xf32>, vector<48x128xf32> -> vector<48x128xf32>
    %221 = arith.addf %216, %220 : vector<48x128xf32>
    %c47_i32_209 = arith.constant 47 : i32
    %222 = tpu.dynamic_rotate %208 by %c47_i32_209 dim 0 : vector<48x128xf32>, i32 -> vector<48x128xf32>
    %c0_210 = arith.constant 0 : index
    %c384_211 = arith.constant 384 : index
    %c0_212 = arith.constant 0 : index
    %223 = vector.load %arg5[%c0_210, %c384_211, %c0_212] : memref<2x640x128xf32, #tpu.memory_space<vmem>>, vector<1x128x128xf32>
    %224 = vector.shape_cast %223 : vector<1x128x128xf32> to vector<128x128xf32>
    %cst_213 = arith.constant dense<0.000000e+00> : vector<48x128xf32>
    %225 = tpu.matmul %222, %224, %cst_213 {dimension_numbers = #tpu.dot_dimension_numbers<[1], [0], [0], [1], [0, 0, 1, 1], [], []>} : vector<48x128xf32>, vector<128x128xf32>, vector<48x128xf32> -> vector<48x128xf32>
    %226 = arith.addf %221, %225 : vector<48x128xf32>
    %c46_i32_214 = arith.constant 46 : i32
    %227 = tpu.dynamic_rotate %208 by %c46_i32_214 dim 0 : vector<48x128xf32>, i32 -> vector<48x128xf32>
    %c0_215 = arith.constant 0 : index
    %c512_216 = arith.constant 512 : index
    %c0_217 = arith.constant 0 : index
    %228 = vector.load %arg5[%c0_215, %c512_216, %c0_217] : memref<2x640x128xf32, #tpu.memory_space<vmem>>, vector<1x128x128xf32>
    %229 = vector.shape_cast %228 : vector<1x128x128xf32> to vector<128x128xf32>
    %cst_218 = arith.constant dense<0.000000e+00> : vector<48x128xf32>
    %230 = tpu.matmul %227, %229, %cst_218 {dimension_numbers = #tpu.dot_dimension_numbers<[1], [0], [0], [1], [0, 0, 1, 1], [], []>} : vector<48x128xf32>, vector<128x128xf32>, vector<48x128xf32> -> vector<48x128xf32>
    %231 = arith.addf %226, %230 : vector<48x128xf32>
    %c4 = arith.constant 4 : index
    %c0_219 = arith.constant 0 : index
    %232 = vector.load %arg3[%c4, %c0_219] : memref<5x128xf32, #tpu.memory_space<vmem>>, vector<1x128xf32>
    %233 = vector.extract_strided_slice %231 {offsets = [8, 0], sizes = [8, 128], strides = [1, 1]} : vector<48x128xf32> to vector<8x128xf32>
    %234 = vector.broadcast %232 : vector<1x128xf32> to vector<8x128xf32>
    %235 = arith.addf %233, %234 : vector<8x128xf32>
    %c0_220 = arith.constant 0 : index
    %c0_221 = arith.constant 0 : index
    %236 = vector.load %arg4[%c0_220, %c0_221] : memref<16x128xf32, #tpu.memory_space<vmem>>, vector<8x128xf32>
    tpu.vector_store %arg4[%c0_220, %c0_221], %235 {strides = array<i32>} : memref<16x128xf32, #tpu.memory_space<vmem>>, vector<8x128xf32>,
    %237 = vector.extract_strided_slice %231 {offsets = [32, 0], sizes = [8, 128], strides = [1, 1]} : vector<48x128xf32> to vector<8x128xf32>
    %238 = vector.broadcast %232 : vector<1x128xf32> to vector<8x128xf32>
    %239 = arith.addf %237, %238 : vector<8x128xf32>
    %c8_222 = arith.constant 8 : index
    %c0_223 = arith.constant 0 : index
    %240 = vector.load %arg4[%c8_222, %c0_223] : memref<16x128xf32, #tpu.memory_space<vmem>>, vector<8x128xf32>
    tpu.vector_store %arg4[%c8_222, %c0_223], %239 {strides = array<i32>} : memref<16x128xf32, #tpu.memory_space<vmem>>, vector<8x128xf32>,
    return
  }
  func.func @transform_0(%arg0: i32) -> (i32, i32, i32) {
    %c0_i32 = arith.constant 0 : i32
    %c0_i32_0 = arith.constant 0 : i32
    %c0_i32_1 = arith.constant 0 : i32
    %c0_i32_2 = arith.constant 0 : i32
    return %c0_i32, %c0_i32_0, %c0_i32_1 : i32, i32, i32
  }
  func.func @transform_2(%arg0: i32) -> (i32, i32) {
    %c0_i32 = arith.constant 0 : i32
    %c0_i32_0 = arith.constant 0 : i32
    %c0_i32_1 = arith.constant 0 : i32
    return %c0_i32, %c0_i32_0 : i32, i32
  }
  func.func @transform_3(%arg0: i32) -> (i32, i32) {
    %c0_i32 = arith.constant 0 : i32
    %c0_i32_0 = arith.constant 0 : i32
    %c0_i32_1 = arith.constant 0 : i32
    return %c0_i32, %c0_i32_0 : i32, i32
  }
}

</mosaic_0001>

<bundles_post_ra>
// kernel: tpu_custom_call.1
= control target key start
LH: loop header
LB: loop body
LE: loop exit
PB: predicated region body
PF: predicated region fallthrough
CT: control target
= control target key end

     0   :  { %8 = vsyncpa [#allocation6], 0  ;;  %s5676_s0 = inlined_call_operand.hbm [shape: f32[2,8,32], index: 0, kind: input, shape index: {}]   ;;  %s5677_s1 = inlined_call_operand.hbm [shape: f32[5,640,128], index: 1, kind: input, shape index: {}]   ;;  %s5678_s2 = inlined_call_operand.hbm [shape: f32[5,128], index: 2, kind: input, shape index: {}]   ;;  %s5679_s3 = inlined_call_operand.hbm [shape: f32[16,128], index: 3, kind: output, shape index: {}]  }
   0x1   :  { %9 = vsyncpa [#allocation9], 0 }
   0x2   :  { %10 = vsyncpa [#allocation7], 0  ;;  %s5014_s12 = smov [#allocation5]  }
   0x3   :  { %s16_s13 = sshll.u32 %s5014_s12, 4  ;;  %s17_s13 = int_to_ptr.vmem [resolvable:$true] %s16_s13 }
   0x4   :  { %s4834_s14 = scalar_lea.vmem %s17_s13, 256  ;;  %p4839_p1 = scmp.lt.s32.totalorder %s17_s13, %s17_s13 }
   0x5   :  { %p4835_p0 = scmp.ne.s32.totalorder %s17_s13, %s4834_s14  ;;  %p4840_p2 = scmp.lt.s32.totalorder %s4834_s14, %s4834_s14 }
   0x7   :  { %p4841_p3 = por %p4840_p2, %p4839_p1 }
   0x9   :  { %p4842_p4 = pnand %p4841_p3, %p4835_p0 }
   0xb   :  { %4845 = shalt.err (!%p4842_p4)
}
   0xc   :  { %s5015_s15 = smov 128   ;;  %s5016_s16 = smov 8  }
   0xd   :  { %22 = dma.hbm_to_vmem [thread:$0]  %s5676_s0, 256, %s17_s13, [#allocation6], %s5015_s15, %s5015_s15, %s5016_s16  }
   0xe   :  { %s5017_s19 = smov [#allocation8]  }
   0xf   :  { %s29_s20 = sshll.u32 %s5017_s19, 4  ;;  %s30_s20 = int_to_ptr.vmem [resolvable:$true] %s29_s20 }
  0x10   :  { %s4854_s21 = scalar_lea.vmem %s30_s20, 128  ;;  %p4859_p6 = scmp.lt.s32.totalorder %s30_s20, %s30_s20 }
  0x11   :  { %p4855_p5 = scmp.ne.s32.totalorder %s30_s20, %s4854_s21  ;;  %p4860_p7 = scmp.lt.s32.totalorder %s4854_s21, %s4854_s21 }
  0x13   :  { %p4861_p8 = por %p4860_p7, %p4859_p6 }
  0x15   :  { %p4862_p9 = pnand %p4861_p8, %p4855_p5 }
  0x17   :  { %4865 = shalt.err (!%p4862_p9)
}
  0x18   :  { %32 = dma.hbm_to_vmem [thread:$0]  %s5678_s2, 128, %s30_s20, [#allocation9]  }
  0x19   :  { %4998 = dma.done.wait [#allocation6], 256  }
  0x1a   :  { %4999 = vsyncadd [#allocation6], 4294967040 }
  0x1b   :  { %5000 = dma.done.wait [#allocation9], 128  }
  0x1c   :  { %5001 = vsyncadd [#allocation9], 4294967168  ;;  %s62_s25 = scalar_lea.hbm %s5677_s1, 10240  ;;  %s5018_s26 = smov [#allocation2]   ;;  %v5019_v0 = vmov 0.0  }
  0x1d   :  { %s46_s27 = sshll.u32 %s5018_s26, 4  ;;  %51 = vst [vmem:[#allocation4 + $0x8] sm:$0xff] %v5019_v0  ;;  %50 = vst [vmem:[#allocation4] sm:$0xff] %v5019_v0  ;;  %s5020_s2 = smov [#allocation2 + $0x280]   ;;  %s5054_s27 = int_to_ptr.vmem [resolvable:$true] %s46_s27 }
  0x1e   :  { %52 = vst [vmem:[#allocation4 + $0x10] sm:$0xff] %v5019_v0  ;;  %53 = vst [vmem:[#allocation4 + $0x18] sm:$0xff] %v5019_v0  ;;  %s72_s28 = sshll.u32 %s5020_s2, 4  ;;  %s4874_s29 = scalar_lea.vmem %s5054_s27, 10240  ;;  %s5071_s28 = int_to_ptr.vmem [resolvable:$true] %s72_s28 }
  0x1f   :  { %54 = vst [vmem:[#allocation4 + $0x20] sm:$0xff] %v5019_v0  ;;  %55 = vst [vmem:[#allocation4 + $0x28] sm:$0xff] %v5019_v0  ;;  %p4875_p10 = scmp.ne.s32.totalorder %s5054_s27, %s4874_s29  ;;  %s4878_s30 = scalar_lea.vmem %s5054_s27, 20480 }
  0x20   :  { %p4879_p11 = scmp.lt.s32.totalorder %s5054_s27, %s5054_s27  ;;  %p4880_p12 = scmp.lt.s32.totalorder %s4878_s30, %s4874_s29 }
  0x22   :  { %p4881_p13 = por %p4880_p12, %p4879_p11 }
  0x24   :  { %p5061_p0 = pnand %p4881_p13, %p4875_p10 }
  0x26   :  { %4885 = shalt.err (!%p5061_p0)  }
  0x27   :  { %49 = dma.hbm_to_vmem [thread:$0]  %s5677_s1, 10240, %s5054_s27, [#allocation3]  ;;  %vm57_vm0 = vcmask 261120  }
  0x28   :  { %s4896_s7 = scalar_lea.vmem %s5071_s28, 10240  ;;  %p4901_p2 = scmp.lt.s32.totalorder %s5071_s28, %s5054_s27 }
  0x29   :  { %p5075_p1 = scmp.ne.s32.totalorder %s5071_s28, %s4896_s7  ;;  %p4902_p3 = scmp.lt.s32.totalorder %s4878_s30, %s4896_s7 }
  0x2b   :  { %p5081_p4 = por %p4902_p3, %p4901_p2 }
  0x2d   :  { %p4904_p5 = pnand %p5081_p4, %p5075_p1 }
  0x2f   :  { %4907 = shalt.err (!%p4904_p5)  }
  0x30   :  { %75 = dma.hbm_to_vmem [thread:$0]  %s62_s25, 10240, %s5071_s28, [#allocation3 + $0x1]  ;;  %v56_v1 = vld [vmem:[#allocation5] sm:$0xff]  ;;  %v60_v2 = vld [vmem:[#allocation5 + $0x8] sm:$0xff] }
  0x31   :  { %58 = vst.msk [vmem:[#allocation4 + $0x8] sm:$0xff] %vm57_vm0, %v56_v1  ;;  %61 = vst.msk [vmem:[#allocation4 + $0x20] sm:$0xff] %vm57_vm0, %v60_v2 }
  0x32   :  { %5002 = dma.done.wait [#allocation3], 10240 }
  0x33   :  { %5003 = vsyncadd [#allocation3], 4294957056  ;;  %v131_v3 = vld [vmem:[#allocation2 + $0x78] sm:$0xff]  ;;  %v130_v5 = vld [vmem:[#allocation2 + $0x70] sm:$0xff]  ;;  %v107_v23 = vlaneseq  ;;  %s691_s14 = scalar_lea.hbm %s5677_s1, 20480 }
  0x34   :  { %v100_v4 = vld [vmem:[#allocation2 + $0x178] sm:$0xff]  ;;  %3745 = vmatprep.subr.mxu0 %v131_v3  ;;  %v99_v6 = vld [vmem:[#allocation2 + $0x170] sm:$0xff]  ;;  %v129_v7 = vld [vmem:[#allocation2 + $0x68] sm:$0xff] }
  0x35   :  { %3786 = vmatprep.subr.mxu1 %v100_v4  ;;  %3746 = vmatpush3.msra.mxu0 %v131_v3  ;;  %v98_v8 = vld [vmem:[#allocation2 + $0x168] sm:$0xff]  ;;  %v128_v9 = vld [vmem:[#allocation2 + $0x60] sm:$0xff]  ;;  %v127_v11 = vld [vmem:[#allocation2 + $0x58] sm:$0xff]  ;;  %v5103_v30 = vshrl.u32 %v107_v23, 7 }
  0x36   :  { %3787 = vmatpush3.msra.mxu1 %v100_v4  ;;  %3747 = vmatprep.subr.mxu0 %v130_v5  ;;  %v97_v10 = vld [vmem:[#allocation2 + $0x160] sm:$0xff]  ;;  %v96_v12 = vld [vmem:[#allocation2 + $0x158] sm:$0xff]  ;;  %v126_v13 = vld [vmem:[#allocation2 + $0x50] sm:$0xff] }
  0x37   :  { %3788 = vmatprep.subr.mxu1 %v99_v6  ;;  %3748 = vmatpush3.msra.mxu0 %v130_v5  ;;  %v95_v14 = vld [vmem:[#allocation2 + $0x150] sm:$0xff]  ;;  %v125_v15 = vld [vmem:[#allocation2 + $0x48] sm:$0xff]  ;;  %v124_v17 = vld [vmem:[#allocation2 + $0x40] sm:$0xff]  ;;  %vm109_vm1 = vcmp.lt.s32.totalorder %v5103_v30, 2  ;;  %vm320_vm2 = vcmp.lt.s32.totalorder %v5103_v30, 1  ;;  %vm442_vm3 = vcmp.lt.s32.totalorder %v5103_v30, 7 }
  0x38   :  { %3789 = vmatpush3.msra.mxu1 %v99_v6  ;;  %3749 = vmatprep.subr.mxu0 %v129_v7  ;;  %v94_v16 = vld [vmem:[#allocation2 + $0x148] sm:$0xff]  ;;  %v93_v18 = vld [vmem:[#allocation2 + $0x140] sm:$0xff]  ;;  %v123_v19 = vld [vmem:[#allocation2 + $0x38] sm:$0xff]  ;;  %vm564_vm4 = vcmp.lt.s32.totalorder %v5103_v30, 6 }
  0x39   :  { %3790 = vmatprep.subr.mxu1 %v98_v8  ;;  %3750 = vmatpush3.msra.mxu0 %v129_v7  ;;  %v92_v20 = vld [vmem:[#allocation2 + $0x138] sm:$0xff]  ;;  %v122_v21 = vld [vmem:[#allocation2 + $0x30] sm:$0xff]  ;;  %v121_v24 = vld [vmem:[#allocation2 + $0x28] sm:$0xff] }
  0x3a   :  { %3791 = vmatpush3.msra.mxu1 %v98_v8  ;;  %3751 = vmatprep.subr.mxu0 %v128_v9  ;;  %v91_v22 = vld [vmem:[#allocation2 + $0x130] sm:$0xff]  ;;  %v90_v25 = vld [vmem:[#allocation2 + $0x128] sm:$0xff]  ;;  %v120_v26 = vld [vmem:[#allocation2 + $0x20] sm:$0xff] }
  0x3b   :  { %3792 = vmatprep.subr.mxu1 %v97_v10  ;;  %3752 = vmatpush3.msra.mxu0 %v128_v9  ;;  %v89_v27 = vld [vmem:[#allocation2 + $0x120] sm:$0xff]  ;;  %v5101_v29 = vld [vmem:[#allocation4 + $0x28] sm:$0xff]  ;;  %v119_v31 = vld [vmem:[#allocation2 + $0x18] sm:$0xff] }
  0x3c   :  { %3793 = vmatpush3.msra.mxu1 %v97_v10  ;;  %3753 = vmatprep.subr.mxu0 %v127_v11  ;;  %v5099_v28 = vld [vmem:[#allocation4] sm:$0xff]  ;;  %v88_v32 = vld [vmem:[#allocation2 + $0x118] sm:$0xff]  ;;  %v5105_v33 = vld [vmem:[#allocation4 + $0x8] sm:$0xff]  ;;  %v106_v37 = vrot.slane %v5101_v29, 6 }
  0x3d   :  { %3794 = vmatprep.subr.mxu1 %v96_v12  ;;  %3754 = vmatpush3.msra.mxu0 %v127_v11  ;;  %v118_v34 = vld [vmem:[#allocation2 + $0x10] sm:$0xff]  ;;  %v101_v36 = vrot.slane %v5099_v28, 6  ;;  %v117_v38 = vld [vmem:[#allocation2 + $0x8] sm:$0xff]  ;;  %v102_v40 = vrot.slane %v5105_v33, 6  ;;  %v116_v41 = vld [vmem:[#allocation2] sm:$0xff] }
  0x3e   :  { %3795 = vmatpush3.msra.mxu1 %v96_v12  ;;  %3755 = vmatprep.subr.mxu0 %v126_v13  ;;  %v87_v35 = vld [vmem:[#allocation2 + $0x110] sm:$0xff]  ;;  %v86_v39 = vld [vmem:[#allocation2 + $0x108] sm:$0xff]  ;;  %v85_v43 = vld [vmem:[#allocation2 + $0x100] sm:$0xff] }
  0x3f   :  { %3796 = vmatprep.subr.mxu1 %v95_v14  ;;  %3756 = vmatpush3.msra.mxu0 %v126_v13  ;;  %v115_v42 = vsel %vm109_vm1, %v106_v37, %v101_v36  ;;  %v114_v44 = vsel %vm109_vm1, %v101_v36, %v102_v40  ;;  %v342_v45 = vld [vmem:[#allocation2 + $0xf8] sm:$0xff]  ;;  %v341_v46 = vld [vmem:[#allocation2 + $0xf0] sm:$0xff]  ;;  %v340_v48 = vld [vmem:[#allocation2 + $0xe8] sm:$0xff] }
  0x40   :  { %3797 = vmatpush3.msra.mxu1 %v95_v14  ;;  %3757 = vmatprep.subr.mxu0 %v125_v15  ;;  %v464_v47 = vld [vmem:[#allocation2 + $0x1f8] sm:$0xff]  ;;  %v463_v49 = vld [vmem:[#allocation2 + $0x1f0] sm:$0xff]  ;;  %v339_v50 = vld [vmem:[#allocation2 + $0xe0] sm:$0xff] }
  0x41   :  { %3798 = vmatprep.subr.mxu1 %v94_v16  ;;  %3758 = vmatpush3.msra.mxu0 %v125_v15  ;;  %v462_v51 = vld [vmem:[#allocation2 + $0x1e8] sm:$0xff]  ;;  %v338_v52 = vld [vmem:[#allocation2 + $0xd8] sm:$0xff]  ;;  %v461_v53 = vld [vmem:[#allocation2 + $0x1e0] sm:$0xff] }
  0x42   :  { %3799 = vmatpush3.msra.mxu1 %v94_v16  ;;  %3759 = vmatprep.subr.mxu0 %v124_v17  ;;  %v337_v54 = vld [vmem:[#allocation2 + $0xd0] sm:$0xff]  ;;  %v460_v55 = vld [vmem:[#allocation2 + $0x1d8] sm:$0xff]  ;;  %v336_v56 = vld [vmem:[#allocation2 + $0xc8] sm:$0xff] }
  0x43   :  { %3800 = vmatprep.subr.mxu1 %v93_v18  ;;  %3760 = vmatpush3.msra.mxu0 %v124_v17  ;;  %v459_v57 = vld [vmem:[#allocation2 + $0x1d0] sm:$0xff]  ;;  %v335_v58 = vld [vmem:[#allocation2 + $0xc0] sm:$0xff]  ;;  %v458_v59 = vld [vmem:[#allocation2 + $0x1c8] sm:$0xff] }
  0x44   :  { %3801 = vmatpush3.msra.mxu1 %v93_v18  ;;  %3761 = vmatprep.subr.mxu0 %v123_v19  ;;  %v5121_v60 = vld [vmem:[#allocation4 + $0x10] sm:$0xff]  ;;  %v334_v61 = vld [vmem:[#allocation2 + $0xb8] sm:$0xff]  ;;  %v457_v62 = vld [vmem:[#allocation2 + $0x1c0] sm:$0xff]  ;;  %v314_v18 = vrot.slane %v5099_v28, 7 }
  0x45   :  { %3802 = vmatprep.subr.mxu1 %v92_v20  ;;  %3762 = vmatpush3.msra.mxu0 %v123_v19  ;;  %v5123_v63 = vld [vmem:[#allocation4 + $0x18] sm:$0xff]  ;;  %v333_v0 = vld [vmem:[#allocation2 + $0xb0] sm:$0xff]  ;;  %v103_v2 = vrot.slane %v5121_v60, 6  ;;  %v332_v3 = vld [vmem:[#allocation2 + $0xa8] sm:$0xff]  ;;  %v319_v19 = vrot.slane %v5101_v29, 7 }
  0x46   :  { %3803 = vmatpush3.msra.mxu1 %v92_v20  ;;  %3763 = vmatprep.subr.mxu0 %v122_v21  ;;  %v456_v1 = vld [vmem:[#allocation2 + $0x1b8] sm:$0xff]  ;;  %v455_v4 = vld [vmem:[#allocation2 + $0x1b0] sm:$0xff]  ;;  %v104_v5 = vrot.slane %v5123_v63, 6  ;;  %v5127_v6 = vld [vmem:[#allocation4 + $0x20] sm:$0xff] }
  0x47   :  { %3804 = vmatprep.subr.mxu1 %v91_v22  ;;  %3764 = vmatpush3.msra.mxu0 %v122_v21  ;;  %v113_v7 = vsel %vm109_vm1, %v102_v40, %v103_v2  ;;  %v331_v8 = vld [vmem:[#allocation2 + $0xa0] sm:$0xff]  ;;  %v454_v9 = vld [vmem:[#allocation2 + $0x1a8] sm:$0xff]  ;;  %v105_v11 = vrot.slane %v5127_v6, 6  ;;  %v330_v12 = vld [vmem:[#allocation2 + $0x98] sm:$0xff] }
  0x48   :  { %3805 = vmatpush3.msra.mxu1 %v91_v22  ;;  %3765 = vmatprep.subr.mxu0 %v121_v24  ;;  %v112_v10 = vsel %vm109_vm1, %v103_v2, %v104_v5  ;;  %v453_v13 = vld [vmem:[#allocation2 + $0x1a0] sm:$0xff]  ;;  %v329_v15 = vld [vmem:[#allocation2 + $0x90] sm:$0xff]  ;;  %v452_v16 = vld [vmem:[#allocation2 + $0x198] sm:$0xff]  ;;  %v315_v22 = vrot.slane %v5105_v33, 7 }
  0x49   :  { %3806 = vmatprep.subr.mxu1 %v90_v25  ;;  %3766 = vmatpush3.msra.mxu0 %v121_v24  ;;  %v111_v14 = vsel %vm109_vm1, %v104_v5, %v105_v11  ;;  %v110_v17 = vsel %vm109_vm1, %v105_v11, %v106_v37  ;;  %v328_v20 = vld [vmem:[#allocation2 + $0x88] sm:$0xff]  ;;  %v451_v21 = vld [vmem:[#allocation2 + $0x190] sm:$0xff]  ;;  %v327_v23 = vld [vmem:[#allocation2 + $0x80] sm:$0xff]  ;;  %v439_v37 = vrot.slane %v5123_v63, 1  ;;  %v562_v11 = vrot.slane %v5127_v6, 2 }
  0x4a   :  { %3807 = vmatpush3.msra.mxu1 %v90_v25  ;;  %3767 = vmatprep.subr.mxu0 %v120_v26  ;;  %v450_v24 = vld [vmem:[#allocation2 + $0x188] sm:$0xff]  ;;  %v436_v25 = vrot.slane %v5099_v28, 1  ;;  %v586_v36 = vld [vmem:[#allocation2 + $0x278] sm:$0xff]  ;;  %v575_v2 = vld [vmem:[#allocation2 + $0x220] sm:$0xff] }
  0x4b   :  { %3808 = vmatprep.subr.mxu1 %v89_v27  ;;  %3768 = vmatpush3.msra.mxu0 %v120_v26  ;;  %v437_v26 = vrot.slane %v5105_v33, 1  ;;  %v572_v5 = vld [vmem:[#allocation2 + $0x208] sm:$0xff] }
  0x4c   :  { %3809 = vmatpush3.msra.mxu1 %v89_v27  ;;  %3769 = vmatprep.subr.mxu0 %v119_v31  ;;  %v326_v27 = vsel %vm320_vm2, %v319_v19, %v314_v18 }
  0x4d   :  { %3810 = vmatprep.subr.mxu1 %v88_v32  ;;  %3770 = vmatpush3.msra.mxu0 %v119_v31  ;;  %v438_v31 = vrot.slane %v5121_v60, 1 }
  0x4e   :  { %3811 = vmatpush3.msra.mxu1 %v88_v32  ;;  %3771 = vmatprep.subr.mxu0 %v118_v34  ;;  %v325_v32 = vsel %vm320_vm2, %v314_v18, %v315_v22 }
  0x4f   :  { %3812 = vmatprep.subr.mxu1 %v87_v35  ;;  %3772 = vmatpush3.msra.mxu0 %v118_v34  ;;  %v316_v34 = vrot.slane %v5121_v60, 7  ;;  %v446_v40 = vsel %vm442_vm3, %v437_v26, %v438_v31 }
  0x50   :  { %3813 = vmatpush3.msra.mxu1 %v87_v35  ;;  %3773 = vmatprep.subr.mxu0 %v117_v38  ;;  %v449_v35 = vld [vmem:[#allocation2 + $0x180] sm:$0xff] }
  0x51   :  { %3814 = vmatprep.subr.mxu1 %v86_v39  ;;  %3774 = vmatpush3.msra.mxu0 %v117_v38  ;;  %v447_v38 = vsel %vm442_vm3, %v436_v25, %v437_v26 }
  0x52   :  { %3815 = vmatpush3.msra.mxu1 %v86_v39  ;;  %3775 = vmatprep.subr.mxu0 %v116_v41  ;;  %v317_v39 = vrot.slane %v5123_v63, 7 }
  0x53   :  { %3777 = vmatprep.mubr.f32.mxu0 %v115_v42  ;;  %3776 = vmatpush3.msra.mxu0 %v116_v41  ;;  %v440_v41 = vrot.slane %v5127_v6, 1  ;;  %v585_v42 = vld [vmem:[#allocation2 + $0x270] sm:$0xff] }
  0x54   :  { %3816 = vmatprep.subr.mxu1 %v85_v43  ;;  %3778 = vmatmul.mubr.f32.vlgmr.msra.gmra.mxu0 %v114_v44  ;;  %v318_v44 = vrot.slane %v5127_v6, 7 }
  0x55   :  { %3817 = vmatpush3.msra.mxu1 %v85_v43  ;;  %3818 = vmatprep.mubr.f32.mxu1 %v5099_v28  ;;  %v324_v43 = vsel %vm320_vm2, %v315_v22, %v316_v34 }
  0x56   :  { %3827 = vmatprep.subr.mxu0 %v342_v45  ;;  %3819 = vmatmul.mubr.f32.vlgmr.msra.gmra.mxu1 %v5105_v33 }
  0x57   :  { %3828 = vmatpush3.msra.mxu0 %v342_v45  ;;  %3868 = vmatprep.subr.mxu1 %v464_v47  ;;  %v445_v45 = vsel %vm442_vm3, %v438_v31, %v439_v37 }
  0x58   :  { %3829 = vmatprep.subr.mxu0 %v341_v46  ;;  %3869 = vmatpush3.msra.mxu1 %v464_v47  ;;  %v323_v47 = vsel %vm320_vm2, %v316_v34, %v317_v39 }
  0x59   :  { %3830 = vmatpush3.msra.mxu0 %v341_v46  ;;  %3870 = vmatprep.subr.mxu1 %v463_v49  ;;  %v441_v46 = vrot.slane %v5101_v29, 1 }
  0x5a   :  { %3831 = vmatprep.subr.mxu0 %v340_v48  ;;  %3871 = vmatpush3.msra.mxu1 %v463_v49  ;;  %v444_v49 = vsel %vm442_vm3, %v439_v37, %v440_v41 }
  0x5b   :  { %3832 = vmatpush3.msra.mxu0 %v340_v48  ;;  %3872 = vmatprep.subr.mxu1 %v462_v51  ;;  %v584_v48 = vld [vmem:[#allocation2 + $0x268] sm:$0xff] }
  0x5c   :  { %3833 = vmatprep.subr.mxu0 %v339_v50  ;;  %3873 = vmatpush3.msra.mxu1 %v462_v51  ;;  %v322_v51 = vsel %vm320_vm2, %v317_v39, %v318_v44 }
  0x5d   :  { %3834 = vmatpush3.msra.mxu0 %v339_v50  ;;  %3874 = vmatprep.subr.mxu1 %v461_v53  ;;  %v583_v50 = vld [vmem:[#allocation2 + $0x260] sm:$0xff] }
  0x5e   :  { %3835 = vmatprep.subr.mxu0 %v338_v52  ;;  %3875 = vmatpush3.msra.mxu1 %v461_v53  ;;  %v559_v53 = vrot.slane %v5105_v33, 2  ;;  %v448_v33 = vsel %vm442_vm3, %v441_v46, %v436_v25 }
  0x5f   :  { %3836 = vmatpush3.msra.mxu0 %v338_v52  ;;  %3876 = vmatprep.subr.mxu1 %v460_v55  ;;  %v558_v52 = vrot.slane %v5099_v28, 2 }
  0x60   :  { %3837 = vmatprep.subr.mxu0 %v337_v54  ;;  %3877 = vmatpush3.msra.mxu1 %v460_v55  ;;  %v321_v55 = vsel %vm320_vm2, %v318_v44, %v319_v19 }
  0x61   :  { %3838 = vmatpush3.msra.mxu0 %v337_v54  ;;  %3878 = vmatprep.subr.mxu1 %v459_v57  ;;  %v443_v54 = vsel %vm442_vm3, %v440_v41, %v441_v46 }
  0x62   :  { %3839 = vmatprep.subr.mxu0 %v336_v56  ;;  %3879 = vmatpush3.msra.mxu1 %v459_v57  ;;  %v581_v57 = vld [vmem:[#allocation2 + $0x250] sm:$0xff] }
  0x63   :  { %3840 = vmatpush3.msra.mxu0 %v336_v56  ;;  %3880 = vmatprep.subr.mxu1 %v458_v59  ;;  %v582_v56 = vld [vmem:[#allocation2 + $0x258] sm:$0xff] }
  0x64   :  { %3841 = vmatprep.subr.mxu0 %v335_v58  ;;  %3881 = vmatpush3.msra.mxu1 %v458_v59  ;;  %v580_v59 = vld [vmem:[#allocation2 + $0x248] sm:$0xff] }
  0x65   :  { %3842 = vmatpush3.msra.mxu0 %v335_v58  ;;  %3882 = vmatprep.subr.mxu1 %v457_v62  ;;  %v569_v58 = vsel %vm564_vm4, %v558_v52, %v559_v53 }
  0x66   :  { %3843 = vmatprep.subr.mxu0 %v334_v61  ;;  %3883 = vmatpush3.msra.mxu1 %v457_v62  ;;  %v578_v62 = vld [vmem:[#allocation2 + $0x238] sm:$0xff] }
  0x67   :  { %3844 = vmatpush3.msra.mxu0 %v334_v61  ;;  %3884 = vmatprep.subr.mxu1 %v456_v1  ;;  %v579_v61 = vld [vmem:[#allocation2 + $0x240] sm:$0xff] }
  0x68   :  { %3845 = vmatprep.subr.mxu0 %v333_v0  ;;  %3885 = vmatpush3.msra.mxu1 %v456_v1  ;;  %v576_v1 = vld [vmem:[#allocation2 + $0x228] sm:$0xff] }
  0x69   :  { %3846 = vmatpush3.msra.mxu0 %v333_v0  ;;  %3886 = vmatprep.subr.mxu1 %v455_v4  ;;  %v577_v0 = vld [vmem:[#allocation2 + $0x230] sm:$0xff] }
  0x6a   :  { %3847 = vmatprep.subr.mxu0 %v332_v3  ;;  %3887 = vmatpush3.msra.mxu1 %v455_v4  ;;  %v573_v4 = vld [vmem:[#allocation2 + $0x210] sm:$0xff] }
  0x6b   :  { %3848 = vmatpush3.msra.mxu0 %v332_v3  ;;  %3780 = vmatprep.mubr.f32.mxu0 %v113_v7  ;;  %v574_v3 = vld [vmem:[#allocation2 + $0x218] sm:$0xff]  ;;  %v560_v7 = vrot.slane %v5121_v60, 2 }
  0x6c   :  { %3821 = vmatprep.mubr.f32.mxu1 %v5121_v60  ;;  %3849 = vmatprep.subr.mxu0 %v331_v8 }
  0x6d   :  { %3888 = vmatprep.subr.mxu1 %v454_v9  ;;  %3781 = vmatmul.mubr.f32.gmra.mxu0 %v112_v10  ;;  %v568_v10 = vsel %vm564_vm4, %v559_v53, %v560_v7 }
  0x6e   :  { %3822 = vmatmul.mubr.f32.gmra.mxu1 %v5123_v63  ;;  %3850 = vmatpush3.msra.mxu0 %v331_v8  ;;  %v561_v8 = vrot.slane %v5123_v63, 2 }
  0x6f   :  { %3889 = vmatpush3.msra.mxu1 %v454_v9  ;;  %3851 = vmatprep.subr.mxu0 %v330_v12  ;;  %v571_v9 = vld [vmem:[#allocation2 + $0x200] sm:$0xff] }
  0x70   :  { %3890 = vmatprep.subr.mxu1 %v453_v13  ;;  %3852 = vmatpush3.msra.mxu0 %v330_v12  ;;  %v567_v12 = vsel %vm564_vm4, %v560_v7, %v561_v8  ;;  %v566_v60 = vsel %vm564_vm4, %v561_v8, %v562_v11 }
  0x71   :  { %3891 = vmatpush3.msra.mxu1 %v453_v13  ;;  %3783 = vmatprep.mubr.f32.mxu0 %v111_v14  ;;  %v563_v13 = vrot.slane %v5101_v29, 2 }
  0x72   :  { %3824 = vmatprep.mubr.f32.mxu1 %v5127_v6  ;;  %3853 = vmatprep.subr.mxu0 %v329_v15 }
  0x73   :  { %3892 = vmatprep.subr.mxu1 %v452_v16  ;;  %3784 = vmatmul.mubr.f32.gmra.mxu0 %v110_v17  ;;  %v565_v63 = vsel %vm564_vm4, %v562_v11, %v563_v13  ;;  %v570_v6 = vsel %vm564_vm4, %v563_v13, %v558_v52 }
  0x74   :  { %3825 = vmatmul.mubr.f32.gmra.mxu1 %v5101_v29  ;;  %3854 = vmatpush3.msra.mxu0 %v329_v15 }
  0x75   :  { %3893 = vmatpush3.msra.mxu1 %v452_v16  ;;  %3855 = vmatprep.subr.mxu0 %v328_v20 }
  0x76   :  { %3894 = vmatprep.subr.mxu1 %v451_v21  ;;  %3856 = vmatpush3.msra.mxu0 %v328_v20 }
  0x77   :  { %3895 = vmatpush3.msra.mxu1 %v451_v21  ;;  %3857 = vmatprep.subr.mxu0 %v327_v23 }
  0x78   :  { %3896 = vmatprep.subr.mxu1 %v450_v24  ;;  %3858 = vmatpush3.msra.mxu0 %v327_v23 }
  0x79   :  { %3859 = vmatprep.mubr.f32.mxu0 %v326_v27  ;;  %3897 = vmatpush3.msra.mxu1 %v450_v24 }
  0x7a   :  { %3860 = vmatmul.mubr.f32.vlgmr.msra.gmra.mxu0 %v325_v32  ;;  %3898 = vmatprep.subr.mxu1 %v449_v35 }
  0x7b   :  { %3909 = vmatprep.subr.mxu0 %v586_v36  ;;  %3899 = vmatpush3.msra.mxu1 %v449_v35 }
  0x7c   :  { %3900 = vmatprep.mubr.f32.mxu1 %v447_v38  ;;  %3910 = vmatpush3.msra.mxu0 %v586_v36 }
  0x7d   :  { %3901 = vmatmul.mubr.f32.vlgmr.msra.gmra.mxu1 %v446_v40  ;;  %3911 = vmatprep.subr.mxu0 %v585_v42 }
  0x7e   :  { %3862 = vmatprep.mubr.f32.mxu0 %v324_v43  ;;  %3912 = vmatpush3.msra.mxu0 %v585_v42 }
  0x7f   :  { %3903 = vmatprep.mubr.f32.mxu1 %v445_v45  ;;  %3863 = vmatmul.mubr.f32.gmra.mxu0 %v323_v47 }
  0x80   :  { %3913 = vmatprep.subr.mxu0 %v584_v48  ;;  %3865 = vmatprep.mubr.f32.mxu0 %v322_v51 }
  0x81   :  { %3914 = vmatpush3.msra.mxu0 %v584_v48  ;;  %3904 = vmatmul.mubr.f32.gmra.mxu1 %v444_v49 }
  0x82   :  { %3915 = vmatprep.subr.mxu0 %v583_v50  ;;  %3906 = vmatprep.mubr.f32.mxu1 %v443_v54 }
  0x83   :  { %3916 = vmatpush3.msra.mxu0 %v583_v50 }
  0x84   :  { %3866 = vmatmul.mubr.f32.gmra.mxu0 %v321_v55  ;;  %3917 = vmatprep.subr.mxu0 %v582_v56 }
  0x85   :  { %3918 = vmatpush3.msra.mxu0 %v582_v56  ;;  %3907 = vmatmul.mubr.f32.gmra.mxu1 %v448_v33 }
  0x86   :  { %3919 = vmatprep.subr.mxu0 %v581_v57  ;;  %3941 = vmatprep.mubr.f32.mxu0 %v569_v58 }
  0x87   :  { %3920 = vmatpush3.msra.mxu0 %v581_v57 }
  0x88   :  { %3921 = vmatprep.subr.mxu0 %v580_v59 }
  0x89   :  { %3922 = vmatpush3.msra.mxu0 %v580_v59 }
  0x8a   :  { %3923 = vmatprep.subr.mxu0 %v579_v61 }
  0x8b   :  { %3924 = vmatpush3.msra.mxu0 %v579_v61 }
  0x8c   :  { %3925 = vmatprep.subr.mxu0 %v578_v62 }
  0x8d   :  { %3926 = vmatpush3.msra.mxu0 %v578_v62 }
  0x8e   :  { %3927 = vmatprep.subr.mxu0 %v577_v0 }
  0x8f   :  { %3928 = vmatpush3.msra.mxu0 %v577_v0 }
  0x90   :  { %3929 = vmatprep.subr.mxu0 %v576_v1 }
  0x91   :  { %3930 = vmatpush3.msra.mxu0 %v576_v1 }
  0x92   :  { %3931 = vmatprep.subr.mxu0 %v575_v2 }
  0x93   :  { %3932 = vmatpush3.msra.mxu0 %v575_v2 }
  0x94   :  { %3933 = vmatprep.subr.mxu0 %v574_v3 }
  0x95   :  { %3934 = vmatpush3.msra.mxu0 %v574_v3 }
  0x96   :  { %3935 = vmatprep.subr.mxu0 %v573_v4 }
  0x97   :  { %3936 = vmatpush3.msra.mxu0 %v573_v4 }
  0x98   :  { %3937 = vmatprep.subr.mxu0 %v572_v5 }
  0x99   :  { %3938 = vmatpush3.msra.mxu0 %v572_v5 }
  0x9a   :  { %3939 = vmatprep.subr.mxu0 %v571_v9 }
  0x9b   :  { %3940 = vmatpush3.msra.mxu0 %v571_v9 }
  0x9c   :  { %3942 = vmatmul.mubr.f32.vlgmr.msra.gmra.mxu0 %v568_v10 }
  0x9d   :  { %3944 = vmatprep.mubr.f32.mxu0 %v567_v12 }
  0xa0   :  { %3945 = vmatmul.mubr.f32.gmra.mxu0 %v566_v60 }
  0xa1   :  { %3947 = vmatprep.mubr.f32.mxu0 %v565_v63 }
  0xa4   :  { %3948 = vmatmul.mubr.f32.gmra.mxu0 %v570_v6 }
  0xa5   :  { %4930 = shalt.err (!%p5061_p0)  }
  0xa6   :  { %702 = dma.hbm_to_vmem [thread:$0]  %s691_s14, 10240, %s5054_s27, [#allocation3]  ;;  %v3188_v43 = vld [vmem:[#allocation8] ss:$0 sm:$0xff] }
 0x114   :  { %v3779_v29 = vpop.f32.mrf.mxu0 }
 0x116   :  { %v3820_v14 = vpop.f32.mrf.mxu1  ;;  %v198_v15 = vpop.f32.mrf.mxu0 }
 0x117   :  { %v294_v38 = vadd.f32 %v3820_v14, %v3779_v29 }
 0x118   :  { %v289_v16 = vpop.f32.mrf.mxu1 }
 0x12d   :  { %v3782_v17 = vpop.f32.mrf.mxu0 }
 0x12e   :  { %v3823_v18 = vpop.f32.mrf.mxu1 }
 0x12f   :  { %v207_v19 = vpop.f32.mrf.mxu0 }
 0x130   :  { %v298_v28 = vpop.f32.mrf.mxu1 }
 0x133   :  { %v3785_v20 = vpop.f32.mrf.mxu0 }
 0x134   :  { %v3826_v21 = vpop.f32.mrf.mxu1 }
 0x135   :  { %v215_v22 = vpop.f32.mrf.mxu0 }
 0x136   :  { %v306_v24 = vpop.f32.mrf.mxu1 }
 0x137   :  { %v307_v46 = vadd.f32 %v306_v24, %v215_v22 }
 0x13a   :  { %v3861_v23 = vpop.f32.mrf.mxu0 }
 0x13b   :  { %v434_v39 = vadd.f32 %v3861_v23, %v294_v38 }
 0x13c   :  { %v409_v25 = vpop.f32.mrf.mxu0 }
 0x13d   :  { %v3902_v26 = vpop.f32.mrf.mxu1 }
 0x13e   :  { %v556_v41 = vadd.f32 %v3902_v26, %v434_v39 }
 0x13f   :  { %v531_v27 = vpop.f32.mrf.mxu1  ;;  %v3864_v31 = vpop.f32.mrf.mxu0 }
 0x141   :  { %v3905_v32 = vpop.f32.mrf.mxu1  ;;  %v418_v34 = vpop.f32.mrf.mxu0 }
 0x143   :  { %v540_v35 = vpop.f32.mrf.mxu1 }
 0x144   :  { %v3867_v36 = vpop.f32.mrf.mxu0 }
 0x145   :  { %v3908_v37 = vpop.f32.mrf.mxu1 }
 0x146   :  { %v426_v40 = vpop.f32.mrf.mxu0 }
 0x147   :  { %v435_v49 = vadd.f32 %v426_v40, %v307_v46  ;;  %v548_v50 = vpop.f32.mrf.mxu1 }
 0x149   :  { %v557_v53 = vadd.f32 %v548_v50, %v435_v49 }
 0x15c   :  { %v3943_v42 = vpop.f32.mrf.mxu0 }
 0x15d   :  { %v678_v44 = vadd.f32 %v3943_v42, %v556_v41 }
 0x15e   :  { %v653_v45 = vpop.f32.mrf.mxu0 }
 0x15f   :  { %v685_v47 = vadd.f32 %v3188_v43, %v678_v44 }
 0x160   :  { %v3946_v48 = vpop.f32.mrf.mxu0 }
 0x161   :  { %4810 = vtanh.f32 %v685_v47 }
 0x162   :  { %v662_v51 = vpop.f32.mrf.mxu0 }
 0x164   :  { %v3949_v52 = vpop.f32.mrf.mxu0 }
 0x166   :  { %v670_v54 = vpop.f32.mrf.mxu0 }
 0x167   :  { %v679_v55 = vadd.f32 %v670_v54, %v557_v53 }
 0x169   :  { %v688_v56 = vadd.f32 %v3188_v43, %v679_v55 }
 0x16b   :  { %4812 = vtanh.f32 %v688_v56 }
 0x16e   :  { %v4811_v33 = vpop.eup %4810 }
 0x16f   :  { %687 = vst [vmem:[#allocation4 + $0x8] sm:$0xff] %v4811_v33 }
 0x178   :  { %v4813_v57 = vpop.eup %4812 }
 0x179   :  { %690 = vst [vmem:[#allocation4 + $0x20] sm:$0xff] %v4813_v57 }
 0x17a   :  { %5004 = dma.done.wait [#allocation3 + $0x1], 10240 }
 0x17b   :  { %5005 = vsyncadd [#allocation3 + $0x1], 4294957056  ;;  %v754_v58 = vld [vmem:[#allocation2 + $0x2f8] sm:$0xff]  ;;  %v753_v61 = vld [vmem:[#allocation2 + $0x2f0] sm:$0xff]  ;;  %s1311_s19 = scalar_lea.hbm %s5677_s1, 30720 }
 0x17c   :  { %v726_v59 = vld [vmem:[#allocation2 + $0x3f8] sm:$0xff]  ;;  %3950 = vmatprep.subr.mxu1 %v754_v58  ;;  %v725_v62 = vld [vmem:[#allocation2 + $0x3f0] sm:$0xff]  ;;  %v752_v0 = vld [vmem:[#allocation2 + $0x2e8] sm:$0xff] }
 0x17d   :  { %3991 = vmatprep.subr.mxu0 %v726_v59  ;;  %3951 = vmatpush3.msra.mxu1 %v754_v58  ;;  %v724_v1 = vld [vmem:[#allocation2 + $0x3e8] sm:$0xff]  ;;  %v751_v2 = vld [vmem:[#allocation2 + $0x2e0] sm:$0xff]  ;;  %v750_v4 = vld [vmem:[#allocation2 + $0x2d8] sm:$0xff] }
 0x17e   :  { %3992 = vmatpush3.msra.mxu0 %v726_v59  ;;  %3952 = vmatprep.subr.mxu1 %v753_v61  ;;  %v723_v3 = vld [vmem:[#allocation2 + $0x3e0] sm:$0xff]  ;;  %v722_v5 = vld [vmem:[#allocation2 + $0x3d8] sm:$0xff]  ;;  %v749_v7 = vld [vmem:[#allocation2 + $0x2d0] sm:$0xff] }
 0x17f   :  { %3993 = vmatprep.subr.mxu0 %v725_v62  ;;  %3953 = vmatpush3.msra.mxu1 %v753_v61  ;;  %v721_v8 = vld [vmem:[#allocation2 + $0x3d0] sm:$0xff]  ;;  %v748_v9 = vld [vmem:[#allocation2 + $0x2c8] sm:$0xff]  ;;  %v747_v11 = vld [vmem:[#allocation2 + $0x2c0] sm:$0xff] }
 0x180   :  { %3994 = vmatpush3.msra.mxu0 %v725_v62  ;;  %3954 = vmatprep.subr.mxu1 %v752_v0  ;;  %v720_v10 = vld [vmem:[#allocation2 + $0x3c8] sm:$0xff]  ;;  %v719_v12 = vld [vmem:[#allocation2 + $0x3c0] sm:$0xff]  ;;  %v746_v13 = vld [vmem:[#allocation2 + $0x2b8] sm:$0xff] }
 0x181   :  { %3995 = vmatprep.subr.mxu0 %v724_v1  ;;  %3955 = vmatpush3.msra.mxu1 %v752_v0  ;;  %v718_v60 = vld [vmem:[#allocation2 + $0x3b8] sm:$0xff]  ;;  %v745_v63 = vld [vmem:[#allocation2 + $0x2b0] sm:$0xff]  ;;  %v744_v29 = vld [vmem:[#allocation2 + $0x2a8] sm:$0xff] }
 0x182   :  { %3996 = vmatpush3.msra.mxu0 %v724_v1  ;;  %3956 = vmatprep.subr.mxu1 %v751_v2  ;;  %v717_v6 = vld [vmem:[#allocation2 + $0x3b0] sm:$0xff]  ;;  %v716_v14 = vld [vmem:[#allocation2 + $0x3a8] sm:$0xff]  ;;  %v743_v15 = vld [vmem:[#allocation2 + $0x2a0] sm:$0xff] }
 0x183   :  { %3997 = vmatprep.subr.mxu0 %v723_v3  ;;  %3957 = vmatpush3.msra.mxu1 %v751_v2  ;;  %v715_v16 = vld [vmem:[#allocation2 + $0x3a0] sm:$0xff]  ;;  %v5219_v18 = vld [vmem:[#allocation4 + $0x28] sm:$0xff]  ;;  %v742_v19 = vld [vmem:[#allocation2 + $0x298] sm:$0xff] }
 0x184   :  { %3998 = vmatpush3.msra.mxu0 %v723_v3  ;;  %3958 = vmatprep.subr.mxu1 %v750_v4  ;;  %v5217_v17 = vld [vmem:[#allocation4] sm:$0xff]  ;;  %v714_v28 = vld [vmem:[#allocation2 + $0x398] sm:$0xff]  ;;  %v5221_v20 = vld [vmem:[#allocation4 + $0x8] sm:$0xff]  ;;  %v732_v24 = vrot.slane %v5219_v18, 6 }
 0x185   :  { %3999 = vmatprep.subr.mxu0 %v722_v5  ;;  %3959 = vmatpush3.msra.mxu1 %v750_v4  ;;  %v741_v21 = vld [vmem:[#allocation2 + $0x290] sm:$0xff]  ;;  %v727_v23 = vrot.slane %v5217_v17, 6  ;;  %v740_v25 = vld [vmem:[#allocation2 + $0x288] sm:$0xff]  ;;  %v728_v27 = vrot.slane %v5221_v20, 6  ;;  %v739_v31 = vld [vmem:[#allocation2 + $0x280] sm:$0xff] }
 0x186   :  { %4000 = vmatpush3.msra.mxu0 %v722_v5  ;;  %3960 = vmatprep.subr.mxu1 %v749_v7  ;;  %v713_v22 = vld [vmem:[#allocation2 + $0x390] sm:$0xff]  ;;  %v712_v26 = vld [vmem:[#allocation2 + $0x388] sm:$0xff]  ;;  %v711_v34 = vld [vmem:[#allocation2 + $0x380] sm:$0xff] }
 0x187   :  { %4001 = vmatprep.subr.mxu0 %v721_v8  ;;  %3961 = vmatpush3.msra.mxu1 %v749_v7  ;;  %v738_v32 = vsel %vm109_vm1, %v732_v24, %v727_v23  ;;  %v737_v35 = vsel %vm109_vm1, %v727_v23, %v728_v27  ;;  %v964_v36 = vld [vmem:[#allocation2 + $0x378] sm:$0xff]  ;;  %v963_v37 = vld [vmem:[#allocation2 + $0x370] sm:$0xff]  ;;  %v962_v39 = vld [vmem:[#allocation2 + $0x368] sm:$0xff] }
 0x188   :  { %4002 = vmatpush3.msra.mxu0 %v721_v8  ;;  %3962 = vmatprep.subr.mxu1 %v748_v9  ;;  %v1085_v38 = vld [vmem:[#allocation2 + $0x478] sm:$0xff]  ;;  %v1084_v40 = vld [vmem:[#allocation2 + $0x470] sm:$0xff]  ;;  %v961_v41 = vld [vmem:[#allocation2 + $0x360] sm:$0xff] }
 0x189   :  { %4003 = vmatprep.subr.mxu0 %v720_v10  ;;  %3963 = vmatpush3.msra.mxu1 %v748_v9  ;;  %v1083_v42 = vld [vmem:[#allocation2 + $0x468] sm:$0xff]  ;;  %v960_v43 = vld [vmem:[#allocation2 + $0x358] sm:$0xff]  ;;  %v1082_v44 = vld [vmem:[#allocation2 + $0x460] sm:$0xff] }
 0x18a   :  { %4004 = vmatpush3.msra.mxu0 %v720_v10  ;;  %3964 = vmatprep.subr.mxu1 %v747_v11  ;;  %v959_v45 = vld [vmem:[#allocation2 + $0x350] sm:$0xff]  ;;  %v1081_v46 = vld [vmem:[#allocation2 + $0x458] sm:$0xff]  ;;  %v958_v47 = vld [vmem:[#allocation2 + $0x348] sm:$0xff] }
 0x18b   :  { %4005 = vmatprep.subr.mxu0 %v719_v12  ;;  %3965 = vmatpush3.msra.mxu1 %v747_v11  ;;  %v1080_v48 = vld [vmem:[#allocation2 + $0x450] sm:$0xff]  ;;  %v957_v49 = vld [vmem:[#allocation2 + $0x340] sm:$0xff]  ;;  %v1079_v50 = vld [vmem:[#allocation2 + $0x448] sm:$0xff]  ;;  %v937_v11 = vrot.slane %v5217_v17, 7 }
 0x18c   :  { %4006 = vmatpush3.msra.mxu0 %v719_v12  ;;  %3966 = vmatprep.subr.mxu1 %v746_v13  ;;  %v5236_v51 = vld [vmem:[#allocation4 + $0x10] sm:$0xff]  ;;  %v956_v52 = vld [vmem:[#allocation2 + $0x338] sm:$0xff]  ;;  %v1078_v53 = vld [vmem:[#allocation2 + $0x440] sm:$0xff]  ;;  %v942_v12 = vrot.slane %v5219_v18, 7 }
 0x18d   :  { %4007 = vmatprep.subr.mxu0 %v718_v60  ;;  %3967 = vmatpush3.msra.mxu1 %v746_v13  ;;  %v5238_v54 = vld [vmem:[#allocation4 + $0x18] sm:$0xff]  ;;  %v955_v55 = vld [vmem:[#allocation2 + $0x330] sm:$0xff]  ;;  %v729_v33 = vrot.slane %v5236_v51, 6  ;;  %v954_v57 = vld [vmem:[#allocation2 + $0x328] sm:$0xff] }
 0x18e   :  { %4008 = vmatpush3.msra.mxu0 %v718_v60  ;;  %3968 = vmatprep.subr.mxu1 %v745_v63  ;;  %v1077_v56 = vld [vmem:[#allocation2 + $0x438] sm:$0xff]  ;;  %v1076_v58 = vld [vmem:[#allocation2 + $0x430] sm:$0xff]  ;;  %v730_v59 = vrot.slane %v5238_v54, 6  ;;  %v5242_v61 = vld [vmem:[#allocation4 + $0x20] sm:$0xff] }
 0x18f   :  { %4009 = vmatprep.subr.mxu0 %v717_v6  ;;  %3969 = vmatpush3.msra.mxu1 %v745_v63  ;;  %v736_v62 = vsel %vm109_vm1, %v728_v27, %v729_v33  ;;  %v953_v0 = vld [vmem:[#allocation2 + $0x320] sm:$0xff]  ;;  %v1075_v1 = vld [vmem:[#allocation2 + $0x428] sm:$0xff]  ;;  %v731_v3 = vrot.slane %v5242_v61, 6  ;;  %v952_v4 = vld [vmem:[#allocation2 + $0x318] sm:$0xff]  ;;  %v938_v63 = vrot.slane %v5221_v20, 7 }
 0x190   :  { %4010 = vmatpush3.msra.mxu0 %v717_v6  ;;  %3970 = vmatprep.subr.mxu1 %v744_v29  ;;  %v735_v2 = vsel %vm109_vm1, %v729_v33, %v730_v59  ;;  %v1074_v5 = vld [vmem:[#allocation2 + $0x420] sm:$0xff]  ;;  %v951_v8 = vld [vmem:[#allocation2 + $0x310] sm:$0xff]  ;;  %v1073_v9 = vld [vmem:[#allocation2 + $0x418] sm:$0xff] }
 0x191   :  { %4011 = vmatprep.subr.mxu0 %v716_v14  ;;  %3971 = vmatpush3.msra.mxu1 %v744_v29  ;;  %v734_v7 = vsel %vm109_vm1, %v730_v59, %v731_v3  ;;  %v733_v10 = vsel %vm109_vm1, %v731_v3, %v732_v24  ;;  %v950_v13 = vld [vmem:[#allocation2 + $0x308] sm:$0xff]  ;;  %v1072_v60 = vld [vmem:[#allocation2 + $0x410] sm:$0xff]  ;;  %v949_v6 = vld [vmem:[#allocation2 + $0x300] sm:$0xff]  ;;  %v1061_v24 = vrot.slane %v5238_v54, 1  ;;  %v1183_v3 = vrot.slane %v5242_v61, 2 }
 0x192   :  { %4012 = vmatpush3.msra.mxu0 %v716_v14  ;;  %3972 = vmatprep.subr.mxu1 %v743_v15  ;;  %v1071_v29 = vld [vmem:[#allocation2 + $0x408] sm:$0xff]  ;;  %v1058_v14 = vrot.slane %v5217_v17, 1  ;;  %v1206_v23 = vld [vmem:[#allocation2 + $0x4f8] sm:$0xff]  ;;  %v1195_v33 = vld [vmem:[#allocation2 + $0x4a0] sm:$0xff] }
 0x193   :  { %4013 = vmatprep.subr.mxu0 %v715_v16  ;;  %3973 = vmatpush3.msra.mxu1 %v743_v15  ;;  %v1059_v15 = vrot.slane %v5221_v20, 1  ;;  %v1192_v59 = vld [vmem:[#allocation2 + $0x488] sm:$0xff] }
 0x194   :  { %4014 = vmatpush3.msra.mxu0 %v715_v16  ;;  %3974 = vmatprep.subr.mxu1 %v742_v19  ;;  %v948_v16 = vsel %vm320_vm2, %v942_v12, %v937_v11 }
 0x195   :  { %4015 = vmatprep.subr.mxu0 %v714_v28  ;;  %3975 = vmatpush3.msra.mxu1 %v742_v19  ;;  %v1060_v19 = vrot.slane %v5236_v51, 1 }
 0x196   :  { %4016 = vmatpush3.msra.mxu0 %v714_v28  ;;  %3976 = vmatprep.subr.mxu1 %v741_v21  ;;  %v947_v28 = vsel %vm320_vm2, %v937_v11, %v938_v63 }
 0x197   :  { %4017 = vmatprep.subr.mxu0 %v713_v22  ;;  %3977 = vmatpush3.msra.mxu1 %v741_v21  ;;  %v939_v21 = vrot.slane %v5236_v51, 7  ;;  %v1067_v27 = vsel %vm442_vm3, %v1059_v15, %v1060_v19 }
 0x198   :  { %4018 = vmatpush3.msra.mxu0 %v713_v22  ;;  %3978 = vmatprep.subr.mxu1 %v740_v25  ;;  %v1070_v22 = vld [vmem:[#allocation2 + $0x400] sm:$0xff] }
 0x199   :  { %4019 = vmatprep.subr.mxu0 %v712_v26  ;;  %3979 = vmatpush3.msra.mxu1 %v740_v25  ;;  %v1068_v25 = vsel %vm442_vm3, %v1058_v14, %v1059_v15 }
 0x19a   :  { %4020 = vmatpush3.msra.mxu0 %v712_v26  ;;  %3980 = vmatprep.subr.mxu1 %v739_v31  ;;  %v940_v26 = vrot.slane %v5238_v54, 7 }
 0x19b   :  { %3982 = vmatprep.mubr.f32.mxu1 %v738_v32  ;;  %3981 = vmatpush3.msra.mxu1 %v739_v31  ;;  %v1062_v31 = vrot.slane %v5242_v61, 1  ;;  %v1205_v32 = vld [vmem:[#allocation2 + $0x4f0] sm:$0xff] }
 0x19c   :  { %4021 = vmatprep.subr.mxu0 %v711_v34  ;;  %3983 = vmatmul.mubr.f32.vlgmr.msra.gmra.mxu1 %v737_v35  ;;  %v941_v35 = vrot.slane %v5242_v61, 7 }
 0x19d   :  { %4022 = vmatpush3.msra.mxu0 %v711_v34  ;;  %4023 = vmatprep.mubr.f32.mxu0 %v5217_v17  ;;  %v946_v34 = vsel %vm320_vm2, %v938_v63, %v939_v21 }
 0x19e   :  { %4032 = vmatprep.subr.mxu1 %v964_v36  ;;  %4024 = vmatmul.mubr.f32.vlgmr.msra.gmra.mxu0 %v5221_v20 }
 0x19f   :  { %4033 = vmatpush3.msra.mxu1 %v964_v36  ;;  %4073 = vmatprep.subr.mxu0 %v1085_v38  ;;  %v1066_v36 = vsel %vm442_vm3, %v1060_v19, %v1061_v24 }
 0x1a0   :  { %4034 = vmatprep.subr.mxu1 %v963_v37  ;;  %4074 = vmatpush3.msra.mxu0 %v1085_v38  ;;  %v945_v38 = vsel %vm320_vm2, %v939_v21, %v940_v26 }
 0x1a1   :  { %4035 = vmatpush3.msra.mxu1 %v963_v37  ;;  %4075 = vmatprep.subr.mxu0 %v1084_v40  ;;  %v1063_v37 = vrot.slane %v5219_v18, 1 }
 0x1a2   :  { %4036 = vmatprep.subr.mxu1 %v962_v39  ;;  %4076 = vmatpush3.msra.mxu0 %v1084_v40  ;;  %v1065_v40 = vsel %vm442_vm3, %v1061_v24, %v1062_v31 }
 0x1a3   :  { %4037 = vmatpush3.msra.mxu1 %v962_v39  ;;  %4077 = vmatprep.subr.mxu0 %v1083_v42  ;;  %v1204_v39 = vld [vmem:[#allocation2 + $0x4e8] sm:$0xff] }
 0x1a4   :  { %4038 = vmatprep.subr.mxu1 %v961_v41  ;;  %4078 = vmatpush3.msra.mxu0 %v1083_v42  ;;  %v944_v42 = vsel %vm320_vm2, %v940_v26, %v941_v35 }
 0x1a5   :  { %4039 = vmatpush3.msra.mxu1 %v961_v41  ;;  %4079 = vmatprep.subr.mxu0 %v1082_v44  ;;  %v1203_v41 = vld [vmem:[#allocation2 + $0x4e0] sm:$0xff] }
 0x1a6   :  { %4040 = vmatprep.subr.mxu1 %v960_v43  ;;  %4080 = vmatpush3.msra.mxu0 %v1082_v44  ;;  %v1180_v44 = vrot.slane %v5221_v20, 2  ;;  %v1201_v20 = vld [vmem:[#allocation2 + $0x4d0] sm:$0xff] }
 0x1a7   :  { %4041 = vmatpush3.msra.mxu1 %v960_v43  ;;  %4081 = vmatprep.subr.mxu0 %v1081_v46  ;;  %v1179_v43 = vrot.slane %v5217_v17, 2 }
 0x1a8   :  { %4042 = vmatprep.subr.mxu1 %v959_v45  ;;  %4082 = vmatpush3.msra.mxu0 %v1081_v46  ;;  %v943_v46 = vsel %vm320_vm2, %v941_v35, %v942_v12 }
 0x1a9   :  { %4043 = vmatpush3.msra.mxu1 %v959_v45  ;;  %4083 = vmatprep.subr.mxu0 %v1080_v48  ;;  %v1064_v45 = vsel %vm442_vm3, %v1062_v31, %v1063_v37 }
 0x1aa   :  { %4044 = vmatprep.subr.mxu1 %v958_v47  ;;  %4084 = vmatpush3.msra.mxu0 %v1080_v48  ;;  %v1069_v48 = vsel %vm442_vm3, %v1063_v37, %v1058_v14 }
 0x1ab   :  { %4045 = vmatpush3.msra.mxu1 %v958_v47  ;;  %4085 = vmatprep.subr.mxu0 %v1079_v50  ;;  %v1202_v47 = vld [vmem:[#allocation2 + $0x4d8] sm:$0xff] }
 0x1ac   :  { %4046 = vmatprep.subr.mxu1 %v957_v49  ;;  %4086 = vmatpush3.msra.mxu0 %v1079_v50  ;;  %v1200_v50 = vld [vmem:[#allocation2 + $0x4c8] sm:$0xff] }
 0x1ad   :  { %4047 = vmatpush3.msra.mxu1 %v957_v49  ;;  %4087 = vmatprep.subr.mxu0 %v1078_v53  ;;  %v1189_v49 = vsel %vm564_vm4, %v1179_v43, %v1180_v44 }
 0x1ae   :  { %4048 = vmatprep.subr.mxu1 %v956_v52  ;;  %4088 = vmatpush3.msra.mxu0 %v1078_v53  ;;  %v1198_v53 = vld [vmem:[#allocation2 + $0x4b8] sm:$0xff] }
 0x1af   :  { %4049 = vmatpush3.msra.mxu1 %v956_v52  ;;  %4089 = vmatprep.subr.mxu0 %v1077_v56  ;;  %v1199_v52 = vld [vmem:[#allocation2 + $0x4c0] sm:$0xff] }
 0x1b0   :  { %4050 = vmatprep.subr.mxu1 %v955_v55  ;;  %4090 = vmatpush3.msra.mxu0 %v1077_v56  ;;  %v1196_v56 = vld [vmem:[#allocation2 + $0x4a8] sm:$0xff] }
 0x1b1   :  { %4051 = vmatpush3.msra.mxu1 %v955_v55  ;;  %4091 = vmatprep.subr.mxu0 %v1076_v58  ;;  %v1197_v55 = vld [vmem:[#allocation2 + $0x4b0] sm:$0xff] }
 0x1b2   :  { %4052 = vmatprep.subr.mxu1 %v954_v57  ;;  %4092 = vmatpush3.msra.mxu0 %v1076_v58  ;;  %v1193_v58 = vld [vmem:[#allocation2 + $0x490] sm:$0xff] }
 0x1b3   :  { %4053 = vmatpush3.msra.mxu1 %v954_v57  ;;  %3985 = vmatprep.mubr.f32.mxu1 %v736_v62  ;;  %v1194_v57 = vld [vmem:[#allocation2 + $0x498] sm:$0xff]  ;;  %v1181_v62 = vrot.slane %v5236_v51, 2 }
 0x1b4   :  { %4026 = vmatprep.mubr.f32.mxu0 %v5236_v51  ;;  %4054 = vmatprep.subr.mxu1 %v953_v0  ;;  %v1184_v51 = vrot.slane %v5219_v18, 2 }
 0x1b5   :  { %4093 = vmatprep.subr.mxu0 %v1075_v1  ;;  %3986 = vmatmul.mubr.f32.gmra.mxu1 %v735_v2  ;;  %v1188_v2 = vsel %vm564_vm4, %v1180_v44, %v1181_v62 }
 0x1b6   :  { %4027 = vmatmul.mubr.f32.gmra.mxu0 %v5238_v54  ;;  %4055 = vmatpush3.msra.mxu1 %v953_v0  ;;  %v1182_v0 = vrot.slane %v5238_v54, 2 }
 0x1b7   :  { %4094 = vmatpush3.msra.mxu0 %v1075_v1  ;;  %4056 = vmatprep.subr.mxu1 %v952_v4  ;;  %v1191_v1 = vld [vmem:[#allocation2 + $0x480] sm:$0xff] }
 0x1b8   :  { %4095 = vmatprep.subr.mxu0 %v1074_v5  ;;  %4057 = vmatpush3.msra.mxu1 %v952_v4  ;;  %v1187_v4 = vsel %vm564_vm4, %v1181_v62, %v1182_v0  ;;  %v1186_v54 = vsel %vm564_vm4, %v1182_v0, %v1183_v3 }
 0x1b9   :  { %4096 = vmatpush3.msra.mxu0 %v1074_v5  ;;  %3988 = vmatprep.mubr.f32.mxu1 %v734_v7  ;;  %v1185_v5 = vsel %vm564_vm4, %v1183_v3, %v1184_v51 }
 0x1ba   :  { %4029 = vmatprep.mubr.f32.mxu0 %v5242_v61  ;;  %4058 = vmatprep.subr.mxu1 %v951_v8  ;;  %v1190_v61 = vsel %vm564_vm4, %v1184_v51, %v1179_v43 }
 0x1bb   :  { %4097 = vmatprep.subr.mxu0 %v1073_v9  ;;  %3989 = vmatmul.mubr.f32.gmra.mxu1 %v733_v10 }
 0x1bc   :  { %4030 = vmatmul.mubr.f32.gmra.mxu0 %v5219_v18  ;;  %4059 = vmatpush3.msra.mxu1 %v951_v8 }
 0x1bd   :  { %4098 = vmatpush3.msra.mxu0 %v1073_v9  ;;  %4060 = vmatprep.subr.mxu1 %v950_v13 }
 0x1be   :  { %4099 = vmatprep.subr.mxu0 %v1072_v60  ;;  %4061 = vmatpush3.msra.mxu1 %v950_v13 }
 0x1bf   :  { %4100 = vmatpush3.msra.mxu0 %v1072_v60  ;;  %4062 = vmatprep.subr.mxu1 %v949_v6 }
 0x1c0   :  { %4101 = vmatprep.subr.mxu0 %v1071_v29  ;;  %4063 = vmatpush3.msra.mxu1 %v949_v6 }
 0x1c1   :  { %4064 = vmatprep.mubr.f32.mxu1 %v948_v16  ;;  %4102 = vmatpush3.msra.mxu0 %v1071_v29 }
 0x1c2   :  { %4065 = vmatmul.mubr.f32.vlgmr.msra.gmra.mxu1 %v947_v28  ;;  %4103 = vmatprep.subr.mxu0 %v1070_v22 }
 0x1c3   :  { %4114 = vmatprep.subr.mxu1 %v1206_v23  ;;  %4104 = vmatpush3.msra.mxu0 %v1070_v22 }
 0x1c4   :  { %4105 = vmatprep.mubr.f32.mxu0 %v1068_v25  ;;  %4115 = vmatpush3.msra.mxu1 %v1206_v23 }
 0x1c5   :  { %4106 = vmatmul.mubr.f32.vlgmr.msra.gmra.mxu0 %v1067_v27  ;;  %4116 = vmatprep.subr.mxu1 %v1205_v32 }
 0x1c6   :  { %4067 = vmatprep.mubr.f32.mxu1 %v946_v34  ;;  %4117 = vmatpush3.msra.mxu1 %v1205_v32 }
 0x1c7   :  { %4108 = vmatprep.mubr.f32.mxu0 %v1066_v36  ;;  %4068 = vmatmul.mubr.f32.gmra.mxu1 %v945_v38 }
 0x1c8   :  { %4118 = vmatprep.subr.mxu1 %v1204_v39  ;;  %4070 = vmatprep.mubr.f32.mxu1 %v944_v42 }
 0x1c9   :  { %4119 = vmatpush3.msra.mxu1 %v1204_v39  ;;  %4109 = vmatmul.mubr.f32.gmra.mxu0 %v1065_v40 }
 0x1ca   :  { %4120 = vmatprep.subr.mxu1 %v1203_v41  ;;  %4111 = vmatprep.mubr.f32.mxu0 %v1064_v45 }
 0x1cb   :  { %4121 = vmatpush3.msra.mxu1 %v1203_v41 }
 0x1cc   :  { %4071 = vmatmul.mubr.f32.gmra.mxu1 %v943_v46  ;;  %4122 = vmatprep.subr.mxu1 %v1202_v47 }
 0x1cd   :  { %4123 = vmatpush3.msra.mxu1 %v1202_v47  ;;  %4112 = vmatmul.mubr.f32.gmra.mxu0 %v1069_v48 }
 0x1ce   :  { %4124 = vmatprep.subr.mxu1 %v1201_v20  ;;  %4146 = vmatprep.mubr.f32.mxu1 %v1189_v49 }
 0x1cf   :  { %4125 = vmatpush3.msra.mxu1 %v1201_v20 }
 0x1d0   :  { %4126 = vmatprep.subr.mxu1 %v1200_v50 }
 0x1d1   :  { %4127 = vmatpush3.msra.mxu1 %v1200_v50 }
 0x1d2   :  { %4128 = vmatprep.subr.mxu1 %v1199_v52 }
 0x1d3   :  { %4129 = vmatpush3.msra.mxu1 %v1199_v52 }
 0x1d4   :  { %4130 = vmatprep.subr.mxu1 %v1198_v53 }
 0x1d5   :  { %4131 = vmatpush3.msra.mxu1 %v1198_v53 }
 0x1d6   :  { %4132 = vmatprep.subr.mxu1 %v1197_v55 }
 0x1d7   :  { %4133 = vmatpush3.msra.mxu1 %v1197_v55 }
 0x1d8   :  { %4134 = vmatprep.subr.mxu1 %v1196_v56 }
 0x1d9   :  { %4135 = vmatpush3.msra.mxu1 %v1196_v56 }
 0x1da   :  { %4136 = vmatprep.subr.mxu1 %v1195_v33 }
 0x1db   :  { %4137 = vmatpush3.msra.mxu1 %v1195_v33 }
 0x1dc   :  { %4138 = vmatprep.subr.mxu1 %v1194_v57 }
 0x1dd   :  { %4139 = vmatpush3.msra.mxu1 %v1194_v57 }
 0x1de   :  { %4140 = vmatprep.subr.mxu1 %v1193_v58 }
 0x1df   :  { %4141 = vmatpush3.msra.mxu1 %v1193_v58 }
 0x1e0   :  { %4142 = vmatprep.subr.mxu1 %v1192_v59 }
 0x1e1   :  { %4143 = vmatpush3.msra.mxu1 %v1192_v59 }
 0x1e2   :  { %4144 = vmatprep.subr.mxu1 %v1191_v1 }
 0x1e3   :  { %4145 = vmatpush3.msra.mxu1 %v1191_v1 }
 0x1e4   :  { %4147 = vmatmul.mubr.f32.vlgmr.msra.gmra.mxu1 %v1188_v2 }
 0x1e5   :  { %4149 = vmatprep.mubr.f32.mxu1 %v1187_v4 }
 0x1e8   :  { %4150 = vmatmul.mubr.f32.gmra.mxu1 %v1186_v54 }
 0x1e9   :  { %4152 = vmatprep.mubr.f32.mxu1 %v1185_v5 }
 0x1ec   :  { %4153 = vmatmul.mubr.f32.gmra.mxu1 %v1190_v61 }
 0x1ed   :  { %4953 = shalt.err (!%p4904_p5)  }
 0x1ee   :  { %1322 = dma.hbm_to_vmem [thread:$0]  %s1311_s19, 10240, %s5071_s28, [#allocation3 + $0x1]  ;;  %v3189_v34 = vld [vmem:[#allocation8 + $0x1] ss:$0 sm:$0xff] }
 0x25c   :  { %v3984_v18 = vpop.f32.mrf.mxu1 }
 0x25e   :  { %v4025_v7 = vpop.f32.mrf.mxu0  ;;  %v821_v8 = vpop.f32.mrf.mxu1 }
 0x25f   :  { %v917_v25 = vadd.f32 %v4025_v7, %v3984_v18 }
 0x260   :  { %v912_v9 = vpop.f32.mrf.mxu0 }
 0x275   :  { %v3987_v10 = vpop.f32.mrf.mxu1 }
 0x276   :  { %v4028_v17 = vpop.f32.mrf.mxu0 }
 0x277   :  { %v830_v11 = vpop.f32.mrf.mxu1 }
 0x278   :  { %v921_v12 = vpop.f32.mrf.mxu0 }
 0x27b   :  { %v3990_v13 = vpop.f32.mrf.mxu1 }
 0x27c   :  { %v4031_v60 = vpop.f32.mrf.mxu0 }
 0x27d   :  { %v838_v63 = vpop.f32.mrf.mxu1 }
 0x27e   :  { %v929_v29 = vpop.f32.mrf.mxu0 }
 0x27f   :  { %v930_v37 = vadd.f32 %v929_v29, %v838_v63 }
 0x282   :  { %v4066_v6 = vpop.f32.mrf.mxu1 }
 0x283   :  { %v1056_v26 = vadd.f32 %v4066_v6, %v917_v25 }
 0x284   :  { %v1031_v14 = vpop.f32.mrf.mxu1 }
 0x285   :  { %v4107_v15 = vpop.f32.mrf.mxu0 }
 0x286   :  { %v1177_v31 = vadd.f32 %v4107_v15, %v1056_v26 }
 0x287   :  { %v1152_v16 = vpop.f32.mrf.mxu0  ;;  %v4069_v19 = vpop.f32.mrf.mxu1 }
 0x289   :  { %v4110_v28 = vpop.f32.mrf.mxu0  ;;  %v1040_v21 = vpop.f32.mrf.mxu1 }
 0x28b   :  { %v1161_v22 = vpop.f32.mrf.mxu0 }
 0x28c   :  { %v4072_v23 = vpop.f32.mrf.mxu1 }
 0x28d   :  { %v4113_v24 = vpop.f32.mrf.mxu0 }
 0x28e   :  { %v1048_v27 = vpop.f32.mrf.mxu1 }
 0x28f   :  { %v1057_v40 = vadd.f32 %v1048_v27, %v930_v37  ;;  %v1169_v41 = vpop.f32.mrf.mxu0 }
 0x291   :  { %v1178_v44 = vadd.f32 %v1169_v41, %v1057_v40 }
 0x2a4   :  { %v4148_v32 = vpop.f32.mrf.mxu1 }
 0x2a5   :  { %v1298_v35 = vadd.f32 %v4148_v32, %v1177_v31 }
 0x2a6   :  { %v1273_v36 = vpop.f32.mrf.mxu1 }
 0x2a7   :  { %v1305_v38 = vadd.f32 %v3189_v34, %v1298_v35 }
 0x2a8   :  { %v4151_v39 = vpop.f32.mrf.mxu1 }
 0x2a9   :  { %4814 = vtanh.f32 %v1305_v38 }
 0x2aa   :  { %v1282_v42 = vpop.f32.mrf.mxu1 }
 0x2ac   :  { %v4154_v43 = vpop.f32.mrf.mxu1 }
 0x2ae   :  { %v1290_v45 = vpop.f32.mrf.mxu1 }
 0x2af   :  { %v1299_v46 = vadd.f32 %v1290_v45, %v1178_v44 }
 0x2b1   :  { %v1308_v47 = vadd.f32 %v3189_v34, %v1299_v46 }
 0x2b3   :  { %4816 = vtanh.f32 %v1308_v47 }
 0x2b6   :  { %v4815_v48 = vpop.eup %4814 }
 0x2b7   :  { %1307 = vst [vmem:[#allocation4 + $0x8] sm:$0xff] %v4815_v48 }
 0x2c0   :  { %v4817_v20 = vpop.eup %4816 }
 0x2c1   :  { %1310 = vst [vmem:[#allocation4 + $0x20] sm:$0xff] %v4817_v20 }
 0x2c2   :  { %5006 = dma.done.wait [#allocation3], 10240 }
 0x2c3   :  { %5007 = vsyncadd [#allocation3], 4294957056  ;;  %v1374_v49 = vld [vmem:[#allocation2 + $0x78] sm:$0xff]  ;;  %v1373_v52 = vld [vmem:[#allocation2 + $0x70] sm:$0xff]  ;;  %s1931_s22 = scalar_lea.hbm %s5677_s1, 40960 }
 0x2c4   :  { %v1346_v50 = vld [vmem:[#allocation2 + $0x178] sm:$0xff]  ;;  %4155 = vmatprep.subr.mxu0 %v1374_v49  ;;  %v1345_v53 = vld [vmem:[#allocation2 + $0x170] sm:$0xff]  ;;  %v1372_v55 = vld [vmem:[#allocation2 + $0x68] sm:$0xff] }
 0x2c5   :  { %4196 = vmatprep.subr.mxu1 %v1346_v50  ;;  %4156 = vmatpush3.msra.mxu0 %v1374_v49  ;;  %v1344_v56 = vld [vmem:[#allocation2 + $0x168] sm:$0xff]  ;;  %v1371_v33 = vld [vmem:[#allocation2 + $0x60] sm:$0xff]  ;;  %v1370_v58 = vld [vmem:[#allocation2 + $0x58] sm:$0xff] }
 0x2c6   :  { %4197 = vmatpush3.msra.mxu1 %v1346_v50  ;;  %4157 = vmatprep.subr.mxu0 %v1373_v52  ;;  %v1343_v57 = vld [vmem:[#allocation2 + $0x160] sm:$0xff]  ;;  %v1342_v59 = vld [vmem:[#allocation2 + $0x158] sm:$0xff]  ;;  %v1369_v62 = vld [vmem:[#allocation2 + $0x50] sm:$0xff] }
 0x2c7   :  { %4198 = vmatprep.subr.mxu1 %v1345_v53  ;;  %4158 = vmatpush3.msra.mxu0 %v1373_v52  ;;  %v1341_v0 = vld [vmem:[#allocation2 + $0x150] sm:$0xff]  ;;  %v1368_v1 = vld [vmem:[#allocation2 + $0x48] sm:$0xff]  ;;  %v1367_v3 = vld [vmem:[#allocation2 + $0x40] sm:$0xff] }
 0x2c8   :  { %4199 = vmatpush3.msra.mxu1 %v1345_v53  ;;  %4159 = vmatprep.subr.mxu0 %v1372_v55  ;;  %v1340_v2 = vld [vmem:[#allocation2 + $0x148] sm:$0xff]  ;;  %v1339_v4 = vld [vmem:[#allocation2 + $0x140] sm:$0xff]  ;;  %v1366_v51 = vld [vmem:[#allocation2 + $0x38] sm:$0xff] }
 0x2c9   :  { %4200 = vmatprep.subr.mxu1 %v1344_v56  ;;  %4160 = vmatpush3.msra.mxu0 %v1372_v55  ;;  %v1338_v54 = vld [vmem:[#allocation2 + $0x138] sm:$0xff]  ;;  %v1365_v5 = vld [vmem:[#allocation2 + $0x30] sm:$0xff]  ;;  %v1364_v18 = vld [vmem:[#allocation2 + $0x28] sm:$0xff] }
 0x2ca   :  { %4201 = vmatpush3.msra.mxu1 %v1344_v56  ;;  %4161 = vmatprep.subr.mxu0 %v1371_v33  ;;  %v1337_v61 = vld [vmem:[#allocation2 + $0x130] sm:$0xff]  ;;  %v1336_v7 = vld [vmem:[#allocation2 + $0x128] sm:$0xff]  ;;  %v1363_v8 = vld [vmem:[#allocation2 + $0x20] sm:$0xff] }
 0x2cb   :  { %4202 = vmatprep.subr.mxu1 %v1343_v57  ;;  %4162 = vmatpush3.msra.mxu0 %v1371_v33  ;;  %v1335_v9 = vld [vmem:[#allocation2 + $0x120] sm:$0xff]  ;;  %v5334_v17 = vld [vmem:[#allocation4 + $0x28] sm:$0xff]  ;;  %v1362_v11 = vld [vmem:[#allocation2 + $0x18] sm:$0xff] }
 0x2cc   :  { %4203 = vmatpush3.msra.mxu1 %v1343_v57  ;;  %4163 = vmatprep.subr.mxu0 %v1370_v58  ;;  %v5332_v10 = vld [vmem:[#allocation4] sm:$0xff]  ;;  %v1334_v12 = vld [vmem:[#allocation2 + $0x118] sm:$0xff]  ;;  %v5336_v13 = vld [vmem:[#allocation4 + $0x8] sm:$0xff]  ;;  %v1352_v29 = vrot.slane %v5334_v17, 6 }
 0x2cd   :  { %4204 = vmatprep.subr.mxu1 %v1342_v59  ;;  %4164 = vmatpush3.msra.mxu0 %v1370_v58  ;;  %v1361_v60 = vld [vmem:[#allocation2 + $0x10] sm:$0xff]  ;;  %v1347_v6 = vrot.slane %v5332_v10, 6  ;;  %v1360_v14 = vld [vmem:[#allocation2 + $0x8] sm:$0xff]  ;;  %v1348_v16 = vrot.slane %v5336_v13, 6  ;;  %v1359_v19 = vld [vmem:[#allocation2] sm:$0xff] }
 0x2ce   :  { %4205 = vmatpush3.msra.mxu1 %v1342_v59  ;;  %4165 = vmatprep.subr.mxu0 %v1369_v62  ;;  %v1333_v63 = vld [vmem:[#allocation2 + $0x110] sm:$0xff]  ;;  %v1332_v15 = vld [vmem:[#allocation2 + $0x108] sm:$0xff]  ;;  %v1331_v21 = vld [vmem:[#allocation2 + $0x100] sm:$0xff] }
 0x2cf   :  { %4206 = vmatprep.subr.mxu1 %v1341_v0  ;;  %4166 = vmatpush3.msra.mxu0 %v1369_v62  ;;  %v1358_v28 = vsel %vm109_vm1, %v1352_v29, %v1347_v6  ;;  %v1357_v22 = vsel %vm109_vm1, %v1347_v6, %v1348_v16  ;;  %v1584_v23 = vld [vmem:[#allocation2 + $0xf8] sm:$0xff]  ;;  %v1583_v24 = vld [vmem:[#allocation2 + $0xf0] sm:$0xff]  ;;  %v1582_v26 = vld [vmem:[#allocation2 + $0xe8] sm:$0xff] }
 0x2d0   :  { %4207 = vmatpush3.msra.mxu1 %v1341_v0  ;;  %4167 = vmatprep.subr.mxu0 %v1368_v1  ;;  %v1705_v25 = vld [vmem:[#allocation2 + $0x1f8] sm:$0xff]  ;;  %v1704_v27 = vld [vmem:[#allocation2 + $0x1f0] sm:$0xff]  ;;  %v1581_v31 = vld [vmem:[#allocation2 + $0xe0] sm:$0xff] }
 0x2d1   :  { %4208 = vmatprep.subr.mxu1 %v1340_v2  ;;  %4168 = vmatpush3.msra.mxu0 %v1368_v1  ;;  %v1703_v32 = vld [vmem:[#allocation2 + $0x1e8] sm:$0xff]  ;;  %v1580_v34 = vld [vmem:[#allocation2 + $0xd8] sm:$0xff]  ;;  %v1702_v35 = vld [vmem:[#allocation2 + $0x1e0] sm:$0xff] }
 0x2d2   :  { %4209 = vmatpush3.msra.mxu1 %v1340_v2  ;;  %4169 = vmatprep.subr.mxu0 %v1367_v3  ;;  %v1579_v36 = vld [vmem:[#allocation2 + $0xd0] sm:$0xff]  ;;  %v1701_v37 = vld [vmem:[#allocation2 + $0x1d8] sm:$0xff]  ;;  %v1578_v38 = vld [vmem:[#allocation2 + $0xc8] sm:$0xff] }
 0x2d3   :  { %4210 = vmatprep.subr.mxu1 %v1339_v4  ;;  %4170 = vmatpush3.msra.mxu0 %v1367_v3  ;;  %v1700_v39 = vld [vmem:[#allocation2 + $0x1d0] sm:$0xff]  ;;  %v1577_v40 = vld [vmem:[#allocation2 + $0xc0] sm:$0xff]  ;;  %v1699_v41 = vld [vmem:[#allocation2 + $0x1c8] sm:$0xff]  ;;  %v1557_v3 = vrot.slane %v5332_v10, 7 }
 0x2d4   :  { %4211 = vmatpush3.msra.mxu1 %v1339_v4  ;;  %4171 = vmatprep.subr.mxu0 %v1366_v51  ;;  %v5351_v42 = vld [vmem:[#allocation4 + $0x10] sm:$0xff]  ;;  %v1576_v43 = vld [vmem:[#allocation2 + $0xb8] sm:$0xff]  ;;  %v1698_v44 = vld [vmem:[#allocation2 + $0x1c0] sm:$0xff]  ;;  %v1562_v4 = vrot.slane %v5334_v17, 7 }
 0x2d5   :  { %4212 = vmatprep.subr.mxu1 %v1338_v54  ;;  %4172 = vmatpush3.msra.mxu0 %v1366_v51  ;;  %v5353_v45 = vld [vmem:[#allocation4 + $0x18] sm:$0xff]  ;;  %v1575_v46 = vld [vmem:[#allocation2 + $0xb0] sm:$0xff]  ;;  %v1349_v48 = vrot.slane %v5351_v42, 6  ;;  %v1574_v20 = vld [vmem:[#allocation2 + $0xa8] sm:$0xff] }
 0x2d6   :  { %4213 = vmatpush3.msra.mxu1 %v1338_v54  ;;  %4173 = vmatprep.subr.mxu0 %v1365_v5  ;;  %v1697_v47 = vld [vmem:[#allocation2 + $0x1b8] sm:$0xff]  ;;  %v1696_v49 = vld [vmem:[#allocation2 + $0x1b0] sm:$0xff]  ;;  %v1350_v50 = vrot.slane %v5353_v45, 6  ;;  %v5357_v52 = vld [vmem:[#allocation4 + $0x20] sm:$0xff] }
 0x2d7   :  { %4214 = vmatprep.subr.mxu1 %v1337_v61  ;;  %4174 = vmatpush3.msra.mxu0 %v1365_v5  ;;  %v1356_v53 = vsel %vm109_vm1, %v1348_v16, %v1349_v48  ;;  %v1573_v55 = vld [vmem:[#allocation2 + $0xa0] sm:$0xff]  ;;  %v1695_v56 = vld [vmem:[#allocation2 + $0x1a8] sm:$0xff]  ;;  %v1351_v57 = vrot.slane %v5357_v52, 6  ;;  %v1572_v58 = vld [vmem:[#allocation2 + $0x98] sm:$0xff]  ;;  %v1558_v5 = vrot.slane %v5336_v13, 7 }
 0x2d8   :  { %4215 = vmatpush3.msra.mxu1 %v1337_v61  ;;  %4175 = vmatprep.subr.mxu0 %v1364_v18  ;;  %v1355_v33 = vsel %vm109_vm1, %v1349_v48, %v1350_v50  ;;  %v1694_v59 = vld [vmem:[#allocation2 + $0x1a0] sm:$0xff]  ;;  %v1571_v0 = vld [vmem:[#allocation2 + $0x90] sm:$0xff]  ;;  %v1693_v1 = vld [vmem:[#allocation2 + $0x198] sm:$0xff] }
 0x2d9   :  { %4216 = vmatprep.subr.mxu1 %v1336_v7  ;;  %4176 = vmatpush3.msra.mxu0 %v1364_v18  ;;  %v1354_v62 = vsel %vm109_vm1, %v1350_v50, %v1351_v57  ;;  %v1353_v2 = vsel %vm109_vm1, %v1351_v57, %v1352_v29  ;;  %v1570_v51 = vld [vmem:[#allocation2 + $0x88] sm:$0xff]  ;;  %v1692_v54 = vld [vmem:[#allocation2 + $0x190] sm:$0xff]  ;;  %v1569_v61 = vld [vmem:[#allocation2 + $0x80] sm:$0xff]  ;;  %v1681_v29 = vrot.slane %v5353_v45, 1  ;;  %v1803_v57 = vrot.slane %v5357_v52, 2 }
 0x2da   :  { %4217 = vmatpush3.msra.mxu1 %v1336_v7  ;;  %4177 = vmatprep.subr.mxu0 %v1363_v8  ;;  %v1691_v18 = vld [vmem:[#allocation2 + $0x188] sm:$0xff]  ;;  %v1678_v7 = vrot.slane %v5332_v10, 1  ;;  %v1826_v6 = vld [vmem:[#allocation2 + $0x278] sm:$0xff]  ;;  %v1815_v48 = vld [vmem:[#allocation2 + $0x220] sm:$0xff] }
 0x2db   :  { %4218 = vmatprep.subr.mxu1 %v1335_v9  ;;  %4178 = vmatpush3.msra.mxu0 %v1363_v8  ;;  %v1679_v8 = vrot.slane %v5336_v13, 1  ;;  %v1812_v50 = vld [vmem:[#allocation2 + $0x208] sm:$0xff] }
 0x2dc   :  { %4219 = vmatpush3.msra.mxu1 %v1335_v9  ;;  %4179 = vmatprep.subr.mxu0 %v1362_v11  ;;  %v1568_v9 = vsel %vm320_vm2, %v1562_v4, %v1557_v3 }
 0x2dd   :  { %4220 = vmatprep.subr.mxu1 %v1334_v12  ;;  %4180 = vmatpush3.msra.mxu0 %v1362_v11  ;;  %v1680_v11 = vrot.slane %v5351_v42, 1 }
 0x2de   :  { %4221 = vmatpush3.msra.mxu1 %v1334_v12  ;;  %4181 = vmatprep.subr.mxu0 %v1361_v60  ;;  %v1567_v12 = vsel %vm320_vm2, %v1557_v3, %v1558_v5 }
 0x2df   :  { %4222 = vmatprep.subr.mxu1 %v1333_v63  ;;  %4182 = vmatpush3.msra.mxu0 %v1361_v60  ;;  %v1559_v60 = vrot.slane %v5351_v42, 7  ;;  %v1687_v16 = vsel %vm442_vm3, %v1679_v8, %v1680_v11 }
 0x2e0   :  { %4223 = vmatpush3.msra.mxu1 %v1333_v63  ;;  %4183 = vmatprep.subr.mxu0 %v1360_v14  ;;  %v1690_v63 = vld [vmem:[#allocation2 + $0x180] sm:$0xff] }
 0x2e1   :  { %4224 = vmatprep.subr.mxu1 %v1332_v15  ;;  %4184 = vmatpush3.msra.mxu0 %v1360_v14  ;;  %v1688_v14 = vsel %vm442_vm3, %v1678_v7, %v1679_v8 }
 0x2e2   :  { %4225 = vmatpush3.msra.mxu1 %v1332_v15  ;;  %4185 = vmatprep.subr.mxu0 %v1359_v19  ;;  %v1560_v15 = vrot.slane %v5353_v45, 7 }
 0x2e3   :  { %4187 = vmatprep.mubr.f32.mxu0 %v1358_v28  ;;  %4186 = vmatpush3.msra.mxu0 %v1359_v19  ;;  %v1682_v19 = vrot.slane %v5357_v52, 1  ;;  %v1825_v28 = vld [vmem:[#allocation2 + $0x270] sm:$0xff] }
 0x2e4   :  { %4226 = vmatprep.subr.mxu1 %v1331_v21  ;;  %4188 = vmatmul.mubr.f32.vlgmr.msra.gmra.mxu0 %v1357_v22  ;;  %v1561_v22 = vrot.slane %v5357_v52, 7 }
 0x2e5   :  { %4227 = vmatpush3.msra.mxu1 %v1331_v21  ;;  %4228 = vmatprep.mubr.f32.mxu1 %v5332_v10  ;;  %v1566_v21 = vsel %vm320_vm2, %v1558_v5, %v1559_v60 }
 0x2e6   :  { %4237 = vmatprep.subr.mxu0 %v1584_v23  ;;  %4229 = vmatmul.mubr.f32.vlgmr.msra.gmra.mxu1 %v5336_v13 }
 0x2e7   :  { %4238 = vmatpush3.msra.mxu0 %v1584_v23  ;;  %4278 = vmatprep.subr.mxu1 %v1705_v25  ;;  %v1686_v23 = vsel %vm442_vm3, %v1680_v11, %v1681_v29 }
 0x2e8   :  { %4239 = vmatprep.subr.mxu0 %v1583_v24  ;;  %4279 = vmatpush3.msra.mxu1 %v1705_v25  ;;  %v1565_v25 = vsel %vm320_vm2, %v1559_v60, %v1560_v15 }
 0x2e9   :  { %4240 = vmatpush3.msra.mxu0 %v1583_v24  ;;  %4280 = vmatprep.subr.mxu1 %v1704_v27  ;;  %v1683_v24 = vrot.slane %v5334_v17, 1 }
 0x2ea   :  { %4241 = vmatprep.subr.mxu0 %v1582_v26  ;;  %4281 = vmatpush3.msra.mxu1 %v1704_v27  ;;  %v1685_v27 = vsel %vm442_vm3, %v1681_v29, %v1682_v19 }
 0x2eb   :  { %4242 = vmatpush3.msra.mxu0 %v1582_v26  ;;  %4282 = vmatprep.subr.mxu1 %v1703_v32  ;;  %v1824_v26 = vld [vmem:[#allocation2 + $0x268] sm:$0xff] }
 0x2ec   :  { %4243 = vmatprep.subr.mxu0 %v1581_v31  ;;  %4283 = vmatpush3.msra.mxu1 %v1703_v32  ;;  %v1564_v32 = vsel %vm320_vm2, %v1560_v15, %v1561_v22 }
 0x2ed   :  { %4244 = vmatpush3.msra.mxu0 %v1581_v31  ;;  %4284 = vmatprep.subr.mxu1 %v1702_v35  ;;  %v1823_v31 = vld [vmem:[#allocation2 + $0x260] sm:$0xff] }
 0x2ee   :  { %4245 = vmatprep.subr.mxu0 %v1580_v34  ;;  %4285 = vmatpush3.msra.mxu1 %v1702_v35  ;;  %v1800_v35 = vrot.slane %v5336_v13, 2  ;;  %v1821_v13 = vld [vmem:[#allocation2 + $0x250] sm:$0xff] }
 0x2ef   :  { %4246 = vmatpush3.msra.mxu0 %v1580_v34  ;;  %4286 = vmatprep.subr.mxu1 %v1701_v37  ;;  %v1799_v34 = vrot.slane %v5332_v10, 2 }
 0x2f0   :  { %4247 = vmatprep.subr.mxu0 %v1579_v36  ;;  %4287 = vmatpush3.msra.mxu1 %v1701_v37  ;;  %v1563_v37 = vsel %vm320_vm2, %v1561_v22, %v1562_v4 }
 0x2f1   :  { %4248 = vmatpush3.msra.mxu0 %v1579_v36  ;;  %4288 = vmatprep.subr.mxu1 %v1700_v39  ;;  %v1684_v36 = vsel %vm442_vm3, %v1682_v19, %v1683_v24 }
 0x2f2   :  { %4249 = vmatprep.subr.mxu0 %v1578_v38  ;;  %4289 = vmatpush3.msra.mxu1 %v1700_v39  ;;  %v1689_v39 = vsel %vm442_vm3, %v1683_v24, %v1678_v7 }
 0x2f3   :  { %4250 = vmatpush3.msra.mxu0 %v1578_v38  ;;  %4290 = vmatprep.subr.mxu1 %v1699_v41  ;;  %v1822_v38 = vld [vmem:[#allocation2 + $0x258] sm:$0xff] }
 0x2f4   :  { %4251 = vmatprep.subr.mxu0 %v1577_v40  ;;  %4291 = vmatpush3.msra.mxu1 %v1699_v41  ;;  %v1820_v41 = vld [vmem:[#allocation2 + $0x248] sm:$0xff] }
 0x2f5   :  { %4252 = vmatpush3.msra.mxu0 %v1577_v40  ;;  %4292 = vmatprep.subr.mxu1 %v1698_v44  ;;  %v1809_v40 = vsel %vm564_vm4, %v1799_v34, %v1800_v35 }
 0x2f6   :  { %4253 = vmatprep.subr.mxu0 %v1576_v43  ;;  %4293 = vmatpush3.msra.mxu1 %v1698_v44  ;;  %v1818_v44 = vld [vmem:[#allocation2 + $0x238] sm:$0xff] }
 0x2f7   :  { %4254 = vmatpush3.msra.mxu0 %v1576_v43  ;;  %4294 = vmatprep.subr.mxu1 %v1697_v47  ;;  %v1819_v43 = vld [vmem:[#allocation2 + $0x240] sm:$0xff] }
 0x2f8   :  { %4255 = vmatprep.subr.mxu0 %v1575_v46  ;;  %4295 = vmatpush3.msra.mxu1 %v1697_v47  ;;  %v1816_v47 = vld [vmem:[#allocation2 + $0x228] sm:$0xff] }
 0x2f9   :  { %4256 = vmatpush3.msra.mxu0 %v1575_v46  ;;  %4296 = vmatprep.subr.mxu1 %v1696_v49  ;;  %v1817_v46 = vld [vmem:[#allocation2 + $0x230] sm:$0xff] }
 0x2fa   :  { %4257 = vmatprep.subr.mxu0 %v1574_v20  ;;  %4297 = vmatpush3.msra.mxu1 %v1696_v49  ;;  %v1813_v49 = vld [vmem:[#allocation2 + $0x210] sm:$0xff] }
 0x2fb   :  { %4258 = vmatpush3.msra.mxu0 %v1574_v20  ;;  %4190 = vmatprep.mubr.f32.mxu0 %v1356_v53  ;;  %v1814_v20 = vld [vmem:[#allocation2 + $0x218] sm:$0xff]  ;;  %v1801_v53 = vrot.slane %v5351_v42, 2 }
 0x2fc   :  { %4231 = vmatprep.mubr.f32.mxu1 %v5351_v42  ;;  %4259 = vmatprep.subr.mxu0 %v1573_v55 }
 0x2fd   :  { %4298 = vmatprep.subr.mxu1 %v1695_v56  ;;  %4191 = vmatmul.mubr.f32.gmra.mxu0 %v1355_v33  ;;  %v1808_v33 = vsel %vm564_vm4, %v1800_v35, %v1801_v53 }
 0x2fe   :  { %4232 = vmatmul.mubr.f32.gmra.mxu1 %v5353_v45  ;;  %4260 = vmatpush3.msra.mxu0 %v1573_v55  ;;  %v1802_v55 = vrot.slane %v5353_v45, 2 }
 0x2ff   :  { %4299 = vmatpush3.msra.mxu1 %v1695_v56  ;;  %4261 = vmatprep.subr.mxu0 %v1572_v58  ;;  %v1811_v56 = vld [vmem:[#allocation2 + $0x200] sm:$0xff] }
 0x300   :  { %4300 = vmatprep.subr.mxu1 %v1694_v59  ;;  %4262 = vmatpush3.msra.mxu0 %v1572_v58  ;;  %v1807_v58 = vsel %vm564_vm4, %v1801_v53, %v1802_v55  ;;  %v1806_v42 = vsel %vm564_vm4, %v1802_v55, %v1803_v57 }
 0x301   :  { %4301 = vmatpush3.msra.mxu1 %v1694_v59  ;;  %4193 = vmatprep.mubr.f32.mxu0 %v1354_v62  ;;  %v1804_v59 = vrot.slane %v5334_v17, 2 }
 0x302   :  { %4234 = vmatprep.mubr.f32.mxu1 %v5357_v52  ;;  %4263 = vmatprep.subr.mxu0 %v1571_v0 }
 0x303   :  { %4302 = vmatprep.subr.mxu1 %v1693_v1  ;;  %4194 = vmatmul.mubr.f32.gmra.mxu0 %v1353_v2  ;;  %v1805_v45 = vsel %vm564_vm4, %v1803_v57, %v1804_v59  ;;  %v1810_v52 = vsel %vm564_vm4, %v1804_v59, %v1799_v34 }
 0x304   :  { %4235 = vmatmul.mubr.f32.gmra.mxu1 %v5334_v17  ;;  %4264 = vmatpush3.msra.mxu0 %v1571_v0 }
 0x305   :  { %4303 = vmatpush3.msra.mxu1 %v1693_v1  ;;  %4265 = vmatprep.subr.mxu0 %v1570_v51 }
 0x306   :  { %4304 = vmatprep.subr.mxu1 %v1692_v54  ;;  %4266 = vmatpush3.msra.mxu0 %v1570_v51 }
 0x307   :  { %4305 = vmatpush3.msra.mxu1 %v1692_v54  ;;  %4267 = vmatprep.subr.mxu0 %v1569_v61 }
 0x308   :  { %4306 = vmatprep.subr.mxu1 %v1691_v18  ;;  %4268 = vmatpush3.msra.mxu0 %v1569_v61 }
 0x309   :  { %4269 = vmatprep.mubr.f32.mxu0 %v1568_v9  ;;  %4307 = vmatpush3.msra.mxu1 %v1691_v18 }
 0x30a   :  { %4270 = vmatmul.mubr.f32.vlgmr.msra.gmra.mxu0 %v1567_v12  ;;  %4308 = vmatprep.subr.mxu1 %v1690_v63 }
 0x30b   :  { %4319 = vmatprep.subr.mxu0 %v1826_v6  ;;  %4309 = vmatpush3.msra.mxu1 %v1690_v63 }
 0x30c   :  { %4310 = vmatprep.mubr.f32.mxu1 %v1688_v14  ;;  %4320 = vmatpush3.msra.mxu0 %v1826_v6 }
 0x30d   :  { %4311 = vmatmul.mubr.f32.vlgmr.msra.gmra.mxu1 %v1687_v16  ;;  %4321 = vmatprep.subr.mxu0 %v1825_v28 }
 0x30e   :  { %4272 = vmatprep.mubr.f32.mxu0 %v1566_v21  ;;  %4322 = vmatpush3.msra.mxu0 %v1825_v28 }
 0x30f   :  { %4313 = vmatprep.mubr.f32.mxu1 %v1686_v23  ;;  %4273 = vmatmul.mubr.f32.gmra.mxu0 %v1565_v25 }
 0x310   :  { %4323 = vmatprep.subr.mxu0 %v1824_v26  ;;  %4275 = vmatprep.mubr.f32.mxu0 %v1564_v32 }
 0x311   :  { %4324 = vmatpush3.msra.mxu0 %v1824_v26  ;;  %4314 = vmatmul.mubr.f32.gmra.mxu1 %v1685_v27 }
 0x312   :  { %4325 = vmatprep.subr.mxu0 %v1823_v31  ;;  %4316 = vmatprep.mubr.f32.mxu1 %v1684_v36 }
 0x313   :  { %4326 = vmatpush3.msra.mxu0 %v1823_v31 }
 0x314   :  { %4276 = vmatmul.mubr.f32.gmra.mxu0 %v1563_v37  ;;  %4327 = vmatprep.subr.mxu0 %v1822_v38 }
 0x315   :  { %4328 = vmatpush3.msra.mxu0 %v1822_v38  ;;  %4317 = vmatmul.mubr.f32.gmra.mxu1 %v1689_v39 }
 0x316   :  { %4329 = vmatprep.subr.mxu0 %v1821_v13  ;;  %4351 = vmatprep.mubr.f32.mxu0 %v1809_v40 }
 0x317   :  { %4330 = vmatpush3.msra.mxu0 %v1821_v13 }
 0x318   :  { %4331 = vmatprep.subr.mxu0 %v1820_v41 }
 0x319   :  { %4332 = vmatpush3.msra.mxu0 %v1820_v41 }
 0x31a   :  { %4333 = vmatprep.subr.mxu0 %v1819_v43 }
 0x31b   :  { %4334 = vmatpush3.msra.mxu0 %v1819_v43 }
 0x31c   :  { %4335 = vmatprep.subr.mxu0 %v1818_v44 }
 0x31d   :  { %4336 = vmatpush3.msra.mxu0 %v1818_v44 }
 0x31e   :  { %4337 = vmatprep.subr.mxu0 %v1817_v46 }
 0x31f   :  { %4338 = vmatpush3.msra.mxu0 %v1817_v46 }
 0x320   :  { %4339 = vmatprep.subr.mxu0 %v1816_v47 }
 0x321   :  { %4340 = vmatpush3.msra.mxu0 %v1816_v47 }
 0x322   :  { %4341 = vmatprep.subr.mxu0 %v1815_v48 }
 0x323   :  { %4342 = vmatpush3.msra.mxu0 %v1815_v48 }
 0x324   :  { %4343 = vmatprep.subr.mxu0 %v1814_v20 }
 0x325   :  { %4344 = vmatpush3.msra.mxu0 %v1814_v20 }
 0x326   :  { %4345 = vmatprep.subr.mxu0 %v1813_v49 }
 0x327   :  { %4346 = vmatpush3.msra.mxu0 %v1813_v49 }
 0x328   :  { %4347 = vmatprep.subr.mxu0 %v1812_v50 }
 0x329   :  { %4348 = vmatpush3.msra.mxu0 %v1812_v50 }
 0x32a   :  { %4349 = vmatprep.subr.mxu0 %v1811_v56 }
 0x32b   :  { %4350 = vmatpush3.msra.mxu0 %v1811_v56 }
 0x32c   :  { %4352 = vmatmul.mubr.f32.vlgmr.msra.gmra.mxu0 %v1808_v33 }
 0x32d   :  { %4354 = vmatprep.mubr.f32.mxu0 %v1807_v58 }
 0x330   :  { %4355 = vmatmul.mubr.f32.gmra.mxu0 %v1806_v42 }
 0x331   :  { %4357 = vmatprep.mubr.f32.mxu0 %v1805_v45 }
 0x334   :  { %4358 = vmatmul.mubr.f32.gmra.mxu0 %v1810_v52 }
 0x335   :  { %4976 = shalt.err (!%p5061_p0)  }
 0x336   :  { %1942 = dma.hbm_to_vmem [thread:$0]  %s1931_s22, 10240, %s5054_s27, [#allocation3]  ;;  %v3190_v21 = vld [vmem:[#allocation8 + $0x2] ss:$0 sm:$0xff] }
 0x3a4   :  { %v4189_v17 = vpop.f32.mrf.mxu0 }
 0x3a6   :  { %v4230_v62 = vpop.f32.mrf.mxu1  ;;  %v1441_v0 = vpop.f32.mrf.mxu0 }
 0x3a7   :  { %v1537_v14 = vadd.f32 %v4230_v62, %v4189_v17 }
 0x3a8   :  { %v1532_v1 = vpop.f32.mrf.mxu1 }
 0x3bd   :  { %v4192_v2 = vpop.f32.mrf.mxu0 }
 0x3be   :  { %v4233_v3 = vpop.f32.mrf.mxu1 }
 0x3bf   :  { %v1450_v4 = vpop.f32.mrf.mxu0 }
 0x3c0   :  { %v1541_v10 = vpop.f32.mrf.mxu1 }
 0x3c3   :  { %v4195_v51 = vpop.f32.mrf.mxu0 }
 0x3c4   :  { %v4236_v54 = vpop.f32.mrf.mxu1 }
 0x3c5   :  { %v1458_v5 = vpop.f32.mrf.mxu0 }
 0x3c6   :  { %v1549_v18 = vpop.f32.mrf.mxu1 }
 0x3c7   :  { %v1550_v24 = vadd.f32 %v1549_v18, %v1458_v5 }
 0x3ca   :  { %v4271_v61 = vpop.f32.mrf.mxu0 }
 0x3cb   :  { %v1676_v15 = vadd.f32 %v4271_v61, %v1537_v14 }
 0x3cc   :  { %v1651_v7 = vpop.f32.mrf.mxu0 }
 0x3cd   :  { %v4312_v8 = vpop.f32.mrf.mxu1 }
 0x3ce   :  { %v1797_v19 = vadd.f32 %v4312_v8, %v1676_v15 }
 0x3cf   :  { %v1772_v9 = vpop.f32.mrf.mxu1  ;;  %v4274_v11 = vpop.f32.mrf.mxu0 }
 0x3d1   :  { %v4315_v12 = vpop.f32.mrf.mxu1  ;;  %v1660_v60 = vpop.f32.mrf.mxu0 }
 0x3d3   :  { %v1781_v63 = vpop.f32.mrf.mxu1 }
 0x3d4   :  { %v4277_v6 = vpop.f32.mrf.mxu0 }
 0x3d5   :  { %v4318_v29 = vpop.f32.mrf.mxu1 }
 0x3d6   :  { %v1668_v16 = vpop.f32.mrf.mxu0 }
 0x3d7   :  { %v1677_v27 = vadd.f32 %v1668_v16, %v1550_v24  ;;  %v1789_v31 = vpop.f32.mrf.mxu1 }
 0x3d9   :  { %v1798_v35 = vadd.f32 %v1789_v31, %v1677_v27 }
 0x3ec   :  { %v4353_v28 = vpop.f32.mrf.mxu0 }
 0x3ed   :  { %v1918_v22 = vadd.f32 %v4353_v28, %v1797_v19 }
 0x3ee   :  { %v1893_v23 = vpop.f32.mrf.mxu0 }
 0x3ef   :  { %v1925_v25 = vadd.f32 %v3190_v21, %v1918_v22 }
 0x3f0   :  { %v4356_v26 = vpop.f32.mrf.mxu0 }
 0x3f1   :  { %4818 = vtanh.f32 %v1925_v25 }
 0x3f2   :  { %v1902_v32 = vpop.f32.mrf.mxu0 }
 0x3f4   :  { %v4359_v34 = vpop.f32.mrf.mxu0 }
 0x3f6   :  { %v1910_v36 = vpop.f32.mrf.mxu0 }
 0x3f7   :  { %v1919_v37 = vadd.f32 %v1910_v36, %v1798_v35 }
 0x3f9   :  { %v1928_v38 = vadd.f32 %v3190_v21, %v1919_v37 }
 0x3fb   :  { %4820 = vtanh.f32 %v1928_v38 }
 0x3fe   :  { %v4819_v39 = vpop.eup %4818 }
 0x3ff   :  { %1927 = vst [vmem:[#allocation4 + $0x8] sm:$0xff] %v4819_v39 }
 0x408   :  { %v4821_v13 = vpop.eup %4820 }
 0x409   :  { %1930 = vst [vmem:[#allocation4 + $0x20] sm:$0xff] %v4821_v13 }
 0x40a   :  { %5008 = dma.done.wait [#allocation3 + $0x1], 10240 }
 0x40b   :  { %5009 = vsyncadd [#allocation3 + $0x1], 4294957056  ;;  %v1994_v40 = vld [vmem:[#allocation2 + $0x2f8] sm:$0xff]  ;;  %v1993_v43 = vld [vmem:[#allocation2 + $0x2f0] sm:$0xff] }
 0x40c   :  { %v1966_v41 = vld [vmem:[#allocation2 + $0x3f8] sm:$0xff]  ;;  %4360 = vmatprep.subr.mxu1 %v1994_v40  ;;  %v1965_v44 = vld [vmem:[#allocation2 + $0x3f0] sm:$0xff]  ;;  %v1992_v46 = vld [vmem:[#allocation2 + $0x2e8] sm:$0xff] }
 0x40d   :  { %4401 = vmatprep.subr.mxu0 %v1966_v41  ;;  %4361 = vmatpush3.msra.mxu1 %v1994_v40  ;;  %v1964_v47 = vld [vmem:[#allocation2 + $0x3e8] sm:$0xff]  ;;  %v1991_v48 = vld [vmem:[#allocation2 + $0x2e0] sm:$0xff]  ;;  %v1990_v49 = vld [vmem:[#allocation2 + $0x2d8] sm:$0xff] }
 0x40e   :  { %4402 = vmatpush3.msra.mxu0 %v1966_v41  ;;  %4362 = vmatprep.subr.mxu1 %v1993_v43  ;;  %v1963_v20 = vld [vmem:[#allocation2 + $0x3e0] sm:$0xff]  ;;  %v1962_v50 = vld [vmem:[#allocation2 + $0x3d8] sm:$0xff]  ;;  %v1989_v53 = vld [vmem:[#allocation2 + $0x2d0] sm:$0xff] }
 0x40f   :  { %4403 = vmatprep.subr.mxu0 %v1965_v44  ;;  %4363 = vmatpush3.msra.mxu1 %v1993_v43  ;;  %v1961_v55 = vld [vmem:[#allocation2 + $0x3d0] sm:$0xff]  ;;  %v1988_v56 = vld [vmem:[#allocation2 + $0x2c8] sm:$0xff]  ;;  %v1987_v57 = vld [vmem:[#allocation2 + $0x2c0] sm:$0xff] }
 0x410   :  { %4404 = vmatpush3.msra.mxu0 %v1965_v44  ;;  %4364 = vmatprep.subr.mxu1 %v1992_v46  ;;  %v1960_v33 = vld [vmem:[#allocation2 + $0x3c8] sm:$0xff]  ;;  %v1959_v58 = vld [vmem:[#allocation2 + $0x3c0] sm:$0xff]  ;;  %v1986_v59 = vld [vmem:[#allocation2 + $0x2b8] sm:$0xff] }
 0x411   :  { %4405 = vmatprep.subr.mxu0 %v1964_v47  ;;  %4365 = vmatpush3.msra.mxu1 %v1992_v46  ;;  %v1958_v42 = vld [vmem:[#allocation2 + $0x3b8] sm:$0xff]  ;;  %v1985_v45 = vld [vmem:[#allocation2 + $0x2b0] sm:$0xff]  ;;  %v1984_v17 = vld [vmem:[#allocation2 + $0x2a8] sm:$0xff] }
 0x412   :  { %4406 = vmatpush3.msra.mxu0 %v1964_v47  ;;  %4366 = vmatprep.subr.mxu1 %v1991_v48  ;;  %v1957_v52 = vld [vmem:[#allocation2 + $0x3b0] sm:$0xff]  ;;  %v1956_v62 = vld [vmem:[#allocation2 + $0x3a8] sm:$0xff]  ;;  %v1983_v0 = vld [vmem:[#allocation2 + $0x2a0] sm:$0xff] }
 0x413   :  { %4407 = vmatprep.subr.mxu0 %v1963_v20  ;;  %4367 = vmatpush3.msra.mxu1 %v1991_v48  ;;  %v1955_v1 = vld [vmem:[#allocation2 + $0x3a0] sm:$0xff]  ;;  %v5446_v3 = vld [vmem:[#allocation4 + $0x28] sm:$0xff]  ;;  %v1982_v4 = vld [vmem:[#allocation2 + $0x298] sm:$0xff] }
 0x414   :  { %4408 = vmatpush3.msra.mxu0 %v1963_v20  ;;  %4368 = vmatprep.subr.mxu1 %v1990_v49  ;;  %v5444_v2 = vld [vmem:[#allocation4] sm:$0xff]  ;;  %v1954_v10 = vld [vmem:[#allocation2 + $0x398] sm:$0xff]  ;;  %v5448_v51 = vld [vmem:[#allocation4 + $0x8] sm:$0xff]  ;;  %v1972_v18 = vrot.slane %v5446_v3, 6 }
 0x415   :  { %4409 = vmatprep.subr.mxu0 %v1962_v50  ;;  %4369 = vmatpush3.msra.mxu1 %v1990_v49  ;;  %v1981_v54 = vld [vmem:[#allocation2 + $0x290] sm:$0xff]  ;;  %v1967_v61 = vrot.slane %v5444_v2, 6  ;;  %v1980_v7 = vld [vmem:[#allocation2 + $0x288] sm:$0xff]  ;;  %v1968_v9 = vrot.slane %v5448_v51, 6  ;;  %v1979_v11 = vld [vmem:[#allocation2 + $0x280] sm:$0xff] }
 0x416   :  { %4410 = vmatpush3.msra.mxu0 %v1962_v50  ;;  %4370 = vmatprep.subr.mxu1 %v1989_v53  ;;  %v1953_v5 = vld [vmem:[#allocation2 + $0x390] sm:$0xff]  ;;  %v1952_v8 = vld [vmem:[#allocation2 + $0x388] sm:$0xff]  ;;  %v1951_v60 = vld [vmem:[#allocation2 + $0x380] sm:$0xff] }
 0x417   :  { %4411 = vmatprep.subr.mxu0 %v1961_v55  ;;  %4371 = vmatpush3.msra.mxu1 %v1989_v53  ;;  %v1978_v12 = vsel %vm109_vm1, %v1972_v18, %v1967_v61  ;;  %v1977_v63 = vsel %vm109_vm1, %v1967_v61, %v1968_v9  ;;  %v2204_v6 = vld [vmem:[#allocation2 + $0x378] sm:$0xff]  ;;  %v2203_v29 = vld [vmem:[#allocation2 + $0x370] sm:$0xff]  ;;  %v2202_v15 = vld [vmem:[#allocation2 + $0x368] sm:$0xff] }
 0x418   :  { %4412 = vmatpush3.msra.mxu0 %v1961_v55  ;;  %4372 = vmatprep.subr.mxu1 %v1988_v56  ;;  %v2325_v14 = vld [vmem:[#allocation2 + $0x478] sm:$0xff]  ;;  %v2324_v16 = vld [vmem:[#allocation2 + $0x470] sm:$0xff]  ;;  %v2201_v19 = vld [vmem:[#allocation2 + $0x360] sm:$0xff] }
 0x419   :  { %4413 = vmatprep.subr.mxu0 %v1960_v33  ;;  %4373 = vmatpush3.msra.mxu1 %v1988_v56  ;;  %v2323_v28 = vld [vmem:[#allocation2 + $0x468] sm:$0xff]  ;;  %v2200_v21 = vld [vmem:[#allocation2 + $0x358] sm:$0xff]  ;;  %v2322_v22 = vld [vmem:[#allocation2 + $0x460] sm:$0xff] }
 0x41a   :  { %4414 = vmatpush3.msra.mxu0 %v1960_v33  ;;  %4374 = vmatprep.subr.mxu1 %v1987_v57  ;;  %v2199_v23 = vld [vmem:[#allocation2 + $0x350] sm:$0xff]  ;;  %v2321_v24 = vld [vmem:[#allocation2 + $0x458] sm:$0xff]  ;;  %v2198_v25 = vld [vmem:[#allocation2 + $0x348] sm:$0xff] }
 0x41b   :  { %4415 = vmatprep.subr.mxu0 %v1959_v58  ;;  %4375 = vmatpush3.msra.mxu1 %v1987_v57  ;;  %v2320_v26 = vld [vmem:[#allocation2 + $0x450] sm:$0xff]  ;;  %v2197_v27 = vld [vmem:[#allocation2 + $0x340] sm:$0xff]  ;;  %v2319_v31 = vld [vmem:[#allocation2 + $0x448] sm:$0xff]  ;;  %v2177_v57 = vrot.slane %v5444_v2, 7 }
 0x41c   :  { %4416 = vmatpush3.msra.mxu0 %v1959_v58  ;;  %4376 = vmatprep.subr.mxu1 %v1986_v59  ;;  %v5463_v32 = vld [vmem:[#allocation4 + $0x10] sm:$0xff]  ;;  %v2196_v34 = vld [vmem:[#allocation2 + $0x338] sm:$0xff]  ;;  %v2318_v35 = vld [vmem:[#allocation2 + $0x440] sm:$0xff]  ;;  %v2182_v58 = vrot.slane %v5446_v3, 7 }
 0x41d   :  { %4417 = vmatprep.subr.mxu0 %v1958_v42  ;;  %4377 = vmatpush3.msra.mxu1 %v1986_v59  ;;  %v5465_v36 = vld [vmem:[#allocation4 + $0x18] sm:$0xff]  ;;  %v2195_v37 = vld [vmem:[#allocation2 + $0x330] sm:$0xff]  ;;  %v1969_v39 = vrot.slane %v5463_v32, 6  ;;  %v2194_v13 = vld [vmem:[#allocation2 + $0x328] sm:$0xff] }
 0x41e   :  { %4418 = vmatpush3.msra.mxu0 %v1958_v42  ;;  %4378 = vmatprep.subr.mxu1 %v1985_v45  ;;  %v2317_v38 = vld [vmem:[#allocation2 + $0x438] sm:$0xff]  ;;  %v2316_v40 = vld [vmem:[#allocation2 + $0x430] sm:$0xff]  ;;  %v1970_v41 = vrot.slane %v5465_v36, 6  ;;  %v5469_v43 = vld [vmem:[#allocation4 + $0x20] sm:$0xff] }
 0x41f   :  { %4419 = vmatprep.subr.mxu0 %v1957_v52  ;;  %4379 = vmatpush3.msra.mxu1 %v1985_v45  ;;  %v1976_v44 = vsel %vm109_vm1, %v1968_v9, %v1969_v39  ;;  %v2193_v46 = vld [vmem:[#allocation2 + $0x320] sm:$0xff]  ;;  %v2315_v47 = vld [vmem:[#allocation2 + $0x428] sm:$0xff]  ;;  %v1971_v20 = vrot.slane %v5469_v43, 6  ;;  %v2192_v49 = vld [vmem:[#allocation2 + $0x318] sm:$0xff]  ;;  %v2178_v45 = vrot.slane %v5448_v51, 7 }
 0x420   :  { %4420 = vmatpush3.msra.mxu0 %v1957_v52  ;;  %4380 = vmatprep.subr.mxu1 %v1984_v17  ;;  %v1975_v48 = vsel %vm109_vm1, %v1969_v39, %v1970_v41  ;;  %v2314_v50 = vld [vmem:[#allocation2 + $0x420] sm:$0xff]  ;;  %v2191_v55 = vld [vmem:[#allocation2 + $0x310] sm:$0xff]  ;;  %v2313_v56 = vld [vmem:[#allocation2 + $0x418] sm:$0xff] }
 0x421   :  { %4421 = vmatprep.subr.mxu0 %v1956_v62  ;;  %4381 = vmatpush3.msra.mxu1 %v1984_v17  ;;  %v1974_v53 = vsel %vm109_vm1, %v1970_v41, %v1971_v20  ;;  %v1973_v33 = vsel %vm109_vm1, %v1971_v20, %v1972_v18  ;;  %v2190_v59 = vld [vmem:[#allocation2 + $0x308] sm:$0xff]  ;;  %v2312_v42 = vld [vmem:[#allocation2 + $0x410] sm:$0xff]  ;;  %v2189_v52 = vld [vmem:[#allocation2 + $0x300] sm:$0xff]  ;;  %v2301_v18 = vrot.slane %v5465_v36, 1  ;;  %v2423_v20 = vrot.slane %v5469_v43, 2 }
 0x422   :  { %4422 = vmatpush3.msra.mxu0 %v1956_v62  ;;  %4382 = vmatprep.subr.mxu1 %v1983_v0  ;;  %v2311_v17 = vld [vmem:[#allocation2 + $0x408] sm:$0xff]  ;;  %v2298_v62 = vrot.slane %v5444_v2, 1  ;;  %v2446_v61 = vld [vmem:[#allocation2 + $0x4f8] sm:$0xff]  ;;  %v2435_v39 = vld [vmem:[#allocation2 + $0x4a0] sm:$0xff] }
 0x423   :  { %4423 = vmatprep.subr.mxu0 %v1955_v1  ;;  %4383 = vmatpush3.msra.mxu1 %v1983_v0  ;;  %v2299_v0 = vrot.slane %v5448_v51, 1  ;;  %v2432_v41 = vld [vmem:[#allocation2 + $0x488] sm:$0xff] }
 0x424   :  { %4424 = vmatpush3.msra.mxu0 %v1955_v1  ;;  %4384 = vmatprep.subr.mxu1 %v1982_v4  ;;  %v2188_v1 = vsel %vm320_vm2, %v2182_v58, %v2177_v57 }
 0x425   :  { %4425 = vmatprep.subr.mxu0 %v1954_v10  ;;  %4385 = vmatpush3.msra.mxu1 %v1982_v4  ;;  %v2300_v4 = vrot.slane %v5463_v32, 1 }
 0x426   :  { %4426 = vmatpush3.msra.mxu0 %v1954_v10  ;;  %4386 = vmatprep.subr.mxu1 %v1981_v54  ;;  %v2187_v10 = vsel %vm320_vm2, %v2177_v57, %v2178_v45 }
 0x427   :  { %4427 = vmatprep.subr.mxu0 %v1953_v5  ;;  %4387 = vmatpush3.msra.mxu1 %v1981_v54  ;;  %v2179_v54 = vrot.slane %v5463_v32, 7  ;;  %v2307_v9 = vsel %vm442_vm3, %v2299_v0, %v2300_v4 }
 0x428   :  { %4428 = vmatpush3.msra.mxu0 %v1953_v5  ;;  %4388 = vmatprep.subr.mxu1 %v1980_v7  ;;  %v2310_v5 = vld [vmem:[#allocation2 + $0x400] sm:$0xff] }
 0x429   :  { %4429 = vmatprep.subr.mxu0 %v1952_v8  ;;  %4389 = vmatpush3.msra.mxu1 %v1980_v7  ;;  %v2308_v7 = vsel %vm442_vm3, %v2298_v62, %v2299_v0 }
 0x42a   :  { %4430 = vmatpush3.msra.mxu0 %v1952_v8  ;;  %4390 = vmatprep.subr.mxu1 %v1979_v11  ;;  %v2180_v8 = vrot.slane %v5465_v36, 7 }
 0x42b   :  { %4392 = vmatprep.mubr.f32.mxu1 %v1978_v12  ;;  %4391 = vmatpush3.msra.mxu1 %v1979_v11  ;;  %v2302_v11 = vrot.slane %v5469_v43, 1  ;;  %v2445_v12 = vld [vmem:[#allocation2 + $0x4f0] sm:$0xff] }
 0x42c   :  { %4431 = vmatprep.subr.mxu0 %v1951_v60  ;;  %4393 = vmatmul.mubr.f32.vlgmr.msra.gmra.mxu1 %v1977_v63  ;;  %v2181_v63 = vrot.slane %v5469_v43, 7 }
 0x42d   :  { %4432 = vmatpush3.msra.mxu0 %v1951_v60  ;;  %4433 = vmatprep.mubr.f32.mxu0 %v5444_v2  ;;  %v2186_v60 = vsel %vm320_vm2, %v2178_v45, %v2179_v54 }
 0x42e   :  { %4442 = vmatprep.subr.mxu1 %v2204_v6  ;;  %4434 = vmatmul.mubr.f32.vlgmr.msra.gmra.mxu0 %v5448_v51 }
 0x42f   :  { %4443 = vmatpush3.msra.mxu1 %v2204_v6  ;;  %4483 = vmatprep.subr.mxu0 %v2325_v14  ;;  %v2306_v6 = vsel %vm442_vm3, %v2300_v4, %v2301_v18 }
 0x430   :  { %4444 = vmatprep.subr.mxu1 %v2203_v29  ;;  %4484 = vmatpush3.msra.mxu0 %v2325_v14  ;;  %v2185_v14 = vsel %vm320_vm2, %v2179_v54, %v2180_v8 }
 0x431   :  { %4445 = vmatpush3.msra.mxu1 %v2203_v29  ;;  %4485 = vmatprep.subr.mxu0 %v2324_v16  ;;  %v2303_v29 = vrot.slane %v5446_v3, 1 }
 0x432   :  { %4446 = vmatprep.subr.mxu1 %v2202_v15  ;;  %4486 = vmatpush3.msra.mxu0 %v2324_v16  ;;  %v2305_v16 = vsel %vm442_vm3, %v2301_v18, %v2302_v11 }
 0x433   :  { %4447 = vmatpush3.msra.mxu1 %v2202_v15  ;;  %4487 = vmatprep.subr.mxu0 %v2323_v28  ;;  %v2444_v15 = vld [vmem:[#allocation2 + $0x4e8] sm:$0xff] }
 0x434   :  { %4448 = vmatprep.subr.mxu1 %v2201_v19  ;;  %4488 = vmatpush3.msra.mxu0 %v2323_v28  ;;  %v2184_v28 = vsel %vm320_vm2, %v2180_v8, %v2181_v63 }
 0x435   :  { %4449 = vmatpush3.msra.mxu1 %v2201_v19  ;;  %4489 = vmatprep.subr.mxu0 %v2322_v22  ;;  %v2443_v19 = vld [vmem:[#allocation2 + $0x4e0] sm:$0xff] }
 0x436   :  { %4450 = vmatprep.subr.mxu1 %v2200_v21  ;;  %4490 = vmatpush3.msra.mxu0 %v2322_v22  ;;  %v2420_v22 = vrot.slane %v5448_v51, 2  ;;  %v2441_v51 = vld [vmem:[#allocation2 + $0x4d0] sm:$0xff] }
 0x437   :  { %4451 = vmatpush3.msra.mxu1 %v2200_v21  ;;  %4491 = vmatprep.subr.mxu0 %v2321_v24  ;;  %v2419_v21 = vrot.slane %v5444_v2, 2 }
 0x438   :  { %4452 = vmatprep.subr.mxu1 %v2199_v23  ;;  %4492 = vmatpush3.msra.mxu0 %v2321_v24  ;;  %v2183_v24 = vsel %vm320_vm2, %v2181_v63, %v2182_v58 }
 0x439   :  { %4453 = vmatpush3.msra.mxu1 %v2199_v23  ;;  %4493 = vmatprep.subr.mxu0 %v2320_v26  ;;  %v2304_v23 = vsel %vm442_vm3, %v2302_v11, %v2303_v29 }
 0x43a   :  { %4454 = vmatprep.subr.mxu1 %v2198_v25  ;;  %4494 = vmatpush3.msra.mxu0 %v2320_v26  ;;  %v2309_v26 = vsel %vm442_vm3, %v2303_v29, %v2298_v62 }
 0x43b   :  { %4455 = vmatpush3.msra.mxu1 %v2198_v25  ;;  %4495 = vmatprep.subr.mxu0 %v2319_v31  ;;  %v2442_v25 = vld [vmem:[#allocation2 + $0x4d8] sm:$0xff] }
 0x43c   :  { %4456 = vmatprep.subr.mxu1 %v2197_v27  ;;  %4496 = vmatpush3.msra.mxu0 %v2319_v31  ;;  %v2440_v31 = vld [vmem:[#allocation2 + $0x4c8] sm:$0xff] }
 0x43d   :  { %4457 = vmatpush3.msra.mxu1 %v2197_v27  ;;  %4497 = vmatprep.subr.mxu0 %v2318_v35  ;;  %v2429_v27 = vsel %vm564_vm4, %v2419_v21, %v2420_v22 }
 0x43e   :  { %4458 = vmatprep.subr.mxu1 %v2196_v34  ;;  %4498 = vmatpush3.msra.mxu0 %v2318_v35  ;;  %v2438_v35 = vld [vmem:[#allocation2 + $0x4b8] sm:$0xff] }
 0x43f   :  { %4459 = vmatpush3.msra.mxu1 %v2196_v34  ;;  %4499 = vmatprep.subr.mxu0 %v2317_v38  ;;  %v2439_v34 = vld [vmem:[#allocation2 + $0x4c0] sm:$0xff] }
 0x440   :  { %4460 = vmatprep.subr.mxu1 %v2195_v37  ;;  %4500 = vmatpush3.msra.mxu0 %v2317_v38  ;;  %v2436_v38 = vld [vmem:[#allocation2 + $0x4a8] sm:$0xff] }
 0x441   :  { %4461 = vmatpush3.msra.mxu1 %v2195_v37  ;;  %4501 = vmatprep.subr.mxu0 %v2316_v40  ;;  %v2437_v37 = vld [vmem:[#allocation2 + $0x4b0] sm:$0xff] }
 0x442   :  { %4462 = vmatprep.subr.mxu1 %v2194_v13  ;;  %4502 = vmatpush3.msra.mxu0 %v2316_v40  ;;  %v2433_v40 = vld [vmem:[#allocation2 + $0x490] sm:$0xff] }
 0x443   :  { %4463 = vmatpush3.msra.mxu1 %v2194_v13  ;;  %4395 = vmatprep.mubr.f32.mxu1 %v1976_v44  ;;  %v2434_v13 = vld [vmem:[#allocation2 + $0x498] sm:$0xff]  ;;  %v2421_v44 = vrot.slane %v5463_v32, 2 }
 0x444   :  { %4436 = vmatprep.mubr.f32.mxu0 %v5463_v32  ;;  %4464 = vmatprep.subr.mxu1 %v2193_v46 }
 0x445   :  { %4503 = vmatprep.subr.mxu0 %v2315_v47  ;;  %4396 = vmatmul.mubr.f32.gmra.mxu1 %v1975_v48  ;;  %v2428_v48 = vsel %vm564_vm4, %v2420_v22, %v2421_v44 }
 0x446   :  { %4437 = vmatmul.mubr.f32.gmra.mxu0 %v5465_v36  ;;  %4465 = vmatpush3.msra.mxu1 %v2193_v46  ;;  %v2422_v46 = vrot.slane %v5465_v36, 2 }
 0x447   :  { %4504 = vmatpush3.msra.mxu0 %v2315_v47  ;;  %4466 = vmatprep.subr.mxu1 %v2192_v49  ;;  %v2431_v47 = vld [vmem:[#allocation2 + $0x480] sm:$0xff] }
 0x448   :  { %4505 = vmatprep.subr.mxu0 %v2314_v50  ;;  %4467 = vmatpush3.msra.mxu1 %v2192_v49  ;;  %v2427_v49 = vsel %vm564_vm4, %v2421_v44, %v2422_v46  ;;  %v2426_v32 = vsel %vm564_vm4, %v2422_v46, %v2423_v20 }
 0x449   :  { %4506 = vmatpush3.msra.mxu0 %v2314_v50  ;;  %4398 = vmatprep.mubr.f32.mxu1 %v1974_v53  ;;  %v2424_v50 = vrot.slane %v5446_v3, 2 }
 0x44a   :  { %4439 = vmatprep.mubr.f32.mxu0 %v5469_v43  ;;  %4468 = vmatprep.subr.mxu1 %v2191_v55 }
 0x44b   :  { %4507 = vmatprep.subr.mxu0 %v2313_v56  ;;  %4399 = vmatmul.mubr.f32.gmra.mxu1 %v1973_v33  ;;  %v2425_v36 = vsel %vm564_vm4, %v2423_v20, %v2424_v50  ;;  %v2430_v43 = vsel %vm564_vm4, %v2424_v50, %v2419_v21 }
 0x44c   :  { %4440 = vmatmul.mubr.f32.gmra.mxu0 %v5446_v3  ;;  %4469 = vmatpush3.msra.mxu1 %v2191_v55 }
 0x44d   :  { %4508 = vmatpush3.msra.mxu0 %v2313_v56  ;;  %4470 = vmatprep.subr.mxu1 %v2190_v59 }
 0x44e   :  { %4509 = vmatprep.subr.mxu0 %v2312_v42  ;;  %4471 = vmatpush3.msra.mxu1 %v2190_v59 }
 0x44f   :  { %4510 = vmatpush3.msra.mxu0 %v2312_v42  ;;  %4472 = vmatprep.subr.mxu1 %v2189_v52 }
 0x450   :  { %4511 = vmatprep.subr.mxu0 %v2311_v17  ;;  %4473 = vmatpush3.msra.mxu1 %v2189_v52 }
 0x451   :  { %4474 = vmatprep.mubr.f32.mxu1 %v2188_v1  ;;  %4512 = vmatpush3.msra.mxu0 %v2311_v17 }
 0x452   :  { %4475 = vmatmul.mubr.f32.vlgmr.msra.gmra.mxu1 %v2187_v10  ;;  %4513 = vmatprep.subr.mxu0 %v2310_v5 }
 0x453   :  { %4524 = vmatprep.subr.mxu1 %v2446_v61  ;;  %4514 = vmatpush3.msra.mxu0 %v2310_v5 }
 0x454   :  { %4515 = vmatprep.mubr.f32.mxu0 %v2308_v7  ;;  %4525 = vmatpush3.msra.mxu1 %v2446_v61 }
 0x455   :  { %4516 = vmatmul.mubr.f32.vlgmr.msra.gmra.mxu0 %v2307_v9  ;;  %4526 = vmatprep.subr.mxu1 %v2445_v12 }
 0x456   :  { %4477 = vmatprep.mubr.f32.mxu1 %v2186_v60  ;;  %4527 = vmatpush3.msra.mxu1 %v2445_v12  ;;  %v3191_v60 = vld [vmem:[#allocation8 + $0x3] ss:$0 sm:$0xff] }
 0x457   :  { %4518 = vmatprep.mubr.f32.mxu0 %v2306_v6  ;;  %4478 = vmatmul.mubr.f32.gmra.mxu1 %v2185_v14 }
 0x458   :  { %4528 = vmatprep.subr.mxu1 %v2444_v15  ;;  %4480 = vmatprep.mubr.f32.mxu1 %v2184_v28 }
 0x459   :  { %4529 = vmatpush3.msra.mxu1 %v2444_v15  ;;  %4519 = vmatmul.mubr.f32.gmra.mxu0 %v2305_v16 }
 0x45a   :  { %4530 = vmatprep.subr.mxu1 %v2443_v19  ;;  %4521 = vmatprep.mubr.f32.mxu0 %v2304_v23 }
 0x45b   :  { %4531 = vmatpush3.msra.mxu1 %v2443_v19 }
 0x45c   :  { %4481 = vmatmul.mubr.f32.gmra.mxu1 %v2183_v24  ;;  %4532 = vmatprep.subr.mxu1 %v2442_v25 }
 0x45d   :  { %4533 = vmatpush3.msra.mxu1 %v2442_v25  ;;  %4522 = vmatmul.mubr.f32.gmra.mxu0 %v2309_v26 }
 0x45e   :  { %4534 = vmatprep.subr.mxu1 %v2441_v51  ;;  %4556 = vmatprep.mubr.f32.mxu1 %v2429_v27 }
 0x45f   :  { %4535 = vmatpush3.msra.mxu1 %v2441_v51 }
 0x460   :  { %4536 = vmatprep.subr.mxu1 %v2440_v31 }
 0x461   :  { %4537 = vmatpush3.msra.mxu1 %v2440_v31 }
 0x462   :  { %4538 = vmatprep.subr.mxu1 %v2439_v34 }
 0x463   :  { %4539 = vmatpush3.msra.mxu1 %v2439_v34 }
 0x464   :  { %4540 = vmatprep.subr.mxu1 %v2438_v35 }
 0x465   :  { %4541 = vmatpush3.msra.mxu1 %v2438_v35 }
 0x466   :  { %4542 = vmatprep.subr.mxu1 %v2437_v37 }
 0x467   :  { %4543 = vmatpush3.msra.mxu1 %v2437_v37 }
 0x468   :  { %4544 = vmatprep.subr.mxu1 %v2436_v38 }
 0x469   :  { %4545 = vmatpush3.msra.mxu1 %v2436_v38 }
 0x46a   :  { %4546 = vmatprep.subr.mxu1 %v2435_v39 }
 0x46b   :  { %4547 = vmatpush3.msra.mxu1 %v2435_v39 }
 0x46c   :  { %4548 = vmatprep.subr.mxu1 %v2434_v13 }
 0x46d   :  { %4549 = vmatpush3.msra.mxu1 %v2434_v13 }
 0x46e   :  { %4550 = vmatprep.subr.mxu1 %v2433_v40 }
 0x46f   :  { %4551 = vmatpush3.msra.mxu1 %v2433_v40 }
 0x470   :  { %4552 = vmatprep.subr.mxu1 %v2432_v41 }
 0x471   :  { %4553 = vmatpush3.msra.mxu1 %v2432_v41 }
 0x472   :  { %4554 = vmatprep.subr.mxu1 %v2431_v47 }
 0x473   :  { %4555 = vmatpush3.msra.mxu1 %v2431_v47 }
 0x474   :  { %4557 = vmatmul.mubr.f32.vlgmr.msra.gmra.mxu1 %v2428_v48 }
 0x475   :  { %4559 = vmatprep.mubr.f32.mxu1 %v2427_v49 }
 0x478   :  { %4560 = vmatmul.mubr.f32.gmra.mxu1 %v2426_v32 }
 0x479   :  { %4562 = vmatprep.mubr.f32.mxu1 %v2425_v36 }
 0x47c   :  { %4563 = vmatmul.mubr.f32.gmra.mxu1 %v2430_v43 }
 0x4ec   :  { %v4394_v53 = vpop.f32.mrf.mxu1 }
 0x4ee   :  { %v4435_v55 = vpop.f32.mrf.mxu0  ;;  %v2061_v3 = vpop.f32.mrf.mxu1 }
 0x4ef   :  { %v2157_v7 = vadd.f32 %v4435_v55, %v4394_v53 }
 0x4f0   :  { %v2152_v56 = vpop.f32.mrf.mxu0 }
 0x505   :  { %v4397_v33 = vpop.f32.mrf.mxu1 }
 0x506   :  { %v4438_v57 = vpop.f32.mrf.mxu0 }
 0x507   :  { %v2070_v58 = vpop.f32.mrf.mxu1 }
 0x508   :  { %v2161_v59 = vpop.f32.mrf.mxu0 }
 0x50b   :  { %v4400_v42 = vpop.f32.mrf.mxu1 }
 0x50c   :  { %v4441_v45 = vpop.f32.mrf.mxu0 }
 0x50d   :  { %v2078_v52 = vpop.f32.mrf.mxu1 }
 0x50e   :  { %v2169_v62 = vpop.f32.mrf.mxu0 }
 0x50f   :  { %v2170_v29 = vadd.f32 %v2169_v62, %v2078_v52 }
 0x512   :  { %v4476_v17 = vpop.f32.mrf.mxu1 }
 0x513   :  { %v2296_v8 = vadd.f32 %v4476_v17, %v2157_v7 }
 0x514   :  { %v2271_v0 = vpop.f32.mrf.mxu1 }
 0x515   :  { %v4517_v1 = vpop.f32.mrf.mxu0 }
 0x516   :  { %v2417_v11 = vadd.f32 %v4517_v1, %v2296_v8 }
 0x517   :  { %v2392_v2 = vpop.f32.mrf.mxu0  ;;  %v4479_v4 = vpop.f32.mrf.mxu1 }
 0x519   :  { %v4520_v10 = vpop.f32.mrf.mxu0  ;;  %v2280_v54 = vpop.f32.mrf.mxu1 }
 0x51b   :  { %v2401_v5 = vpop.f32.mrf.mxu0 }
 0x51c   :  { %v4482_v61 = vpop.f32.mrf.mxu1 }
 0x51d   :  { %v4523_v18 = vpop.f32.mrf.mxu0 }
 0x51e   :  { %v2288_v9 = vpop.f32.mrf.mxu1 }
 0x51f   :  { %v2297_v16 = vadd.f32 %v2288_v9, %v2170_v29  ;;  %v2409_v19 = vpop.f32.mrf.mxu0 }
 0x521   :  { %v2418_v22 = vadd.f32 %v2409_v19, %v2297_v16 }
 0x534   :  { %v4558_v12 = vpop.f32.mrf.mxu1 }
 0x535   :  { %v2538_v63 = vadd.f32 %v4558_v12, %v2417_v11 }
 0x536   :  { %v2513_v6 = vpop.f32.mrf.mxu1 }
 0x537   :  { %v2545_v14 = vadd.f32 %v3191_v60, %v2538_v63 }
 0x538   :  { %v4561_v15 = vpop.f32.mrf.mxu1 }
 0x539   :  { %4822 = vtanh.f32 %v2545_v14 }
 0x53a   :  { %v2522_v28 = vpop.f32.mrf.mxu1 }
 0x53c   :  { %v4564_v21 = vpop.f32.mrf.mxu1 }
 0x53e   :  { %v2530_v23 = vpop.f32.mrf.mxu1 }
 0x53f   :  { %v2539_v24 = vadd.f32 %v2530_v23, %v2418_v22 }
 0x541   :  { %v2548_v25 = vadd.f32 %v3191_v60, %v2539_v24 }
 0x543   :  { %4824 = vtanh.f32 %v2548_v25 }
 0x546   :  { %v4823_v26 = vpop.eup %4822 }
 0x547   :  { %2547 = vst [vmem:[#allocation4 + $0x8] sm:$0xff] %v4823_v26 }
 0x550   :  { %v4825_v51 = vpop.eup %4824 }
 0x551   :  { %2550 = vst [vmem:[#allocation4 + $0x20] sm:$0xff] %v4825_v51 }
 0x552   :  { %5010 = dma.done.wait [#allocation3], 10240 }
 0x553   :  { %5011 = vsyncadd [#allocation3], 4294957056  ;;  %v2602_v27 = vld [vmem:[#allocation2 + $0x78] sm:$0xff]  ;;  %v2601_v34 = vld [vmem:[#allocation2 + $0x70] sm:$0xff]  ;;  %s5021_s1 = smov [#allocation10]  }
 0x554   :  { %v2574_v31 = vld [vmem:[#allocation2 + $0x178] sm:$0xff]  ;;  %4565 = vmatprep.subr.mxu0 %v2602_v27  ;;  %v2573_v35 = vld [vmem:[#allocation2 + $0x170] sm:$0xff]  ;;  %v2600_v37 = vld [vmem:[#allocation2 + $0x68] sm:$0xff]  ;;  %s3162_s23 = sshll.u32 %s5021_s1, 4  ;;  %s3163_s23 = int_to_ptr.vmem [resolvable:$true] %s3162_s23 }
 0x555   :  { %4606 = vmatprep.subr.mxu1 %v2574_v31  ;;  %4566 = vmatpush3.msra.mxu0 %v2602_v27  ;;  %v2572_v38 = vld [vmem:[#allocation2 + $0x168] sm:$0xff]  ;;  %v2599_v39 = vld [vmem:[#allocation2 + $0x60] sm:$0xff]  ;;  %v2598_v40 = vld [vmem:[#allocation2 + $0x58] sm:$0xff]  ;;  %s4978_s24 = scalar_lea.vmem %s3163_s23, 256  ;;  %p4983_p7 = scmp.lt.s32.totalorder %s3163_s23, %s3163_s23 }
 0x556   :  { %4607 = vmatpush3.msra.mxu1 %v2574_v31  ;;  %4567 = vmatprep.subr.mxu0 %v2601_v34  ;;  %v2571_v13 = vld [vmem:[#allocation2 + $0x160] sm:$0xff]  ;;  %v2570_v41 = vld [vmem:[#allocation2 + $0x158] sm:$0xff]  ;;  %v2597_v44 = vld [vmem:[#allocation2 + $0x50] sm:$0xff]  ;;  %p4979_p6 = scmp.ne.s32.totalorder %s3163_s23, %s4978_s24  ;;  %p4984_p8 = scmp.lt.s32.totalorder %s4978_s24, %s4978_s24 }
 0x557   :  { %4608 = vmatprep.subr.mxu1 %v2573_v35  ;;  %4568 = vmatpush3.msra.mxu0 %v2601_v34  ;;  %v2569_v46 = vld [vmem:[#allocation2 + $0x150] sm:$0xff]  ;;  %v2596_v47 = vld [vmem:[#allocation2 + $0x48] sm:$0xff]  ;;  %v2595_v20 = vld [vmem:[#allocation2 + $0x40] sm:$0xff] }
 0x558   :  { %4609 = vmatpush3.msra.mxu1 %v2573_v35  ;;  %4569 = vmatprep.subr.mxu0 %v2600_v37  ;;  %v2568_v48 = vld [vmem:[#allocation2 + $0x148] sm:$0xff]  ;;  %v2567_v49 = vld [vmem:[#allocation2 + $0x140] sm:$0xff]  ;;  %v2594_v32 = vld [vmem:[#allocation2 + $0x38] sm:$0xff]  ;;  %p4985_p9 = por %p4984_p8, %p4983_p7 }
 0x559   :  { %4610 = vmatprep.subr.mxu1 %v2572_v38  ;;  %4570 = vmatpush3.msra.mxu0 %v2600_v37  ;;  %v5550_v50 = vld [vmem:[#allocation4] sm:$0xff]  ;;  %v2566_v36 = vld [vmem:[#allocation2 + $0x138] sm:$0xff]  ;;  %v5552_v43 = vld [vmem:[#allocation4 + $0x8] sm:$0xff] }
 0x55a   :  { %4611 = vmatpush3.msra.mxu1 %v2572_v38  ;;  %4571 = vmatprep.subr.mxu0 %v2599_v39  ;;  %v3027_v53 = vrot.slane %v5550_v50, 2  ;;  %v5555_v55 = vld [vmem:[#allocation4 + $0x28] sm:$0xff]  ;;  %v3028_v3 = vrot.slane %v5552_v43, 2  ;;  %v2593_v56 = vld [vmem:[#allocation2 + $0x30] sm:$0xff]  ;;  %v2591_v52 = vld [vmem:[#allocation2 + $0x20] sm:$0xff]  ;;  %v2575_v54 = vrot.slane %v5550_v50, 6  ;;  %p4986_p10 = pnand %p4985_p9, %p4979_p6 }
 0x55b   :  { %4612 = vmatprep.subr.mxu1 %v2571_v13  ;;  %4572 = vmatpush3.msra.mxu0 %v2599_v39  ;;  %v2565_v33 = vld [vmem:[#allocation2 + $0x130] sm:$0xff]  ;;  %v3032_v57 = vrot.slane %v5555_v55, 2  ;;  %v2592_v59 = vld [vmem:[#allocation2 + $0x28] sm:$0xff]  ;;  %v2563_v17 = vld [vmem:[#allocation2 + $0x120] sm:$0xff]  ;;  %v2580_v5 = vrot.slane %v5555_v55, 6  ;;  %v2576_v7 = vrot.slane %v5552_v43, 6 }
 0x55c   :  { %4613 = vmatpush3.msra.mxu1 %v2571_v13  ;;  %4573 = vmatprep.subr.mxu0 %v2598_v40  ;;  %v5563_v58 = vsel %vm564_vm4, %v3027_v53, %v3028_v3  ;;  %v2564_v42 = vld [vmem:[#allocation2 + $0x128] sm:$0xff]  ;;  %v2590_v62 = vld [vmem:[#allocation2 + $0x18] sm:$0xff]  ;;  %v2589_v1 = vld [vmem:[#allocation2 + $0x10] sm:$0xff] }
 0x55d   :  { %4614 = vmatprep.subr.mxu1 %v2570_v41  ;;  %4574 = vmatpush3.msra.mxu0 %v2598_v40  ;;  %v5569_v45 = vsel %vm564_vm4, %v3032_v57, %v3027_v53  ;;  %v2562_v0 = vld [vmem:[#allocation2 + $0x118] sm:$0xff]  ;;  %v2561_v2 = vld [vmem:[#allocation2 + $0x110] sm:$0xff]  ;;  %v2588_v4 = vld [vmem:[#allocation2 + $0x8] sm:$0xff]  ;;  %v2586_v8 = vsel %vm109_vm1, %v2580_v5, %v2575_v54  ;;  %v2585_v12 = vsel %vm109_vm1, %v2575_v54, %v2576_v7 }
 0x55e   :  { %4615 = vmatpush3.msra.mxu1 %v2570_v41  ;;  %4575 = vmatprep.subr.mxu0 %v2597_v44  ;;  %v2560_v10 = vld [vmem:[#allocation2 + $0x108] sm:$0xff]  ;;  %v2587_v61 = vld [vmem:[#allocation2] sm:$0xff]  ;;  %v2812_v9 = vld [vmem:[#allocation2 + $0xf8] sm:$0xff] }
 0x55f   :  { %4616 = vmatprep.subr.mxu1 %v2569_v46  ;;  %4576 = vmatpush3.msra.mxu0 %v2597_v44  ;;  %v2559_v18 = vld [vmem:[#allocation2 + $0x100] sm:$0xff]  ;;  %v2933_v11 = vld [vmem:[#allocation2 + $0x1f8] sm:$0xff]  ;;  %v2811_v60 = vld [vmem:[#allocation2 + $0xf0] sm:$0xff] }
 0x560   :  { %4617 = vmatpush3.msra.mxu1 %v2569_v46  ;;  %4577 = vmatprep.subr.mxu0 %v2596_v47  ;;  %v2932_v63 = vld [vmem:[#allocation2 + $0x1f0] sm:$0xff]  ;;  %v2810_v6 = vld [vmem:[#allocation2 + $0xe8] sm:$0xff]  ;;  %v2809_v14 = vld [vmem:[#allocation2 + $0xe0] sm:$0xff] }
 0x561   :  { %4618 = vmatprep.subr.mxu1 %v2568_v48  ;;  %4578 = vmatpush3.msra.mxu0 %v2596_v47  ;;  %v2931_v29 = vld [vmem:[#allocation2 + $0x1e8] sm:$0xff]  ;;  %v2930_v15 = vld [vmem:[#allocation2 + $0x1e0] sm:$0xff]  ;;  %v2808_v16 = vld [vmem:[#allocation2 + $0xd8] sm:$0xff] }
 0x562   :  { %4619 = vmatpush3.msra.mxu1 %v2568_v48  ;;  %4579 = vmatprep.subr.mxu0 %v2595_v20  ;;  %v2929_v19 = vld [vmem:[#allocation2 + $0x1d8] sm:$0xff]  ;;  %v2807_v28 = vld [vmem:[#allocation2 + $0xd0] sm:$0xff]  ;;  %v2806_v22 = vld [vmem:[#allocation2 + $0xc8] sm:$0xff] }
 0x563   :  { %4620 = vmatprep.subr.mxu1 %v2567_v49  ;;  %4580 = vmatpush3.msra.mxu0 %v2595_v20  ;;  %v2928_v21 = vld [vmem:[#allocation2 + $0x1d0] sm:$0xff]  ;;  %v2927_v23 = vld [vmem:[#allocation2 + $0x1c8] sm:$0xff]  ;;  %v2805_v24 = vld [vmem:[#allocation2 + $0xc0] sm:$0xff] }
 0x564   :  { %4621 = vmatpush3.msra.mxu1 %v2567_v49  ;;  %4581 = vmatprep.subr.mxu0 %v2594_v32  ;;  %v2926_v25 = vld [vmem:[#allocation2 + $0x1c0] sm:$0xff]  ;;  %v5584_v26 = vld [vmem:[#allocation4 + $0x10] sm:$0xff]  ;;  %v2804_v51 = vld [vmem:[#allocation2 + $0xb8] sm:$0xff] }
 0x565   :  { %4622 = vmatprep.subr.mxu1 %v2566_v36  ;;  %4582 = vmatpush3.msra.mxu0 %v2594_v32  ;;  %v2925_v27 = vld [vmem:[#allocation2 + $0x1b8] sm:$0xff]  ;;  %v2803_v34 = vld [vmem:[#allocation2 + $0xb0] sm:$0xff]  ;;  %v2577_v37 = vrot.slane %v5584_v26, 6  ;;  %v2802_v38 = vld [vmem:[#allocation2 + $0xa8] sm:$0xff] }
 0x566   :  { %4623 = vmatpush3.msra.mxu1 %v2566_v36  ;;  %4583 = vmatprep.subr.mxu0 %v2593_v56  ;;  %v5586_v31 = vld [vmem:[#allocation4 + $0x18] sm:$0xff]  ;;  %v2924_v35 = vld [vmem:[#allocation2 + $0x1b0] sm:$0xff]  ;;  %v2923_v39 = vld [vmem:[#allocation2 + $0x1a8] sm:$0xff] }
 0x567   :  { %4624 = vmatprep.subr.mxu1 %v2565_v33  ;;  %4584 = vmatpush3.msra.mxu0 %v2593_v56  ;;  %v2578_v13 = vrot.slane %v5586_v31, 6  ;;  %v5590_v40 = vld [vmem:[#allocation4 + $0x20] sm:$0xff]  ;;  %v2584_v41 = vsel %vm109_vm1, %v2576_v7, %v2577_v37  ;;  %v2800_v20 = vld [vmem:[#allocation2 + $0x98] sm:$0xff]  ;;  %v2799_v36 = vld [vmem:[#allocation2 + $0x90] sm:$0xff] }
 0x568   :  { %4625 = vmatpush3.msra.mxu1 %v2565_v33  ;;  %4585 = vmatprep.subr.mxu0 %v2592_v59  ;;  %v2801_v44 = vld [vmem:[#allocation2 + $0xa0] sm:$0xff]  ;;  %v2579_v48 = vrot.slane %v5590_v40, 6  ;;  %v2921_v49 = vld [vmem:[#allocation2 + $0x198] sm:$0xff]  ;;  %v2920_v53 = vld [vmem:[#allocation2 + $0x190] sm:$0xff]  ;;  %v2785_v33 = vrot.slane %v5550_v50, 7 }
 0x569   :  { %4626 = vmatprep.subr.mxu1 %v2564_v42  ;;  %4586 = vmatpush3.msra.mxu0 %v2592_v59  ;;  %v2922_v46 = vld [vmem:[#allocation2 + $0x1a0] sm:$0xff]  ;;  %v2583_v47 = vsel %vm109_vm1, %v2577_v37, %v2578_v13  ;;  %v2790_v59 = vrot.slane %v5555_v55, 7  ;;  %v3054_v7 = vld [vmem:[#allocation2 + $0x278] sm:$0xff] }
 0x56a   :  { %4627 = vmatpush3.msra.mxu1 %v2564_v42  ;;  %4587 = vmatprep.subr.mxu0 %v2591_v52  ;;  %v2582_v32 = vsel %vm109_vm1, %v2578_v13, %v2579_v48  ;;  %v2581_v56 = vsel %vm109_vm1, %v2579_v48, %v2580_v5  ;;  %v2798_v42 = vld [vmem:[#allocation2 + $0x88] sm:$0xff]  ;;  %v3043_v37 = vld [vmem:[#allocation2 + $0x220] sm:$0xff] }
 0x56b   :  { %4628 = vmatprep.subr.mxu1 %v2563_v17  ;;  %4588 = vmatpush3.msra.mxu0 %v2591_v52  ;;  %v2919_v52 = vld [vmem:[#allocation2 + $0x188] sm:$0xff] }
 0x56c   :  { %4629 = vmatpush3.msra.mxu1 %v2563_v17  ;;  %4589 = vmatprep.subr.mxu0 %v2590_v62  ;;  %v2906_v17 = vrot.slane %v5550_v50, 1  ;;  %v3040_v13 = vld [vmem:[#allocation2 + $0x208] sm:$0xff] }
 0x56d   :  { %4630 = vmatprep.subr.mxu1 %v2562_v0  ;;  %4590 = vmatpush3.msra.mxu0 %v2590_v62  ;;  %v2907_v62 = vrot.slane %v5552_v43, 1 }
 0x56e   :  { %4631 = vmatpush3.msra.mxu1 %v2562_v0  ;;  %4591 = vmatprep.subr.mxu0 %v2589_v1  ;;  %v2786_v0 = vrot.slane %v5552_v43, 7 }
 0x56f   :  { %4632 = vmatprep.subr.mxu1 %v2561_v2  ;;  %4592 = vmatpush3.msra.mxu0 %v2589_v1  ;;  %v2908_v1 = vrot.slane %v5584_v26, 1  ;;  %v2916_v54 = vsel %vm442_vm3, %v2906_v17, %v2907_v62 }
 0x570   :  { %4633 = vmatpush3.msra.mxu1 %v2561_v2  ;;  %4593 = vmatprep.subr.mxu0 %v2588_v4  ;;  %v2797_v2 = vld [vmem:[#allocation2 + $0x80] sm:$0xff]  ;;  %v2795_v5 = vsel %vm320_vm2, %v2785_v33, %v2786_v0 }
 0x571   :  { %4634 = vmatprep.subr.mxu1 %v2560_v10  ;;  %4594 = vmatpush3.msra.mxu0 %v2588_v4  ;;  %v2918_v4 = vld [vmem:[#allocation2 + $0x180] sm:$0xff] }
 0x572   :  { %4635 = vmatpush3.msra.mxu1 %v2560_v10  ;;  %4595 = vmatprep.subr.mxu0 %v2587_v61  ;;  %v2796_v10 = vsel %vm320_vm2, %v2790_v59, %v2785_v33 }
 0x573   :  { %4636 = vmatprep.subr.mxu1 %v2559_v18  ;;  %4596 = vmatpush3.msra.mxu0 %v2587_v61  ;;  %v2915_v61 = vsel %vm442_vm3, %v2907_v62, %v2908_v1 }
 0x574   :  { %4637 = vmatpush3.msra.mxu1 %v2559_v18  ;;  %4638 = vmatprep.mubr.f32.mxu1 %v5550_v50  ;;  %v2787_v18 = vrot.slane %v5584_v26, 7  ;;  %v3045_v50 = vld [vmem:[#allocation2 + $0x230] sm:$0xff] }
 0x575   :  { %4597 = vmatprep.mubr.f32.mxu0 %v2586_v8  ;;  %4639 = vmatmul.mubr.f32.vlgmr.msra.gmra.mxu1 %v5552_v43  ;;  %v2788_v8 = vrot.slane %v5586_v31, 7 }
 0x576   :  { %4647 = vmatprep.subr.mxu0 %v2812_v9  ;;  %4688 = vmatprep.subr.mxu1 %v2933_v11 }
 0x577   :  { %4598 = vmatmul.mubr.f32.vlgmr.msra.gmra.mxu0 %v2585_v12  ;;  %4689 = vmatpush3.msra.mxu1 %v2933_v11  ;;  %v2909_v11 = vrot.slane %v5586_v31, 1  ;;  %v2794_v12 = vsel %vm320_vm2, %v2786_v0, %v2787_v18 }
 0x578   :  { %4648 = vmatpush3.msra.mxu0 %v2812_v9  ;;  %4690 = vmatprep.subr.mxu1 %v2932_v63  ;;  %v3053_v9 = vld [vmem:[#allocation2 + $0x270] sm:$0xff] }
 0x579   :  { %4649 = vmatprep.subr.mxu0 %v2811_v60  ;;  %4691 = vmatpush3.msra.mxu1 %v2932_v63  ;;  %v2910_v63 = vrot.slane %v5590_v40, 1 }
 0x57a   :  { %4650 = vmatpush3.msra.mxu0 %v2811_v60  ;;  %4692 = vmatprep.subr.mxu1 %v2931_v29  ;;  %v2793_v60 = vsel %vm320_vm2, %v2787_v18, %v2788_v8 }
 0x57b   :  { %4651 = vmatprep.subr.mxu0 %v2810_v6  ;;  %4693 = vmatpush3.msra.mxu1 %v2931_v29  ;;  %v2789_v29 = vrot.slane %v5590_v40, 7 }
 0x57c   :  { %4652 = vmatpush3.msra.mxu0 %v2810_v6  ;;  %4694 = vmatprep.subr.mxu1 %v2930_v15  ;;  %v3052_v6 = vld [vmem:[#allocation2 + $0x268] sm:$0xff] }
 0x57d   :  { %4653 = vmatprep.subr.mxu0 %v2809_v14  ;;  %4695 = vmatpush3.msra.mxu1 %v2930_v15  ;;  %v3051_v15 = vld [vmem:[#allocation2 + $0x260] sm:$0xff] }
 0x57e   :  { %4654 = vmatpush3.msra.mxu0 %v2809_v14  ;;  %4696 = vmatprep.subr.mxu1 %v2929_v19  ;;  %v2914_v14 = vsel %vm442_vm3, %v2908_v1, %v2909_v11 }
 0x57f   :  { %4655 = vmatprep.subr.mxu0 %v2808_v16  ;;  %4697 = vmatpush3.msra.mxu1 %v2929_v19  ;;  %v2911_v19 = vrot.slane %v5555_v55, 1 }
 0x580   :  { %4656 = vmatpush3.msra.mxu0 %v2808_v16  ;;  %4698 = vmatprep.subr.mxu1 %v2928_v21  ;;  %v2913_v16 = vsel %vm442_vm3, %v2909_v11, %v2910_v63 }
 0x581   :  { %4657 = vmatprep.subr.mxu0 %v2807_v28  ;;  %4699 = vmatpush3.msra.mxu1 %v2928_v21  ;;  %v2791_v21 = vsel %vm320_vm2, %v2789_v29, %v2790_v59 }
 0x582   :  { %4658 = vmatpush3.msra.mxu0 %v2807_v28  ;;  %4700 = vmatprep.subr.mxu1 %v2927_v23  ;;  %v2792_v28 = vsel %vm320_vm2, %v2788_v8, %v2789_v29  ;;  %v3192_v8 = vld [vmem:[#allocation8 + $0x4] ss:$0 sm:$0xff] }
 0x583   :  { %4659 = vmatprep.subr.mxu0 %v2806_v22  ;;  %4701 = vmatpush3.msra.mxu1 %v2927_v23  ;;  %v2912_v23 = vsel %vm442_vm3, %v2910_v63, %v2911_v19 }
 0x584   :  { %4660 = vmatpush3.msra.mxu0 %v2806_v22  ;;  %4702 = vmatprep.subr.mxu1 %v2926_v25  ;;  %v3050_v22 = vld [vmem:[#allocation2 + $0x258] sm:$0xff] }
 0x585   :  { %4661 = vmatprep.subr.mxu0 %v2805_v24  ;;  %4703 = vmatpush3.msra.mxu1 %v2926_v25  ;;  %v2917_v25 = vsel %vm442_vm3, %v2911_v19, %v2906_v17 }
 0x586   :  { %4662 = vmatpush3.msra.mxu0 %v2805_v24  ;;  %4704 = vmatprep.subr.mxu1 %v2925_v27  ;;  %v3049_v24 = vld [vmem:[#allocation2 + $0x250] sm:$0xff] }
 0x587   :  { %4663 = vmatprep.subr.mxu0 %v2804_v51  ;;  %4705 = vmatpush3.msra.mxu1 %v2925_v27  ;;  %v3047_v27 = vld [vmem:[#allocation2 + $0x240] sm:$0xff] }
 0x588   :  { %4664 = vmatpush3.msra.mxu0 %v2804_v51  ;;  %4706 = vmatprep.subr.mxu1 %v2924_v35  ;;  %v3048_v51 = vld [vmem:[#allocation2 + $0x248] sm:$0xff] }
 0x589   :  { %4665 = vmatprep.subr.mxu0 %v2803_v34  ;;  %4707 = vmatpush3.msra.mxu1 %v2924_v35  ;;  %v3044_v35 = vld [vmem:[#allocation2 + $0x228] sm:$0xff] }
 0x58a   :  { %4666 = vmatpush3.msra.mxu0 %v2803_v34  ;;  %4708 = vmatprep.subr.mxu1 %v2923_v39  ;;  %v3046_v34 = vld [vmem:[#allocation2 + $0x238] sm:$0xff] }
 0x58b   :  { %4667 = vmatprep.subr.mxu0 %v2802_v38  ;;  %4709 = vmatpush3.msra.mxu1 %v2923_v39  ;;  %v3041_v39 = vld [vmem:[#allocation2 + $0x210] sm:$0xff] }
 0x58c   :  { %4668 = vmatpush3.msra.mxu0 %v2802_v38  ;;  %4600 = vmatprep.mubr.f32.mxu0 %v2584_v41  ;;  %v3042_v38 = vld [vmem:[#allocation2 + $0x218] sm:$0xff]  ;;  %v3029_v41 = vrot.slane %v5584_v26, 2 }
 0x58d   :  { %4641 = vmatprep.mubr.f32.mxu1 %v5584_v26  ;;  %4669 = vmatprep.subr.mxu0 %v2801_v44 }
 0x58e   :  { %4710 = vmatprep.subr.mxu1 %v2922_v46  ;;  %4601 = vmatmul.mubr.f32.gmra.mxu0 %v2583_v47  ;;  %v3039_v47 = vld [vmem:[#allocation2 + $0x200] sm:$0xff]  ;;  %v3036_v26 = vsel %vm564_vm4, %v3028_v3, %v3029_v41 }
 0x58f   :  { %4642 = vmatmul.mubr.f32.gmra.mxu1 %v5586_v31  ;;  %4670 = vmatpush3.msra.mxu0 %v2801_v44  ;;  %v3030_v44 = vrot.slane %v5586_v31, 2 }
 0x590   :  { %4711 = vmatpush3.msra.mxu1 %v2922_v46  ;;  %4671 = vmatprep.subr.mxu0 %v2800_v20  ;;  %v3031_v46 = vrot.slane %v5590_v40, 2 }
 0x591   :  { %4712 = vmatprep.subr.mxu1 %v2921_v49  ;;  %4672 = vmatpush3.msra.mxu0 %v2800_v20  ;;  %v3035_v48 = vsel %vm564_vm4, %v3029_v41, %v3030_v44 }
 0x592   :  { %4713 = vmatpush3.msra.mxu1 %v2921_v49  ;;  %4603 = vmatprep.mubr.f32.mxu0 %v2582_v32  ;;  %v3034_v31 = vsel %vm564_vm4, %v3030_v44, %v3031_v46 }
 0x593   :  { %4644 = vmatprep.mubr.f32.mxu1 %v5590_v40  ;;  %4673 = vmatprep.subr.mxu0 %v2799_v36  ;;  %v3033_v40 = vsel %vm564_vm4, %v3031_v46, %v3032_v57 }
 0x594   :  { %4714 = vmatprep.subr.mxu1 %v2920_v53  ;;  %4604 = vmatmul.mubr.f32.gmra.mxu0 %v2581_v56 }
 0x595   :  { %4645 = vmatmul.mubr.f32.gmra.mxu1 %v5555_v55  ;;  %4674 = vmatpush3.msra.mxu0 %v2799_v36 }
 0x596   :  { %4715 = vmatpush3.msra.mxu1 %v2920_v53  ;;  %4675 = vmatprep.subr.mxu0 %v2798_v42 }
 0x597   :  { %4716 = vmatprep.subr.mxu1 %v2919_v52  ;;  %4676 = vmatpush3.msra.mxu0 %v2798_v42 }
 0x598   :  { %4717 = vmatpush3.msra.mxu1 %v2919_v52  ;;  %4677 = vmatprep.subr.mxu0 %v2797_v2 }
 0x599   :  { %4718 = vmatprep.subr.mxu1 %v2918_v4  ;;  %4678 = vmatpush3.msra.mxu0 %v2797_v2 }
 0x59a   :  { %4679 = vmatprep.mubr.f32.mxu0 %v2796_v10  ;;  %4719 = vmatpush3.msra.mxu1 %v2918_v4 }
 0x59b   :  { %4720 = vmatprep.mubr.f32.mxu1 %v2916_v54  ;;  %4680 = vmatmul.mubr.f32.vlgmr.msra.gmra.mxu0 %v2795_v5 }
 0x59c   :  { %4721 = vmatmul.mubr.f32.vlgmr.msra.gmra.mxu1 %v2915_v61  ;;  %4729 = vmatprep.subr.mxu0 %v3054_v7 }
 0x59d   :  { %4770 = vmatprep.subr.mxu1 %v3054_v7  ;;  %4730 = vmatpush3.msra.mxu0 %v3054_v7 }
 0x59e   :  { %4786 = vmatpush3.msra.mxu1 %v3054_v7  ;;  %4731 = vmatprep.subr.mxu0 %v3053_v9 }
 0x59f   :  { %4771 = vmatprep.subr.mxu1 %v3053_v9  ;;  %4682 = vmatprep.mubr.f32.mxu0 %v2794_v12 }
 0x5a0   :  { %4732 = vmatpush3.msra.mxu0 %v3053_v9  ;;  %4787 = vmatpush3.msra.mxu1 %v3053_v9 }
 0x5a1   :  { %4683 = vmatmul.mubr.f32.gmra.mxu0 %v2793_v60  ;;  %4733 = vmatprep.subr.mxu0 %v3052_v6 }
 0x5a2   :  { %4772 = vmatprep.subr.mxu1 %v3052_v6  ;;  %4723 = vmatprep.mubr.f32.mxu1 %v2914_v14 }
 0x5a3   :  { %4734 = vmatpush3.msra.mxu0 %v3052_v6  ;;  %4788 = vmatpush3.msra.mxu1 %v3052_v6 }
 0x5a4   :  { %4735 = vmatprep.subr.mxu0 %v3051_v15  ;;  %4724 = vmatmul.mubr.f32.gmra.mxu1 %v2913_v16 }
 0x5a5   :  { %4773 = vmatprep.subr.mxu1 %v3051_v15  ;;  %4685 = vmatprep.mubr.f32.mxu0 %v2792_v28 }
 0x5a6   :  { %4736 = vmatpush3.msra.mxu0 %v3051_v15  ;;  %4789 = vmatpush3.msra.mxu1 %v3051_v15 }
 0x5a7   :  { %4686 = vmatmul.mubr.f32.gmra.mxu0 %v2791_v21  ;;  %4737 = vmatprep.subr.mxu0 %v3050_v22 }
 0x5a8   :  { %4774 = vmatprep.subr.mxu1 %v3050_v22  ;;  %4726 = vmatprep.mubr.f32.mxu1 %v2912_v23 }
 0x5a9   :  { %4738 = vmatpush3.msra.mxu0 %v3050_v22  ;;  %4790 = vmatpush3.msra.mxu1 %v3050_v22 }
 0x5aa   :  { %4739 = vmatprep.subr.mxu0 %v3049_v24  ;;  %4727 = vmatmul.mubr.f32.gmra.mxu1 %v2917_v25 }
 0x5ab   :  { %4775 = vmatprep.subr.mxu1 %v3049_v24  ;;  %4740 = vmatpush3.msra.mxu0 %v3049_v24 }
 0x5ac   :  { %4791 = vmatpush3.msra.mxu1 %v3049_v24  ;;  %4741 = vmatprep.subr.mxu0 %v3048_v51 }
 0x5ad   :  { %4776 = vmatprep.subr.mxu1 %v3048_v51  ;;  %4742 = vmatpush3.msra.mxu0 %v3048_v51 }
 0x5ae   :  { %4792 = vmatpush3.msra.mxu1 %v3048_v51  ;;  %4743 = vmatprep.subr.mxu0 %v3047_v27 }
 0x5af   :  { %4777 = vmatprep.subr.mxu1 %v3047_v27  ;;  %4744 = vmatpush3.msra.mxu0 %v3047_v27 }
 0x5b0   :  { %4793 = vmatpush3.msra.mxu1 %v3047_v27  ;;  %4745 = vmatprep.subr.mxu0 %v3046_v34 }
 0x5b1   :  { %4778 = vmatprep.subr.mxu1 %v3046_v34  ;;  %4746 = vmatpush3.msra.mxu0 %v3046_v34 }
 0x5b2   :  { %4794 = vmatpush3.msra.mxu1 %v3046_v34  ;;  %4747 = vmatprep.subr.mxu0 %v3045_v50 }
 0x5b3   :  { %4779 = vmatprep.subr.mxu1 %v3045_v50  ;;  %4748 = vmatpush3.msra.mxu0 %v3045_v50 }
 0x5b4   :  { %4795 = vmatpush3.msra.mxu1 %v3045_v50  ;;  %4749 = vmatprep.subr.mxu0 %v3044_v35 }
 0x5b5   :  { %4780 = vmatprep.subr.mxu1 %v3044_v35  ;;  %4750 = vmatpush3.msra.mxu0 %v3044_v35 }
 0x5b6   :  { %4796 = vmatpush3.msra.mxu1 %v3044_v35  ;;  %4751 = vmatprep.subr.mxu0 %v3043_v37 }
 0x5b7   :  { %4781 = vmatprep.subr.mxu1 %v3043_v37  ;;  %4752 = vmatpush3.msra.mxu0 %v3043_v37 }
 0x5b8   :  { %4797 = vmatpush3.msra.mxu1 %v3043_v37  ;;  %4753 = vmatprep.subr.mxu0 %v3042_v38 }
 0x5b9   :  { %4782 = vmatprep.subr.mxu1 %v3042_v38  ;;  %4754 = vmatpush3.msra.mxu0 %v3042_v38 }
 0x5ba   :  { %4798 = vmatpush3.msra.mxu1 %v3042_v38  ;;  %4755 = vmatprep.subr.mxu0 %v3041_v39 }
 0x5bb   :  { %4783 = vmatprep.subr.mxu1 %v3041_v39  ;;  %4756 = vmatpush3.msra.mxu0 %v3041_v39 }
 0x5bc   :  { %4799 = vmatpush3.msra.mxu1 %v3041_v39  ;;  %4757 = vmatprep.subr.mxu0 %v3040_v13 }
 0x5bd   :  { %4784 = vmatprep.subr.mxu1 %v3040_v13  ;;  %4758 = vmatpush3.msra.mxu0 %v3040_v13 }
 0x5be   :  { %4800 = vmatpush3.msra.mxu1 %v3040_v13  ;;  %4759 = vmatprep.subr.mxu0 %v3039_v47 }
 0x5bf   :  { %4785 = vmatprep.subr.mxu1 %v3039_v47  ;;  %4760 = vmatpush3.msra.mxu0 %v3039_v47 }
 0x5c0   :  { %4801 = vmatpush3.msra.mxu1 %v3039_v47  ;;  %4761 = vmatprep.mubr.f32.mxu0 %v5563_v58 }
 0x5c1   :  { %4764 = vmatprep.mubr.f32.mxu1 %v3035_v48  ;;  %4762 = vmatmul.mubr.f32.vlgmr.msra.gmra.mxu0 %v3036_v26 }
 0x5c2   :  { %4765 = vmatmul.mubr.f32.vlgmr.msra.gmra.mxu1 %v3034_v31 }
 0x5c3   :  { %4767 = vmatprep.mubr.f32.mxu1 %v3033_v40 }
 0x5c6   :  { %4768 = vmatmul.mubr.f32.gmra.mxu1 %v5569_v45 }
 0x635   :  { %v4640_v43 = vpop.f32.mrf.mxu1 }
 0x637   :  { %v4599_v3 = vpop.f32.mrf.mxu0  ;;  %v2760_v49 = vpop.f32.mrf.mxu1 }
 0x638   :  { %v2765_v20 = vadd.f32 %v4640_v43, %v4599_v3 }
 0x639   :  { %v2669_v32 = vpop.f32.mrf.mxu0 }
 0x64e   :  { %v4602_v36 = vpop.f32.mrf.mxu0 }
 0x64f   :  { %v4643_v53 = vpop.f32.mrf.mxu1 }
 0x650   :  { %v2678_v56 = vpop.f32.mrf.mxu0 }
 0x651   :  { %v2769_v55 = vpop.f32.mrf.mxu1 }
 0x654   :  { %v4605_v33 = vpop.f32.mrf.mxu0 }
 0x655   :  { %v4646_v30 = vpop.f32.mrf.mxu1 }
 0x656   :  { %v2686_v57 = vpop.f32.mrf.mxu0 }
 0x657   :  { %v2777_v59 = vpop.f32.mrf.mxu1 }
 0x658   :  { %v2778_v61 = vadd.f32 %v2777_v59, %v2686_v57 }
 0x65b   :  { %v4681_v58 = vpop.f32.mrf.mxu0 }
 0x65c   :  { %v4722_v42 = vpop.f32.mrf.mxu1  ;;  %v2904_v10 = vadd.f32 %v4681_v58, %v2765_v20 }
 0x65d   :  { %v2879_v52 = vpop.f32.mrf.mxu0 }
 0x65e   :  { %v3000_v17 = vpop.f32.mrf.mxu1  ;;  %v3025_v18 = vadd.f32 %v4722_v42, %v2904_v10 }
 0x661   :  { %v4684_v62 = vpop.f32.mrf.mxu0 }
 0x663   :  { %v2888_v0 = vpop.f32.mrf.mxu0 }
 0x664   :  { %v4725_v45 = vpop.f32.mrf.mxu1 }
 0x666   :  { %v3009_v2 = vpop.f32.mrf.mxu1 }
 0x667   :  { %v4687_v1 = vpop.f32.mrf.mxu0 }
 0x669   :  { %v2896_v54 = vpop.f32.mrf.mxu0 }
 0x66a   :  { %v4728_v4 = vpop.f32.mrf.mxu1  ;;  %v2905_v11 = vadd.f32 %v2896_v54, %v2778_v61 }
 0x66c   :  { %v3017_v5 = vpop.f32.mrf.mxu1 }
 0x66d   :  { %v3026_v14 = vadd.f32 %v3017_v5, %v2905_v11 }
 0x681   :  { %v4763_v7 = vpop.f32.mrf.mxu0 }
 0x682   :  { %v4766_v9 = vpop.f32.mrf.mxu1  ;;  %v3146_v12 = vadd.f32 %v4763_v7, %v3025_v18 }
 0x683   :  { %v3121_v63 = vpop.f32.mrf.mxu0 }
 0x684   :  { %v3130_v60 = vpop.f32.mrf.mxu1  ;;  %v3153_v6 = vadd.f32 %v3192_v8, %v3146_v12 }
 0x686   :  { %v4769_v29 = vpop.f32.mrf.mxu1  ;;  %3154 = vst [vmem:[#allocation10] sm:$0xff] %v3153_v6 }
 0x688   :  { %v3138_v15 = vpop.f32.mrf.mxu1 }
 0x689   :  { %v3147_v16 = vadd.f32 %v3138_v15, %v3026_v14 }
 0x68b   :  { %v3155_v19 = vadd.f32 %v3192_v8, %v3147_v16 }
 0x68d   :  { %3156 = vst [vmem:[#allocation10 + $0x8] sm:$0xff] %v3155_v19 }
 0x68e   :  { %4989 = shalt.err (!%p4986_p10)
}
 0x68f   :  { %3168 = dma.vmem_to_hbm [thread:$0]  %s3163_s23, 256, %s5679_s3, [#allocation7], %s5015_s15, %s5015_s15, %s5016_s16  }
 0x690   :  { %5012 = dma.done.wait [#allocation7], 256  }
 0x691   :  { %5013 = vsyncadd [#allocation7], 4294967040 }
 0x692   :  { %3172 = vsyncpa [#allocation6], 1 }
 0x693   :  { %3173 = vsyncpa [#allocation9], 1 }
 0x694   :  { %3174 = vsyncpa [#allocation7], 1 }
 0x695   :  { %3175 = vsyncmov [#allocation3] }
 0x698   :  { %s3176_s26 = vpop.sfrf %3175 }
 0x699   :  { %p3193_p11 = scmp.ne.s32.totalorder %s3176_s26, 0 }
 0x69b   :  { %3180 = shalt.err (%p3193_p11)  }
 0x69c   :  { %3182 = vsyncmov [#allocation3 + $0x1] }
 0x69f   :  { %s3183_s27 = vpop.sfrf %3182 }
 0x6a0   :  { %p3194_p12 = scmp.ne.s32.totalorder %s3183_s27, 0 }
 0x6a2   :  { %3187 = shalt.err (%p3194_p12)  }

</bundles_post_ra>
